<compile_context>
chip_gen: v5e
topology: v5e:2x2
jax: 0.10.0
libtpu: 0.0.40
codegen_flags: <defaults>
</compile_context>

<pallas_src>
import functools

import jax
import jax.numpy as jnp
from jax.experimental import pallas as pl
from jax.experimental.pallas import tpu as pltpu

EPS = 1.1920928955078125e-07  # torch.finfo(torch.float32).eps (F.rms_norm default)
ATTN_SCALE = 0.12


def next_multiple_of_n(v, *, n):
    return next(x for x in range(n, int(v) + 1 + n, n) if x >= v)


# ----------------------------------------------------------------------------
# Kernel 1: fused residual mix + rmsnorm + qkv projection
#   mixed = lam0*x + lam1*x0 ; qkv = rmsnorm(mixed) @ Wqkv
# ----------------------------------------------------------------------------
def _mix_norm_qkv_kernel(lam_ref, x_ref, x0_ref, w_ref, mix_ref, qkv_ref):
    m = lam_ref[0] * x_ref[...] + lam_ref[1] * x0_ref[...]
    mix_ref[...] = m
    ms = jnp.mean(m * m, axis=-1, keepdims=True)
    n = m * jax.lax.rsqrt(ms + EPS)
    qkv_ref[...] = jnp.dot(n.astype(jnp.bfloat16), w_ref[...],
                           preferred_element_type=jnp.float32
                           ).astype(qkv_ref.dtype)


def mix_norm_qkv(x, x0, lam, w_bf16, *, tm=256):
    M, D = x.shape
    N = w_bf16.shape[1]
    tm = min(tm, M)
    assert M % tm == 0
    row = pl.BlockSpec((tm, D), lambda i: (i, 0))
    return pl.pallas_call(
        _mix_norm_qkv_kernel,
        out_shape=(jax.ShapeDtypeStruct((M, D), x.dtype),
                   jax.ShapeDtypeStruct((M, N), x.dtype)),
        grid=(M // tm,),
        in_specs=[pl.BlockSpec(memory_space=pltpu.MemorySpace.SMEM),
                  row, row,
                  pl.BlockSpec((D, N), lambda i: (0, 0))],
        out_specs=(row, pl.BlockSpec((tm, N), lambda i: (i, 0))),
        compiler_params=pltpu.CompilerParams(dimension_semantics=("parallel",)),
    )(lam, x, x0, w_bf16)


# ----------------------------------------------------------------------------
# Kernel 2: causal flash attention per (batch*head, q-tile) with fused
#           qk-rmsnorm + rotary (roll-based) + lambda-mixed values.
#   qkv is the flat (B, T, 3*H*hd) projection; head selection is done by the
#   BlockSpec index maps (no transposes).  Output lands in (B, T, H*hd).
# ----------------------------------------------------------------------------
def _attn_kernel(lam_ref, q_ref, k_ref, v_ref, ve_ref, cos_ref, sin_ref,
                 o_ref, m_ref, l_ref, acc_ref, *, tq, scale):
    qi = pl.program_id(1)
    q_start = pl.multiple_of(qi * tq, tq)
    hd = q_ref.shape[-1]
    hd2 = hd // 2

    def norm_rot(x, cos, sin):
        ms = jnp.mean(x * x, axis=-1, keepdims=True)
        xn = x * jax.lax.rsqrt(ms + EPS)
        # full-width rotary: cos = [c, c], sin = [s, -s]  (precomputed on host)
        return xn * cos + pltpu.roll(xn, hd2, 1) * sin

    # q prologue: rmsnorm + rotary, fold attn scale in before the bf16 cast
    qb = (norm_rot(q_ref[...],
                   cos_ref[pl.ds(q_start, tq), :],
                   sin_ref[pl.ds(q_start, tq), :]) * scale).astype(jnp.bfloat16)

    lam0 = lam_ref[0]
    lam1 = lam_ref[1]
    rows = q_start + jax.lax.broadcasted_iota(jnp.int32, (tq, tq), 0)

    m_ref[...] = jnp.full_like(m_ref, -1e30)
    l_ref[...] = jnp.zeros_like(l_ref)
    acc_ref[...] = jnp.zeros_like(acc_ref)

    # online softmax over KV tiles; tiles strictly in the future are skipped
    @pl.loop(0, qi + 1)
    def _(j):
        k_start = pl.multiple_of(j * tq, tq)
        kb = norm_rot(k_ref[pl.ds(k_start, tq), :],
                      cos_ref[pl.ds(k_start, tq), :],
                      sin_ref[pl.ds(k_start, tq), :]).astype(jnp.bfloat16)
        vb = (lam0 * v_ref[pl.ds(k_start, tq), :] +
              lam1 * ve_ref[pl.ds(k_start, tq), :]).astype(jnp.bfloat16)

        s = jax.lax.dot_general(qb, kb, (((1,), (1,)), ((), ())),
                                preferred_element_type=jnp.float32)
        cols = k_start + jax.lax.broadcasted_iota(jnp.int32, (tq, tq), 1)
        s = jnp.where(cols <= rows, s, -1e30)

        m_prev = m_ref[...]
        m_new = jnp.maximum(m_prev, jnp.max(s, axis=-1, keepdims=True))
        alpha = jnp.exp(m_prev - m_new)
        p = jnp.exp(s - m_new)
        l_ref[...] = alpha * l_ref[...] + jnp.sum(p, axis=-1, keepdims=True)
        acc_ref[...] = alpha * acc_ref[...] + jnp.dot(
            p.astype(jnp.bfloat16), vb, preferred_element_type=jnp.float32)
        m_ref[...] = m_new

    o_ref[...] = (acc_ref[...] * pl.reciprocal(l_ref[...], approx=True)
                  ).astype(o_ref.dtype)


def attention(qkv, ve, cos_full, sin_signed, lam, *, num_heads, head_dim,
              scale=ATTN_SCALE, tq=128):
    B, T, _ = qkv.shape
    H, hd = num_heads, head_dim
    hdim = H * hd
    assert hd % 128 == 0
    tq = min(tq, T)
    assert T % tq == 0 and tq % 8 == 0

    q_map = lambda bh, qi: (bh // H, qi, bh % H)
    k_map = lambda bh, qi: (bh // H, 0, H + bh % H)
    v_map = lambda bh, qi: (bh // H, 0, 2 * H + bh % H)
    ve_map = lambda bh, qi: (bh // H, 0, bh % H)
    cs_map = lambda bh, qi: (0, 0)

    kernel = functools.partial(_attn_kernel, tq=tq, scale=scale)
    return pl.pallas_call(
        kernel,
        out_shape=jax.ShapeDtypeStruct((B, T, hdim), qkv.dtype),
        grid=(B * H, T // tq),
        in_specs=[pl.BlockSpec(memory_space=pltpu.MemorySpace.SMEM),
                  pl.BlockSpec((None, tq, hd), q_map),
                  pl.BlockSpec((None, T, hd), k_map),
                  pl.BlockSpec((None, T, hd), v_map),
                  pl.BlockSpec((None, T, hd), ve_map),
                  pl.BlockSpec((T, hd), cs_map),
                  pl.BlockSpec((T, hd), cs_map)],
        out_specs=pl.BlockSpec((None, tq, hd), q_map),
        scratch_shapes=[pltpu.VMEM((tq, 1), jnp.float32),
                        pltpu.VMEM((tq, 1), jnp.float32),
                        pltpu.VMEM((tq, hd), jnp.float32)],
        compiler_params=pltpu.CompilerParams(
            dimension_semantics=("parallel", "parallel")),
    )(lam, qkv, qkv, qkv, ve, cos_full, sin_signed)


# ----------------------------------------------------------------------------
# Kernel 3: fused attn c_proj + residual + rmsnorm + MLP (+ residual),
#           tiled over the MLP hidden dim (reduction axis) with an f32 acc.
#   out = x2 + relu(rmsnorm(x2) @ W1)^2 @ W2 ,  x2 = x1 + y @ Wattn
# ----------------------------------------------------------------------------
def _proj_mlp_kernel(y_ref, x1_ref, wattn_ref, wfc_ref, wproj_ref, o_ref,
                     acc_ref, n2_ref):
    j = pl.program_id(1)

    @pl.when(j == 0)
    def _():
        attn = jnp.dot(y_ref[...].astype(jnp.bfloat16), wattn_ref[...],
                       preferred_element_type=jnp.float32)
        x2 = x1_ref[...] + attn
        acc_ref[...] = x2                       # residual seeds the accumulator
        ms = jnp.mean(x2 * x2, axis=-1, keepdims=True)
        n2_ref[...] = (x2 * jax.lax.rsqrt(ms + EPS)).astype(jnp.bfloat16)

    h = jnp.dot(n2_ref[...], wfc_ref[...], preferred_element_type=jnp.float32)
    h = jnp.maximum(h, 0.0)
    h = h * h
    acc_ref[...] += jnp.dot(h.astype(jnp.bfloat16), wproj_ref[...],
                            preferred_element_type=jnp.float32)

    @pl.when(j == pl.num_programs(1) - 1)
    def _():
        o_ref[...] = acc_ref[...].astype(o_ref.dtype)


def proj_mlp(y, x1, w_attn_bf16, w_fc_bf16, w_proj_bf16, *, tm=256, th=512):
    M, hdim = y.shape
    D = x1.shape[1]
    Hm = w_fc_bf16.shape[1]
    tm = min(tm, M)
    th = min(th, Hm)
    assert M % tm == 0 and Hm % th == 0
    return pl.pallas_call(
        _proj_mlp_kernel,
        out_shape=jax.ShapeDtypeStruct((M, D), x1.dtype),
        grid=(M // tm, Hm // th),
        in_specs=[pl.BlockSpec((tm, hdim), lambda i, j: (i, 0)),
                  pl.BlockSpec((tm, D), lambda i, j: (i, 0)),
                  pl.BlockSpec((hdim, D), lambda i, j: (0, 0)),
                  pl.BlockSpec((D, th), lambda i, j: (0, j)),
                  pl.BlockSpec((th, D), lambda i, j: (j, 0))],
        out_specs=pl.BlockSpec((tm, D), lambda i, j: (i, 0)),
        scratch_shapes=[pltpu.VMEM((tm, D), jnp.float32),
                        pltpu.VMEM((tm, D), jnp.bfloat16)],
        compiler_params=pltpu.CompilerParams(
            dimension_semantics=("parallel", "arbitrary")),
    )(y, x1, w_attn_bf16, w_fc_bf16, w_proj_bf16)


# ----------------------------------------------------------------------------
# Block forward (reshape-only glue in JAX, all compute in 3 Pallas kernels)
# ----------------------------------------------------------------------------
def block_forward(x, ve, x0, params):
    B, T, D = x.shape
    H, hd = params["num_heads"], params["head_dim"]
    hdim = H * hd
    M = B * T

    x_flat = x.reshape(M, D)
    x0_flat = x0.reshape(M, D)

    # K1: x1 = l0*x + l1*x0 ; qkv = rmsnorm(x1) @ Wqkv
    x1, qkv = mix_norm_qkv(x_flat, x0_flat, params["block_lambdas"],
                           params["qkv_w_bf16"])

    # K2: causal attention (head layout handled by BlockSpecs; no transposes)
    qkv_3d = qkv.reshape(B, T, 3 * hdim)                    # free reshape
    y = attention(qkv_3d, ve, params["cos_full"][:T], params["sin_signed"][:T],
                  params["attn_lambdas"], num_heads=H, head_dim=hd)
    y_flat = y.reshape(M, hdim)                             # free reshape

    # K3: x2 = x1 + y @ Wattn ; out = x2 + relu(rmsnorm(x2) @ W1)^2 @ W2
    out = proj_mlp(y_flat, x1, params["c_proj_attn_w_bf16"],
                   params["c_fc_w_bf16"], params["c_proj_mlp_w_bf16"])
    return out.reshape(B, T, D)


# ----------------------------------------------------------------------------
# Pure-JAX references (f32 semantics + bf16-matmul-simulating variant)
# ----------------------------------------------------------------------------
def _rms_norm_ref(x):
    return x * jax.lax.rsqrt(jnp.mean(x * x, axis=-1, keepdims=True) + EPS)


def _rotary_ref(x, cos, sin):
    hd2 = x.shape[-1] // 2
    x1, x2 = x[..., :hd2], x[..., hd2:]
    c = cos[None, :, None, :]
    s = sin[None, :, None, :]
    return jnp.concatenate([x1 * c + x2 * s, -x1 * s + x2 * c], axis=-1)


def block_forward_ref(x, ve, x0, params, cast_bf16=False):
    def c(t):
        return t.astype(jnp.bfloat16) if cast_bf16 else t

    def mm(a, b):
        return jnp.dot(c(a), c(b), preferred_element_type=jnp.float32)

    B, T, D = x.shape
    H, hd = params["num_heads"], params["head_dim"]
    lam = params["block_lambdas"]
    x = lam[0] * x + lam[1] * x0
    n1 = _rms_norm_ref(x)
    qkv = mm(n1, params["qkv_w_t"]).reshape(B, T, 3, H, hd)
    q, k, v = qkv[:, :, 0], qkv[:, :, 1], qkv[:, :, 2]
    cos, sin = params["cos"][:T], params["sin"][:T]
    q = _rotary_ref(_rms_norm_ref(q), cos, sin)
    k = _rotary_ref(_rms_norm_ref(k), cos, sin)
    al = params["attn_lambdas"]
    v = al[0] * v + al[1] * ve.reshape(B, T, H, hd)
    qh, kh, vh = (jnp.transpose(t, (0, 2, 1, 3)) for t in (q, k, v))
    if cast_bf16:
        s = jnp.einsum("bhqd,bhkd->bhqk", c(qh * ATTN_SCALE), c(kh),
                       preferred_element_type=jnp.float32)
    else:
        s = jnp.einsum("bhqd,bhkd->bhqk", qh, kh) * ATTN_SCALE
    mask = jnp.tril(jnp.ones((T, T), bool))
    s = jnp.where(mask[None, None], s, -jnp.inf)
    p = jax.nn.softmax(s, axis=-1)
    y = jnp.einsum("bhqk,bhkd->bhqd", c(p), c(vh),
                   preferred_element_type=jnp.float32)
    y = jnp.transpose(y, (0, 2, 1, 3)).reshape(B, T, H * hd)
    x = x + mm(y, params["c_proj_attn_w_t"])
    n2 = _rms_norm_ref(x)
    h = jnp.square(jnp.maximum(mm(n2, params["c_fc_w_t"]), 0.0))
    return x + mm(h, params["c_proj_mlp_w_t"])


# ----------------------------------------------------------------------------
# Deterministic parameter construction (shapes follow the PyTorch __init__)
# ----------------------------------------------------------------------------
def make_params(key, *, dim, num_heads, head_dim, max_seq_len,
                expansion_factor=4.0):
    hdim = num_heads * head_dim
    mlp_hdim = next_multiple_of_n(int(expansion_factor * dim), n=128)
    k0, k1, k2, k3 = jax.random.split(key, 4)

    bound = (3.0 ** 0.5) * 0.5 * dim ** -0.5
    qkv_w = jax.random.uniform(k0, (3 * hdim, dim), jnp.float32, -bound, bound)
    c_fc_w = jax.random.uniform(k1, (mlp_hdim, dim), jnp.float32, -bound, bound)
    # NOTE: the PyTorch module zero-initializes both c_proj weights; we use
    # small random values instead so the projection kernels do real work.
    c_proj_attn_w = 0.02 * jax.random.normal(k2, (dim, hdim), jnp.float32)
    c_proj_mlp_w = 0.02 * jax.random.normal(k3, (dim, mlp_hdim), jnp.float32)

    # rotary tables (head_dim//4 nonzero freqs + head_dim//4 zeros)
    ang = (1.0 / 1024) ** jnp.linspace(0.0, 1.0, head_dim // 4, dtype=jnp.float32)
    ang = jnp.concatenate([ang, jnp.zeros(head_dim // 4, jnp.float32)])
    t = jnp.arange(max_seq_len, dtype=jnp.float32)
    theta = jnp.outer(t, ang)
    cos, sin = jnp.cos(theta), jnp.sin(theta)

    qkv_w_t = qkv_w.T                    # (dim, 3*hdim)
    c_proj_attn_w_t = c_proj_attn_w.T    # (hdim, dim)
    c_fc_w_t = c_fc_w.T                  # (dim, mlp_hdim)
    c_proj_mlp_w_t = c_proj_mlp_w.T      # (mlp_hdim, dim)

    return {
        "num_heads": num_heads,
        "head_dim": head_dim,
        "block_lambdas": jnp.array([1.0, 0.0], jnp.float32),   # Block.lambdas init
        "attn_lambdas": jnp.array([0.5, 0.5], jnp.float32),    # Attn.lambdas init
        # f32 weights (reference)
        "qkv_w_t": qkv_w_t,
        "c_proj_attn_w_t": c_proj_attn_w_t,
        "c_fc_w_t": c_fc_w_t,
        "c_proj_mlp_w_t": c_proj_mlp_w_t,
        # bf16 copies fed to the kernels (MXU operands; f32 accumulation)
        "qkv_w_bf16": qkv_w_t.astype(jnp.bfloat16),
        "c_proj_attn_w_bf16": c_proj_attn_w_t.astype(jnp.bfloat16),
        "c_fc_w_bf16": c_fc_w_t.astype(jnp.bfloat16),
        "c_proj_mlp_w_bf16": c_proj_mlp_w_t.astype(jnp.bfloat16),
        # rotary: half-width tables (reference) + full-width roll-friendly tables
        "cos": cos,
        "sin": sin,
        "cos_full": jnp.concatenate([cos, cos], axis=-1),
        "sin_signed": jnp.concatenate([sin, -sin], axis=-1),
    }


if __name__ == "__main__":
    B, T = 2, 128
    dim, num_heads, head_dim = 256, 2, 128   # small but tile-friendly shapes
    max_seq_len = 128

    key = jax.random.PRNGKey(0)
    kp, kx, kx0, kve = jax.random.split(key, 4)
    params = make_params(kp, dim=dim, num_heads=num_heads,
                         head_dim=head_dim, max_seq_len=max_seq_len)

    x = jax.random.normal(kx, (B, T, dim), jnp.float32)
    x0 = jax.random.normal(kx0, (B, T, dim), jnp.float32)
    ve = jax.random.normal(kve, (B, T, num_heads * head_dim), jnp.float32)

    out = jax.block_until_ready(block_forward(x, ve, x0, params))

    ref_b16 = jax.block_until_ready(block_forward_ref(x, ve, x0, params, True))
    ref_f32 = jax.block_until_ready(block_forward_ref(x, ve, x0, params, False))

    assert out.shape == (B, T, dim) and out.dtype == jnp.float32
    assert bool(jnp.all(jnp.isfinite(out)))
    # tight check vs. a reference that mimics the kernel's bf16 matmul operands
    assert bool(jnp.allclose(out, ref_b16, rtol=1e-2, atol=1e-2)), (
        float(jnp.max(jnp.abs(out - ref_b16))))
    # loose check vs. the full-f32 reference semantics
    assert bool(jnp.allclose(out, ref_f32, rtol=5e-2, atol=5e-2)), (
        float(jnp.max(jnp.abs(out - ref_f32))))

    print("KERNEL_OK")
</pallas_src>

<mosaic_0001>
module attributes {stable_mosaic.version = 11 : i64} {
  func.func @_mix_norm_qkv_kernel(%arg0: i32, %arg1: memref<2xf32, #tpu.memory_space<smem>>, %arg2: memref<256x256xf32, #tpu.memory_space<vmem>>, %arg3: memref<256x256xf32, #tpu.memory_space<vmem>>, %arg4: memref<256x768xbf16, #tpu.memory_space<vmem>>, %arg5: memref<256x256xf32, #tpu.memory_space<vmem>>, %arg6: memref<256x768xf32, #tpu.memory_space<vmem>>) attributes {dimension_semantics = [#tpu.dimension_semantics<parallel>], iteration_bounds = array<i64: 1>, scalar_prefetch = 0 : i64, scratch_operands = 0 : i64, tpu.core_type = #tpu.core_type<tc>, window_params = [{transform_indices = @transform_0, window_bounds = array<i64: 2>}, {transform_indices = @transform_1, window_bounds = array<i64: 256, 256>}, {transform_indices = @transform_2, window_bounds = array<i64: 256, 256>}, {pipeline_mode = #tpu.pipeline_mode<synchronous>, transform_indices = @transform_3, window_bounds = array<i64: 256, 768>}, {transform_indices = @transform_4, window_bounds = array<i64: 256, 256>}, {transform_indices = @transform_5, window_bounds = array<i64: 256, 768>}]} {
    %c0 = arith.constant 0 : index
    %0 = memref.load %arg1[%c0] : memref<2xf32, #tpu.memory_space<smem>>
    %c0_0 = arith.constant 0 : index
    %c0_1 = arith.constant 0 : index
    %1 = vector.load %arg2[%c0_0, %c0_1] : memref<256x256xf32, #tpu.memory_space<vmem>>, vector<256x256xf32>
    %2 = vector.broadcast %0 : f32 to vector<256x256xf32>
    %3 = arith.mulf %2, %1 : vector<256x256xf32>
    %c1 = arith.constant 1 : index
    %4 = memref.load %arg1[%c1] : memref<2xf32, #tpu.memory_space<smem>>
    %c0_2 = arith.constant 0 : index
    %c0_3 = arith.constant 0 : index
    %5 = vector.load %arg3[%c0_2, %c0_3] : memref<256x256xf32, #tpu.memory_space<vmem>>, vector<256x256xf32>
    %6 = vector.broadcast %4 : f32 to vector<256x256xf32>
    %7 = arith.mulf %6, %5 : vector<256x256xf32>
    %8 = arith.addf %3, %7 : vector<256x256xf32>
    %c0_4 = arith.constant 0 : index
    %c0_5 = arith.constant 0 : index
    %9 = vector.load %arg5[%c0_4, %c0_5] : memref<256x256xf32, #tpu.memory_space<vmem>>, vector<256x256xf32>
    tpu.vector_store %arg5[%c0_4, %c0_5], %8 {strides = array<i32>} : memref<256x256xf32, #tpu.memory_space<vmem>>, vector<256x256xf32>,
    %10 = arith.mulf %8, %8 : vector<256x256xf32>
    %cst = arith.constant dense<0.000000e+00> : vector<256xf32>
    %11 = vector.multi_reduction <add>, %10, %cst [1] : vector<256x256xf32> to vector<256xf32>
    %12 = vector.shape_cast %11 : vector<256xf32> to vector<256x1xf32>
    %cst_6 = arith.constant 2.560000e+02 : f32
    %13 = vector.broadcast %cst_6 : f32 to vector<256x1xf32>
    %14 = arith.divf %12, %13 : vector<256x1xf32>
    %cst_7 = arith.constant 1.1920929E-7 : f32
    %15 = vector.broadcast %cst_7 : f32 to vector<256x1xf32>
    %16 = arith.addf %14, %15 : vector<256x1xf32>
    %17 = math.rsqrt %16 : vector<256x1xf32>
    %18 = vector.broadcast %17 : vector<256x1xf32> to vector<256x256xf32>
    %19 = arith.mulf %8, %18 : vector<256x256xf32>
    %20 = arith.truncf %19 : vector<256x256xf32> to vector<256x256xbf16>
    %c0_8 = arith.constant 0 : index
    %c0_9 = arith.constant 0 : index
    %21 = vector.load %arg4[%c0_8, %c0_9] : memref<256x768xbf16, #tpu.memory_space<vmem>>, vector<256x768xbf16>
    %cst_10 = arith.constant dense<0.000000e+00> : vector<256x768xf32>
    %22 = tpu.matmul %20, %21, %cst_10 {dimension_numbers = #tpu.dot_dimension_numbers<[1], [0], [0], [1], [0, 0, 1, 1], [], []>} : vector<256x256xbf16>, vector<256x768xbf16>, vector<256x768xf32> -> vector<256x768xf32>
    %c0_11 = arith.constant 0 : index
    %c0_12 = arith.constant 0 : index
    %23 = vector.load %arg6[%c0_11, %c0_12] : memref<256x768xf32, #tpu.memory_space<vmem>>, vector<256x768xf32>
    tpu.vector_store %arg6[%c0_11, %c0_12], %22 {strides = array<i32>} : memref<256x768xf32, #tpu.memory_space<vmem>>, vector<256x768xf32>,
    return
  }
  func.func @transform_0(%arg0: i32) -> i32 {
    %c0_i32 = arith.constant 0 : i32
    %c0_i32_0 = arith.constant 0 : i32
    return %c0_i32 : i32
  }
  func.func @transform_1(%arg0: i32) -> (i32, i32) {
    %c0_i32 = arith.constant 0 : i32
    %c0_i32_0 = arith.constant 0 : i32
    return %arg0, %c0_i32 : i32, i32
  }
  func.func @transform_2(%arg0: i32) -> (i32, i32) {
    %c0_i32 = arith.constant 0 : i32
    %c0_i32_0 = arith.constant 0 : i32
    return %arg0, %c0_i32 : i32, i32
  }
  func.func @transform_3(%arg0: i32) -> (i32, i32) {
    %c0_i32 = arith.constant 0 : i32
    %c0_i32_0 = arith.constant 0 : i32
    %c0_i32_1 = arith.constant 0 : i32
    return %c0_i32, %c0_i32_0 : i32, i32
  }
  func.func @transform_4(%arg0: i32) -> (i32, i32) {
    %c0_i32 = arith.constant 0 : i32
    %c0_i32_0 = arith.constant 0 : i32
    return %arg0, %c0_i32 : i32, i32
  }
  func.func @transform_5(%arg0: i32) -> (i32, i32) {
    %c0_i32 = arith.constant 0 : i32
    %c0_i32_0 = arith.constant 0 : i32
    return %arg0, %c0_i32 : i32, i32
  }
}

</mosaic_0001>

<bundles_post_ra>
// kernel: tpu_custom_call.1
= control target key start
LH: loop header
LB: loop body
LE: loop exit
PB: predicated region body
PF: predicated region fallthrough
CT: control target
= control target key end

     0   :  { %11 = vsyncpa [#allocation5], 0  ;;  %s4742_s0 = inlined_call_operand.hbm [shape: f32[2], index: 0, kind: input, shape index: {}]   ;;  %s4743_s1 = inlined_call_operand.hbm [shape: f32[256,256], index: 1, kind: input, shape index: {}]   ;;  %s4744_s2 = inlined_call_operand.hbm [shape: f32[256,256], index: 2, kind: input, shape index: {}]   ;;  %s4745_s3 = inlined_call_operand.hbm [shape: bf16[256,768], index: 3, kind: input, shape index: {}]   ;;  %s4746_s4 = inlined_call_operand.hbm [shape: f32[256,256], index: 4, kind: output, shape index: {0}]   ;;  %s4747_s5 = inlined_call_operand.hbm [shape: f32[256,768], index: 5, kind: output, shape index: {1}]  }
   0x1   :  { %12 = vsyncpa [#allocation3], 0 }
   0x2   :  { %13 = vsyncpa [#allocation8], 0 }
   0x3   :  { %14 = vsyncpa [#allocation4], 0 }
   0x4   :  { %15 = vsyncpa [#allocation12], 0  ;;  %s42_s20 = sshll.u32 %s4744_s2, 4  ;;  %s3755_s21 = smov [#allocation7]   ;;  %s43_s20 = int_to_ptr.hbm [resolvable:$true] %s42_s20 }
   0x5   :  { %s44_s22 = sshll.u32 %s3755_s21, 4  ;;  %s21_s25 = sshll.u32 %s4742_s0, 4  ;;  %s45_s22 = int_to_ptr.vmem [resolvable:$true] %s44_s22  ;;  %s22_s25 = int_to_ptr.hbm [resolvable:$true] %s21_s25 }
   0x6   :  { %s3756_s26 = smov 256   ;;  %s3757_s27 = smov 16  }
   0x7   :  { %50 = dma.hbm_to_vmem [thread:$0]  %s43_s20, 8192, %s45_s22, [#allocation8], %s3756_s26, %s3756_s26, %s3757_s27  }
   0x8   :  { %s3758_s28 = smov [#allocation2]   ;;  %s29_s2 = sshll.u32 %s4743_s1, 4  ;;  %s30_s2 = int_to_ptr.hbm [resolvable:$true] %s29_s2 }
   0x9   :  { %24 = dma.hbm_to_smem %s22_s25, 16, %s3758_s28, [#allocation5]  }
   0xa   :  { %s3759_s6 = smov [#allocation6]   ;;  %s55_s0 = sshll.u32 %s4745_s3, 4  ;;  %s56_s0 = int_to_ptr.hbm [resolvable:$true] %s55_s0 }
   0xb   :  { %s31_s7 = sshll.u32 %s3759_s6, 4  ;;  %s3760_s10 = smov [#allocation9]   ;;  %s32_s7 = int_to_ptr.vmem [resolvable:$true] %s31_s7 }
   0xc   :  { %37 = dma.hbm_to_vmem [thread:$0]  %s30_s2, 8192, %s32_s7, [#allocation3], %s3756_s26, %s3756_s26, %s3757_s27  }
   0xd   :  { %s57_s11 = sshll.u32 %s3760_s10, 4  ;;  %s3761_s12 = smov 384   ;;  %s58_s11 = int_to_ptr.vmem [resolvable:$true] %s57_s11 }
   0xe   :  { %s3762_s13 = smov 24  }
   0xf   :  { %63 = dma.hbm_to_vmem [thread:$0]  %s56_s0, 12288, %s58_s11, [#allocation8], %s3761_s12, %s3761_s12, %s3762_s13  }
  0x10   :  { %3745 = dma.done.wait [#allocation5], 16  }
  0x11   :  { %3746 = vsyncadd [#allocation5], 4294967280 }
  0x12   :  { %3747 = dma.done.wait [#allocation3], 8192  }
  0x13   :  { %3748 = vsyncadd [#allocation3], 4294959104 }
  0x14   :  { %3749 = dma.done.wait [#allocation8], 20480  }
  0x15   :  { %3750 = vsyncadd [#allocation8], 4294946816 }
  0x16   :  { %80 = sfence }
  0x17   :  { %s81_s1 = sld [smem:[#allocation2]]  ;;  %v86_v0 = vld [vmem:[#allocation6 + $0x20] sm:$0xff]  ;;  %v87_v1 = vld [vmem:[#allocation6 + $0x28] sm:$0xff]  ;;  %v88_v9 = vld [vmem:[#allocation6 + $0x30] sm:$0xff]  ;;  %s3764_s14 = smov [#allocation10]  }
  0x18   :  { %s2991_s3 = sld [smem:[#allocation2 + $0x1]]  ;;  %v216_v2 = vld [vmem:[#allocation7 + $0x20] sm:$0xff]  ;;  %v217_v3 = vld [vmem:[#allocation7 + $0x28] sm:$0xff]  ;;  %v89_v10 = vld [vmem:[#allocation6 + $0x38] sm:$0xff]  ;;  %s2956_s15 = sshll.u32 %s3764_s14, 4  ;;  %s2957_s15 = int_to_ptr.vmem [resolvable:$true] %s2956_s15 }
  0x19   :  { %v82_v4 = vld [vmem:[#allocation6] sm:$0xff]  ;;  %v83_v5 = vld [vmem:[#allocation6 + $0x8] sm:$0xff]  ;;  %v218_v11 = vld [vmem:[#allocation7 + $0x30] sm:$0xff]  ;;  %s2958_s18 = sshll.u32 %s4746_s4, 4  ;;  %s3765_s4 = smov [#allocation11]   ;;  %s2959_s18 = int_to_ptr.hbm [resolvable:$true] %s2958_s18 }
  0x1a   :  { %v212_v6 = vld [vmem:[#allocation7] sm:$0xff]  ;;  %v213_v7 = vld [vmem:[#allocation7 + $0x8] sm:$0xff]  ;;  %v219_v16 = vld [vmem:[#allocation7 + $0x38] sm:$0xff]  ;;  %s2969_s19 = sshll.u32 %s3765_s4, 4  ;;  %s2971_s22 = sshll.u32 %s4747_s5, 4  ;;  %s2970_s19 = int_to_ptr.vmem [resolvable:$true] %s2969_s19  ;;  %s2972_s22 = int_to_ptr.hbm [resolvable:$true] %s2971_s22 }
  0x1b   :  { %v84_v21 = vld [vmem:[#allocation6 + $0x10] sm:$0xff]  ;;  %v85_v22 = vld [vmem:[#allocation6 + $0x18] sm:$0xff]  ;;  %v90_v37 = vld [vmem:[#allocation6 + $0x40] sm:$0xff]  ;;  %s3766_s23 = smov 768   ;;  %s3767_s24 = smov 48  }
  0x1c   :  { %v214_v31 = vld [vmem:[#allocation7 + $0x10] sm:$0xff]  ;;  %v215_v32 = vld [vmem:[#allocation7 + $0x18] sm:$0xff]  ;;  %v91_v38 = vld [vmem:[#allocation6 + $0x48] sm:$0xff] }
  0x1d   :  { %v3816_v8 = vstv %s81_s1  ;;  %v220_v43 = vld [vmem:[#allocation7 + $0x40] sm:$0xff]  ;;  %v221_v48 = vld [vmem:[#allocation7 + $0x48] sm:$0xff]  ;;  %v92_v49 = vld [vmem:[#allocation6 + $0x50] sm:$0xff] }
  0x1e   :  { %v151_v12 = vmul.f32 %v3816_v8, %v86_v0  ;;  %v152_v13 = vmul.f32 %v3816_v8, %v87_v1  ;;  %v3820_v14 = vstv %s2991_s3  ;;  %v147_v15 = vmul.f32 %v3816_v8, %v82_v4  ;;  %v93_v58 = vld [vmem:[#allocation6 + $0x58] sm:$0xff]  ;;  %v222_v59 = vld [vmem:[#allocation7 + $0x50] sm:$0xff] }
  0x1f   :  { %v281_v17 = vmul.f32 %v3820_v14, %v216_v2  ;;  %v282_v18 = vmul.f32 %v3820_v14, %v217_v3  ;;  %v148_v19 = vmul.f32 %v3816_v8, %v83_v5  ;;  %v277_v20 = vmul.f32 %v3820_v14, %v212_v6  ;;  %v223_v60 = vld [vmem:[#allocation7 + $0x58] sm:$0xff]  ;;  %v96_v0 = vld [vmem:[#allocation6 + $0x70] sm:$0xff] }
  0x20   :  { %v278_v23 = vmul.f32 %v3820_v14, %v213_v7  ;;  %v153_v24 = vmul.f32 %v3816_v8, %v88_v9  ;;  %v154_v25 = vmul.f32 %v3816_v8, %v89_v10  ;;  %v283_v26 = vmul.f32 %v3820_v14, %v218_v11  ;;  %v97_v1 = vld [vmem:[#allocation6 + $0x78] sm:$0xff]  ;;  %v226_v5 = vld [vmem:[#allocation7 + $0x70] sm:$0xff] }
  0x21   :  { %v345_v27 = vadd.f32 %v281_v17, %v151_v12  ;;  %v346_v28 = vadd.f32 %v282_v18, %v152_v13  ;;  %v341_v29 = vadd.f32 %v277_v20, %v147_v15  ;;  %v284_v30 = vmul.f32 %v3820_v14, %v219_v16  ;;  %v227_v6 = vld [vmem:[#allocation7 + $0x78] sm:$0xff]  ;;  %v94_v12 = vld [vmem:[#allocation6 + $0x60] sm:$0xff]  ;;  %v95_v13 = vld [vmem:[#allocation6 + $0x68] sm:$0xff] }
  0x22   :  { %v342_v33 = vadd.f32 %v278_v23, %v148_v19  ;;  %v347_v34 = vadd.f32 %v283_v26, %v153_v24  ;;  %v149_v35 = vmul.f32 %v3816_v8, %v84_v21  ;;  %v150_v36 = vmul.f32 %v3816_v8, %v85_v22  ;;  %v224_v15 = vld [vmem:[#allocation7 + $0x60] sm:$0xff]  ;;  %v225_v24 = vld [vmem:[#allocation7 + $0x68] sm:$0xff] }
  0x23   :  { %410 = vst [vmem:[#allocation10 + $0x28] sm:$0xff] %v346_v28  ;;  %v473_v39 = vmul.f32 %v345_v27, %v345_v27  ;;  %v474_v40 = vmul.f32 %v346_v28, %v346_v28  ;;  %v469_v41 = vmul.f32 %v341_v29, %v341_v29  ;;  %v348_v42 = vadd.f32 %v284_v30, %v154_v25  ;;  %v98_v25 = vld [vmem:[#allocation6 + $0x80] sm:$0xff]  ;;  %v99_v30 = vld [vmem:[#allocation6 + $0x88] sm:$0xff] }
  0x24   :  { %409 = vst [vmem:[#allocation10 + $0x20] sm:$0xff] %v345_v27  ;;  %v470_v44 = vmul.f32 %v342_v33, %v342_v33  ;;  %v475_v45 = vmul.f32 %v347_v34, %v347_v34  ;;  %v279_v46 = vmul.f32 %v3820_v14, %v214_v31  ;;  %v280_v47 = vmul.f32 %v3820_v14, %v215_v32 }
  0x25   :  { %v539_v50 = vadd.f32 %v474_v40, %v473_v39  ;;  %406 = vst [vmem:[#allocation10 + $0x8] sm:$0xff] %v342_v33  ;;  %v476_v51 = vmul.f32 %v348_v42, %v348_v42  ;;  %v155_v52 = vmul.f32 %v3816_v8, %v90_v37  ;;  %v156_v53 = vmul.f32 %v3816_v8, %v91_v38  ;;  %v229_v40 = vld [vmem:[#allocation7 + $0x88] sm:$0xff] }
  0x26   :  { %v533_v54 = vadd.f32 %v470_v44, %v469_v41  ;;  %405 = vst [vmem:[#allocation10] sm:$0xff] %v341_v29  ;;  %v3838_v55 = vadd.f32 %v279_v46, %v149_v35  ;;  %v3840_v56 = vadd.f32 %v280_v47, %v150_v36  ;;  %v285_v57 = vmul.f32 %v3820_v14, %v220_v43  ;;  %v228_v35 = vld [vmem:[#allocation7 + $0x80] sm:$0xff]  ;;  %v100_v41 = vld [vmem:[#allocation6 + $0x90] sm:$0xff]  ;;  %v231_v47 = vld [vmem:[#allocation7 + $0x98] sm:$0xff] }
  0x27   :  { %540 = vadd.xlane.f32.xlu1 %v539_v50  ;;  %411 = vst [vmem:[#allocation10 + $0x30] sm:$0xff] %v347_v34  ;;  %v542_v61 = vadd.f32 %v476_v51, %v475_v45  ;;  %v286_v62 = vmul.f32 %v3820_v14, %v221_v48  ;;  %v157_v63 = vmul.f32 %v3816_v8, %v92_v49  ;;  %v230_v46 = vld [vmem:[#allocation7 + $0x90] sm:$0xff] }
  0x28   :  { %534 = vadd.xlane.f32.xlu0 %v533_v54  ;;  %412 = vst [vmem:[#allocation10 + $0x38] sm:$0xff] %v348_v42  ;;  %v471_v2 = vmul.f32 %v3838_v55, %v3838_v55  ;;  %v472_v3 = vmul.f32 %v3840_v56, %v3840_v56  ;;  %v349_v4 = vadd.f32 %v285_v57, %v155_v52  ;;  %v101_v42 = vld [vmem:[#allocation6 + $0x98] sm:$0xff]  ;;  %v104_v51 = vld [vmem:[#allocation6 + $0xb0] sm:$0xff] }
  0x29   :  { %407 = vst [vmem:[#allocation10 + $0x10] sm:$0xff] %v3838_v55  ;;  %v350_v7 = vadd.f32 %v286_v62, %v156_v53  ;;  %v158_v9 = vmul.f32 %v3816_v8, %v93_v58  ;;  %v287_v10 = vmul.f32 %v3820_v14, %v222_v59  ;;  %v288_v11 = vmul.f32 %v3820_v14, %v223_v60  ;;  %v105_v52 = vld [vmem:[#allocation6 + $0xb8] sm:$0xff]  ;;  %v234_v59 = vld [vmem:[#allocation7 + $0xb0] sm:$0xff] }
  0x2a   :  { %408 = vst [vmem:[#allocation10 + $0x18] sm:$0xff] %v3840_v56  ;;  %v536_v16 = vadd.f32 %v472_v3, %v471_v2  ;;  %v477_v17 = vmul.f32 %v349_v4, %v349_v4  ;;  %v161_v18 = vmul.f32 %v3816_v8, %v96_v0  ;;  %v162_v19 = vmul.f32 %v3816_v8, %v97_v1  ;;  %v235_v0 = vld [vmem:[#allocation7 + $0xb8] sm:$0xff]  ;;  %v102_v1 = vld [vmem:[#allocation6 + $0xa0] sm:$0xff] }
  0x2b   :  { %414 = vst [vmem:[#allocation10 + $0x48] sm:$0xff] %v350_v7  ;;  %v478_v20 = vmul.f32 %v350_v7, %v350_v7  ;;  %v351_v21 = vadd.f32 %v287_v10, %v157_v63  ;;  %v352_v22 = vadd.f32 %v288_v11, %v158_v9  ;;  %v291_v23 = vmul.f32 %v3820_v14, %v226_v5 }
  0x2c   :  { %413 = vst [vmem:[#allocation10 + $0x40] sm:$0xff] %v349_v4  ;;  %v292_v26 = vmul.f32 %v3820_v14, %v227_v6  ;;  %v159_v27 = vmul.f32 %v3816_v8, %v94_v12  ;;  %v160_v28 = vmul.f32 %v3816_v8, %v95_v13  ;;  %v289_v29 = vmul.f32 %v3820_v14, %v224_v15  ;;  %v103_v6 = vld [vmem:[#allocation6 + $0xa8] sm:$0xff]  ;;  %v232_v12 = vld [vmem:[#allocation7 + $0xa0] sm:$0xff] }
  0x2d   :  { %v545_v31 = vadd.f32 %v478_v20, %v477_v17  ;;  %415 = vst [vmem:[#allocation10 + $0x50] sm:$0xff] %v351_v21  ;;  %v479_v32 = vmul.f32 %v351_v21, %v351_v21  ;;  %v480_v33 = vmul.f32 %v352_v22, %v352_v22  ;;  %v355_v34 = vadd.f32 %v291_v23, %v161_v18  ;;  %v233_v18 = vld [vmem:[#allocation7 + $0xa8] sm:$0xff]  ;;  %v109_v23 = vld [vmem:[#allocation6 + $0xd8] sm:$0xff] }
  0x2e   :  { %416 = vst [vmem:[#allocation10 + $0x58] sm:$0xff] %v352_v22  ;;  %v356_v36 = vadd.f32 %v292_v26, %v162_v19  ;;  %v290_v37 = vmul.f32 %v3820_v14, %v225_v24  ;;  %v353_v38 = vadd.f32 %v289_v29, %v159_v27  ;;  %v163_v39 = vmul.f32 %v3816_v8, %v98_v25  ;;  %v108_v22 = vld [vmem:[#allocation6 + $0xd0] sm:$0xff]  ;;  %v239_v27 = vld [vmem:[#allocation7 + $0xd8] sm:$0xff] }
  0x2f   :  { %543 = vadd.xlane.f32.xlu1 %v542_v61  ;;  %546 = vadd.xlane.f32.xlu2 %v545_v31  ;;  %v548_v43 = vadd.f32 %v480_v33, %v479_v32  ;;  %419 = vst [vmem:[#allocation10 + $0x70] sm:$0xff] %v355_v34  ;;  %v483_v44 = vmul.f32 %v355_v34, %v355_v34  ;;  %v238_v26 = vld [vmem:[#allocation7 + $0xd0] sm:$0xff]  ;;  %v107_v32 = vld [vmem:[#allocation6 + $0xc8] sm:$0xff]  ;;  %v236_v33 = vld [vmem:[#allocation7 + $0xc0] sm:$0xff] }
  0x30   :  { %v164_v45 = vmul.f32 %v3816_v8, %v99_v30  ;;  %537 = vadd.xlane.f32.xlu0 %v536_v16  ;;  %420 = vst [vmem:[#allocation10 + $0x78] sm:$0xff] %v356_v36  ;;  %v484_v48 = vmul.f32 %v356_v36, %v356_v36  ;;  %v354_v49 = vadd.f32 %v290_v37, %v160_v28  ;;  %v106_v28 = vld [vmem:[#allocation6 + $0xc0] sm:$0xff] }
  0x31   :  { %v481_v50 = vmul.f32 %v353_v38, %v353_v38  ;;  %417 = vst [vmem:[#allocation10 + $0x60] sm:$0xff] %v353_v38  ;;  %v293_v53 = vmul.f32 %v3820_v14, %v228_v35  ;;  %v294_v54 = vmul.f32 %v3820_v14, %v229_v40  ;;  %v165_v57 = vmul.f32 %v3816_v8, %v100_v41  ;;  %v237_v38 = vld [vmem:[#allocation7 + $0xc8] sm:$0xff] }
  0x32   :  { %v166_v58 = vmul.f32 %v3816_v8, %v101_v42  ;;  %v554_v60 = vadd.f32 %v484_v48, %v483_v44  ;;  %418 = vst [vmem:[#allocation10 + $0x68] sm:$0xff] %v354_v49  ;;  %v482_v61 = vmul.f32 %v354_v49, %v354_v49  ;;  %v295_v62 = vmul.f32 %v3820_v14, %v230_v46  ;;  %v111_v44 = vld [vmem:[#allocation6 + $0xe8] sm:$0xff] }
  0x33   :  { %v296_v63 = vmul.f32 %v3820_v14, %v231_v47  ;;  %v357_v2 = vadd.f32 %v293_v53, %v163_v39  ;;  %v358_v3 = vadd.f32 %v294_v54, %v164_v45  ;;  %v169_v4 = vmul.f32 %v3816_v8, %v104_v51  ;;  %v240_v45 = vld [vmem:[#allocation7 + $0xe0] sm:$0xff]  ;;  %v241_v54 = vld [vmem:[#allocation7 + $0xe8] sm:$0xff] }
  0x34   :  { %v170_v5 = vmul.f32 %v3816_v8, %v105_v52  ;;  %v551_v7 = vadd.f32 %v482_v61, %v481_v50  ;;  %v359_v9 = vadd.f32 %v295_v62, %v165_v57  ;;  %v299_v11 = vmul.f32 %v3820_v14, %v234_v59  ;;  %v112_v61 = vld [vmem:[#allocation6 + $0xf0] sm:$0xff] }
  0x35   :  { %v360_v10 = vadd.f32 %v296_v63, %v166_v58  ;;  %421 = vst [vmem:[#allocation10 + $0x80] sm:$0xff] %v357_v2  ;;  %v485_v13 = vmul.f32 %v357_v2, %v357_v2  ;;  %v486_v15 = vmul.f32 %v358_v3, %v358_v3  ;;  %v300_v16 = vmul.f32 %v3820_v14, %v235_v0  ;;  %v113_v2 = vld [vmem:[#allocation6 + $0xf8] sm:$0xff] }
  0x36   :  { %v167_v17 = vmul.f32 %v3816_v8, %v102_v1  ;;  %422 = vst [vmem:[#allocation10 + $0x88] sm:$0xff] %v358_v3  ;;  %v487_v19 = vmul.f32 %v359_v9, %v359_v9  ;;  %v168_v21 = vmul.f32 %v3816_v8, %v103_v6  ;;  %v363_v24 = vadd.f32 %v299_v11, %v169_v4  ;;  %v242_v3 = vld [vmem:[#allocation7 + $0xf0] sm:$0xff] }
  0x37   :  { %v488_v20 = vmul.f32 %v360_v10, %v360_v10  ;;  %549 = vadd.xlane.f32.xlu2 %v548_v43  ;;  %555 = vadd.xlane.f32.xlu1 %v554_v60  ;;  %423 = vst [vmem:[#allocation10 + $0x90] sm:$0xff] %v359_v9  ;;  %v297_v25 = vmul.f32 %v3820_v14, %v232_v12  ;;  %v110_v43 = vld [vmem:[#allocation6 + $0xe0] sm:$0xff] }
  0x38   :  { %552 = vadd.xlane.f32.xlu0 %v551_v7  ;;  %v557_v29 = vadd.f32 %v486_v15, %v485_v13  ;;  %424 = vst [vmem:[#allocation10 + $0x98] sm:$0xff] %v360_v10  ;;  %v364_v30 = vadd.f32 %v300_v16, %v170_v5  ;;  %v298_v31 = vmul.f32 %v3820_v14, %v233_v18  ;;  %v243_v7 = vld [vmem:[#allocation7 + $0xf8] sm:$0xff] }
  0x39   :  { %v560_v34 = vadd.f32 %v488_v20, %v487_v19  ;;  %427 = vst [vmem:[#allocation10 + $0xb0] sm:$0xff] %v363_v24  ;;  %v361_v35 = vadd.f32 %v297_v25, %v167_v17  ;;  %v173_v36 = vmul.f32 %v3816_v8, %v108_v22  ;;  %v174_v37 = vmul.f32 %v3816_v8, %v109_v23 }
  0x3a   :  { %428 = vst [vmem:[#allocation10 + $0xb8] sm:$0xff] %v364_v30  ;;  %v362_v39 = vadd.f32 %v298_v31, %v168_v21  ;;  %v303_v40 = vmul.f32 %v3820_v14, %v238_v26  ;;  %v304_v41 = vmul.f32 %v3820_v14, %v239_v27  ;;  %v171_v42 = vmul.f32 %v3816_v8, %v106_v28  ;;  %v116_v28 = vld [vmem:[#allocation6 + $0x110] sm:$0xff] }
  0x3b   :  { %v491_v46 = vmul.f32 %v363_v24, %v363_v24  ;;  %425 = vst [vmem:[#allocation10 + $0xa0] sm:$0xff] %v361_v35  ;;  %v489_v47 = vmul.f32 %v361_v35, %v361_v35  ;;  %v172_v48 = vmul.f32 %v3816_v8, %v107_v32  ;;  %v301_v49 = vmul.f32 %v3820_v14, %v236_v33  ;;  %v247_v33 = vld [vmem:[#allocation7 + $0x118] sm:$0xff]  ;;  %v114_v35 = vld [vmem:[#allocation6 + $0x100] sm:$0xff] }
  0x3c   :  { %426 = vst [vmem:[#allocation10 + $0xa8] sm:$0xff] %v362_v39  ;;  %v490_v50 = vmul.f32 %v362_v39, %v362_v39  ;;  %v367_v51 = vadd.f32 %v303_v40, %v173_v36  ;;  %v368_v52 = vadd.f32 %v304_v41, %v174_v37  ;;  %v302_v53 = vmul.f32 %v3820_v14, %v237_v38  ;;  %v115_v36 = vld [vmem:[#allocation6 + $0x108] sm:$0xff]  ;;  %v244_v40 = vld [vmem:[#allocation7 + $0x100] sm:$0xff] }
  0x3d   :  { %v365_v57 = vadd.f32 %v301_v49, %v171_v42  ;;  %v175_v58 = vmul.f32 %v3816_v8, %v110_v43  ;;  %v176_v59 = vmul.f32 %v3816_v8, %v111_v44  ;;  %v305_v60 = vmul.f32 %v3820_v14, %v240_v45  ;;  %v245_v41 = vld [vmem:[#allocation7 + $0x108] sm:$0xff]  ;;  %v3162_v45 = vld [vmem:[#allocation9 + $0x150] sm:$0xf] }
  0x3e   :  { %v492_v62 = vmul.f32 %v364_v30, %v364_v30  ;;  %v563_v63 = vadd.f32 %v490_v50, %v489_v47  ;;  %431 = vst [vmem:[#allocation10 + $0xd0] sm:$0xff] %v367_v51  ;;  %v495_v0 = vmul.f32 %v367_v51, %v367_v51  ;;  %v366_v1 = vadd.f32 %v302_v53, %v172_v48  ;;  %v246_v30 = vld [vmem:[#allocation7 + $0x110] sm:$0xff]  ;;  %v3469_v50 = vld [vmem:[#allocation9 + $0x2e4] sm:$0xf0] }
  0x3f   :  { %558 = vadd.xlane.f32.xlu2 %v557_v29  ;;  %432 = vst [vmem:[#allocation10 + $0xd8] sm:$0xff] %v368_v52  ;;  %v496_v4 = vmul.f32 %v368_v52, %v368_v52  ;;  %v493_v5 = vmul.f32 %v365_v57, %v365_v57  ;;  %v306_v6 = vmul.f32 %v3820_v14, %v241_v54  ;;  %v117_v29 = vld [vmem:[#allocation6 + $0x118] sm:$0xff]  ;;  %v3354_v47 = vld [vmem:[#allocation9 + $0x2d0] sm:$0xf]  ;;  %v3418_v51 = vld [vmem:[#allocation9 + $0x154] sm:$0xf] }
  0x40   :  { %561 = vadd.xlane.f32.xlu0 %v560_v34  ;;  %564 = vadd.xlane.f32.xlu1 %v563_v63  ;;  %429 = vst [vmem:[#allocation10 + $0xc0] sm:$0xff] %v365_v57  ;;  %v494_v9 = vmul.f32 %v366_v1, %v366_v1  ;;  %v369_v10 = vadd.f32 %v305_v60, %v175_v58  ;;  %v3164_v52 = vld [vmem:[#allocation9 + $0x168] sm:$0xf0]  ;;  %v3763_v58 = vmov 256.0  }
  0x41   :  { %v177_v11 = vmul.f32 %v3816_v8, %v112_v61  ;;  %430 = vst [vmem:[#allocation10 + $0xc8] sm:$0xff] %v366_v1  ;;  %v370_v12 = vadd.f32 %v306_v6, %v176_v59  ;;  %v178_v13 = vmul.f32 %v3816_v8, %v113_v2  ;;  %v307_v15 = vmul.f32 %v3820_v14, %v242_v3  ;;  %v3466_v61 = vld [vmem:[#allocation9 + $0x2d4] sm:$0xf] }
  0x42   :  { %433 = vst [vmem:[#allocation10 + $0xe0] sm:$0xff] %v369_v10  ;;  %v308_v16 = vmul.f32 %v3820_v14, %v243_v7  ;;  %v566_v17 = vadd.f32 %v492_v62, %v491_v46  ;;  %v572_v19 = vadd.f32 %v496_v4, %v495_v0  ;;  %v569_v20 = vadd.f32 %v494_v9, %v493_v5  ;;  %v3421_v46 = vld [vmem:[#allocation9 + $0x164] sm:$0xf0]  ;;  %v3356_v62 = vld [vmem:[#allocation9 + $0x2e8] sm:$0xf0] }
  0x43   :  { %434 = vst [vmem:[#allocation10 + $0xe8] sm:$0xff] %v370_v12  ;;  %v371_v18 = vadd.f32 %v307_v15, %v177_v11  ;;  %v497_v22 = vmul.f32 %v369_v10, %v369_v10  ;;  %v498_v23 = vmul.f32 %v370_v12, %v370_v12  ;;  %v181_v31 = vmul.f32 %v3816_v8, %v116_v28  ;;  %v3138_v4 = vld [vmem:[#allocation9 + $0x120] sm:$0xf]  ;;  %v3415_v5 = vld [vmem:[#allocation9 + $0x134] sm:$0xf0] }
  0x44   :  { %v372_v21 = vadd.f32 %v308_v16, %v178_v13  ;;  %v182_v32 = vmul.f32 %v3816_v8, %v117_v29  ;;  %v311_v34 = vmul.f32 %v3820_v14, %v246_v30  ;;  %v312_v37 = vmul.f32 %v3820_v14, %v247_v33  ;;  %v3330_v9 = vld [vmem:[#allocation9 + $0x2a0] sm:$0xf]  ;;  %v3463_v10 = vld [vmem:[#allocation9 + $0x2b4] sm:$0xf0]  ;;  %v3412_v12 = vld [vmem:[#allocation9 + $0x124] sm:$0xf] }
  0x45   :  { %435 = vst [vmem:[#allocation10 + $0xf0] sm:$0xff] %v371_v18  ;;  %v499_v24 = vmul.f32 %v371_v18, %v371_v18  ;;  %v575_v26 = vadd.f32 %v498_v23, %v497_v22  ;;  %v179_v38 = vmul.f32 %v3816_v8, %v114_v35  ;;  %v180_v39 = vmul.f32 %v3816_v8, %v115_v36  ;;  %v3140_v13 = vld [vmem:[#allocation9 + $0x138] sm:$0xf0]  ;;  %v3460_v15 = vld [vmem:[#allocation9 + $0x2a4] sm:$0xf] }
  0x46   :  { %436 = vst [vmem:[#allocation10 + $0xf8] sm:$0xff] %v372_v21  ;;  %v500_v25 = vmul.f32 %v372_v21, %v372_v21  ;;  %v375_v42 = vadd.f32 %v311_v34, %v181_v31  ;;  %v309_v43 = vmul.f32 %v3820_v14, %v244_v40  ;;  %v310_v44 = vmul.f32 %v3820_v14, %v245_v41  ;;  %v3409_v21 = vld [vmem:[#allocation9 + $0x104] sm:$0xf0]  ;;  %v3306_v22 = vld [vmem:[#allocation9 + $0x270] sm:$0xf] }
  0x47   :  { %567 = vadd.xlane.f32.xlu2 %v566_v17  ;;  %v376_v48 = vadd.f32 %v312_v37, %v182_v32  ;;  %v3163_v49 = vor.u32 %v3421_v46, %v3162_v45  ;;  %3485 = vrcp.f32 %v3763_v58  ;;  %v3355_v59 = vor.u32 %v3469_v50, %v3354_v47  ;;  %v3332_v17 = vld [vmem:[#allocation9 + $0x2b8] sm:$0xf0]  ;;  %v3454_v29 = vld [vmem:[#allocation9 + $0x274] sm:$0xf]  ;;  %v3308_v30 = vld [vmem:[#allocation9 + $0x288] sm:$0xf0] }
  0x48   :  { %573 = vadd.xlane.f32.xlu1 %v572_v19  ;;  %570 = vadd.xlane.f32.xlu0 %v569_v20  ;;  %v578_v27 = vadd.f32 %v500_v25, %v499_v24  ;;  %v503_v53 = vmul.f32 %v375_v42, %v375_v42  ;;  %v373_v54 = vadd.f32 %v309_v43, %v179_v38  ;;  %v3114_v20 = vld [vmem:[#allocation9 + $0xf0] sm:$0xf]  ;;  %v3457_v24 = vld [vmem:[#allocation9 + $0x284] sm:$0xf0]  ;;  %v3406_v25 = vld [vmem:[#allocation9 + $0xf4] sm:$0xf] }
  0x49   :  { %v374_v57 = vadd.f32 %v310_v44, %v180_v39  ;;  %v3167_v60 = vor.u32 %v3418_v51, %v3164_v52  ;;  %439 = vst [vmem:[#allocation10 + $0x110] sm:$0xff] %v375_v42  ;;  %v504_v63 = vmul.f32 %v376_v48, %v376_v48  ;;  %1692 = vmatpush.bf16.msra.mxu0 %v3163_v49  ;;  %v3090_v33 = vld [vmem:[#allocation9 + $0xc0] sm:$0xf]  ;;  %v3403_v34 = vld [vmem:[#allocation9 + $0xd4] sm:$0xf0]  ;;  %v120_v44 = vld [vmem:[#allocation6 + $0x130] sm:$0xff] }
  0x4a   :  { %v3359_v0 = vor.u32 %v3466_v61, %v3356_v62  ;;  %440 = vst [vmem:[#allocation10 + $0x118] sm:$0xff] %v376_v48  ;;  %v501_v1 = vmul.f32 %v373_v54, %v373_v54  ;;  %1781 = vmatpush.bf16.msra.mxu1 %v3355_v59  ;;  %v3139_v7 = vor.u32 %v3415_v5, %v3138_v4  ;;  %v3282_v35 = vld [vmem:[#allocation9 + $0x240] sm:$0xf]  ;;  %v3451_v37 = vld [vmem:[#allocation9 + $0x254] sm:$0xf0]  ;;  %v250_v49 = vld [vmem:[#allocation7 + $0x130] sm:$0xff] }
  0x4b   :  { %v502_v2 = vmul.f32 %v374_v57, %v374_v57  ;;  %1870 = vmatpush.bf16.msra.mxu2 %v3167_v60  ;;  %v584_v3 = vadd.f32 %v504_v63, %v503_v53  ;;  %437 = vst [vmem:[#allocation10 + $0x100] sm:$0xff] %v373_v54  ;;  %v3331_v11 = vor.u32 %v3463_v10, %v3330_v9  ;;  %v3400_v38 = vld [vmem:[#allocation9 + $0xc4] sm:$0xf]  ;;  %v3092_v39 = vld [vmem:[#allocation9 + $0xd8] sm:$0xf0]  ;;  %v119_v9 = vld [vmem:[#allocation6 + $0x128] sm:$0xff] }
  0x4c   :  { %1959 = vmatpush.bf16.msra.mxu3 %v3359_v0  ;;  %438 = vst [vmem:[#allocation10 + $0x108] sm:$0xff] %v374_v57  ;;  %v3143_v16 = vor.u32 %v3412_v12, %v3140_v13  ;;  %v3335_v19 = vor.u32 %v3460_v15, %v3332_v17  ;;  %v3115_v23 = vor.u32 %v3409_v21, %v3114_v20  ;;  %v3448_v42 = vld [vmem:[#allocation9 + $0x244] sm:$0xf]  ;;  %v3284_v43 = vld [vmem:[#allocation9 + $0x258] sm:$0xf0]  ;;  %v249_v12 = vld [vmem:[#allocation7 + $0x128] sm:$0xff] }
  0x4d   :  { %v581_v6 = vadd.f32 %v502_v2, %v501_v1  ;;  %1693 = vmatpush.bf16.msra.mxu0 %v3139_v7  ;;  %v3902_v18 = vpop.eup %3485  ;;  %v3311_v32 = vor.u32 %v3454_v29, %v3308_v30  ;;  %v3091_v36 = vor.u32 %v3403_v34, %v3090_v33  ;;  %v3283_v40 = vor.u32 %v3451_v37, %v3282_v35  ;;  %v121_v47 = vld [vmem:[#allocation6 + $0x138] sm:$0xff]  ;;  %v3066_v51 = vld [vmem:[#allocation9 + $0x90] sm:$0xf]  ;;  %v3397_v52 = vld [vmem:[#allocation9 + $0xa4] sm:$0xf0] }
  0x4e   :  { %1782 = vmatpush.bf16.msra.mxu1 %v3331_v11  ;;  %v630_v31 = vmul.f32 256.0, %v3902_v18  ;;  %v3095_v41 = vor.u32 %v3400_v38, %v3092_v39  ;;  %v3287_v46 = vor.u32 %v3448_v42, %v3284_v43  ;;  %v185_v48 = vmul.f32 %v3816_v8, %v120_v44  ;;  %v251_v50 = vld [vmem:[#allocation7 + $0x138] sm:$0xff]  ;;  %v3258_v53 = vld [vmem:[#allocation9 + $0x210] sm:$0xf]  ;;  %v3445_v60 = vld [vmem:[#allocation9 + $0x224] sm:$0xf0] }
  0x4f   :  { %576 = vadd.xlane.f32.xlu2 %v575_v26  ;;  %1871 = vmatpush.bf16.msra.mxu2 %v3143_v16  ;;  %v3116_v26 = vld [vmem:[#allocation9 + $0x108] sm:$0xf0]  ;;  %v186_v54 = vmul.f32 %v3816_v8, %v121_v47  ;;  %v315_v57 = vmul.f32 %v3820_v14, %v250_v49  ;;  %v316_v58 = vmul.f32 %v3820_v14, %v251_v50  ;;  %v3394_v61 = vld [vmem:[#allocation9 + $0x94] sm:$0xf]  ;;  %v118_v5 = vld [vmem:[#allocation6 + $0x120] sm:$0xff]  ;;  %vm634_vm0 = vweird.f32 %v3902_v18 }
  0x50   :  { %579 = vadd.xlane.f32.xlu0 %v578_v27  ;;  %582 = vadd.xlane.f32.xlu1 %v581_v6  ;;  %v3307_v27 = vor.u32 %v3457_v24, %v3306_v22  ;;  %v3119_v28 = vor.u32 %v3406_v25, %v3116_v26  ;;  %v631_v45 = vsub.f32 1.0, %v630_v31  ;;  %v3067_v59 = vor.u32 %v3397_v52, %v3066_v51  ;;  %v3068_v62 = vld [vmem:[#allocation9 + $0xa8] sm:$0xf0]  ;;  %v3442_v1 = vld [vmem:[#allocation9 + $0x214] sm:$0xf]  ;;  %v248_v11 = vld [vmem:[#allocation7 + $0x120] sm:$0xff] }
  0x51   :  { %1960 = vmatpush.bf16.msra.mxu3 %v3335_v19  ;;  %1694 = vmatpush.bf16.msra.mxu0 %v3115_v23  ;;  %v3259_v63 = vor.u32 %v3445_v60, %v3258_v53  ;;  %v3071_v0 = vor.u32 %v3394_v61, %v3068_v62  ;;  %v3260_v2 = vld [vmem:[#allocation9 + $0x228] sm:$0xf0]  ;;  %v380_v4 = vadd.f32 %v316_v58, %v186_v54  ;;  %v3042_v17 = vld [vmem:[#allocation9 + $0x60] sm:$0xf]  ;;  %v3391_v19 = vld [vmem:[#allocation9 + $0x74] sm:$0xf0] }
  0x52   :  { %1783 = vmatpush.bf16.msra.mxu1 %v3307_v27  ;;  %v632_v6 = vmul.f32 %v3902_v18, %v631_v45  ;;  %v3263_v7 = vor.u32 %v3442_v1, %v3260_v2  ;;  %v183_v10 = vmul.f32 %v3816_v8, %v118_v5  ;;  %v184_v16 = vmul.f32 %v3816_v8, %v119_v9  ;;  %v3234_v23 = vld [vmem:[#allocation9 + $0x1e0] sm:$0xf]  ;;  %v3439_v24 = vld [vmem:[#allocation9 + $0x1f4] sm:$0xf0]  ;;  %v3388_v27 = vld [vmem:[#allocation9 + $0x64] sm:$0xf] }
  0x53   :  { %1872 = vmatpush.bf16.msra.mxu2 %v3119_v28  ;;  %v508_v15 = vmul.f32 %v380_v4, %v380_v4  ;;  %444 = vst [vmem:[#allocation10 + $0x138] sm:$0xff] %v380_v4  ;;  %v313_v20 = vmul.f32 %v3820_v14, %v248_v11  ;;  %v314_v21 = vmul.f32 %v3820_v14, %v249_v12  ;;  %v3044_v28 = vld [vmem:[#allocation9 + $0x78] sm:$0xf0]  ;;  %v3436_v29 = vld [vmem:[#allocation9 + $0x1e4] sm:$0xf]  ;;  %v123_v5 = vld [vmem:[#allocation6 + $0x148] sm:$0xff] }
  0x54   :  { %v3043_v22 = vor.u32 %v3391_v19, %v3042_v17  ;;  %v3235_v26 = vor.u32 %v3439_v24, %v3234_v23  ;;  %v3236_v33 = vld [vmem:[#allocation9 + $0x1f8] sm:$0xf0]  ;;  %v633_v34 = vadd.f32 %v3902_v18, %v632_v6  ;;  %v3385_v37 = vld [vmem:[#allocation9 + $0x44] sm:$0xf0]  ;;  %v3210_v38 = vld [vmem:[#allocation9 + $0x1b0] sm:$0xf] }
  0x55   :  { %1961 = vmatpush.bf16.msra.mxu3 %v3311_v32  ;;  %1695 = vmatpush.bf16.msra.mxu0 %v3091_v36  ;;  %v377_v30 = vadd.f32 %v313_v20, %v183_v10  ;;  %v378_v31 = vadd.f32 %v314_v21, %v184_v16  ;;  %v3047_v32 = vor.u32 %v3388_v27, %v3044_v28  ;;  %v3018_v36 = vld [vmem:[#allocation9 + $0x30] sm:$0xf]  ;;  %v3433_v42 = vld [vmem:[#allocation9 + $0x1c4] sm:$0xf0]  ;;  %v3382_v43 = vld [vmem:[#allocation9 + $0x34] sm:$0xf] }
  0x56   :  { %1784 = vmatpush.bf16.msra.mxu1 %v3283_v40  ;;  %v3239_v35 = vor.u32 %v3436_v29, %v3236_v33  ;;  %v3211_v44 = vor.u32 %v3433_v42, %v3210_v38  ;;  %v3020_v45 = vld [vmem:[#allocation9 + $0x48] sm:$0xf0]  ;;  %v2994_v51 = vld [vmem:[#allocation9] sm:$0xf]  ;;  %v3379_v52 = vld [vmem:[#allocation9 + $0x14] sm:$0xf0]  ;;  %v3917_v54 = vsel %vm634_vm0, %v3902_v18, %v633_v34  ;;  %v188_v10 = vmul.f32 %v3816_v8, %v123_v5 }
  0x57   :  { %585 = vadd.xlane.f32.xlu2 %v584_v3  ;;  %1873 = vmatpush.bf16.msra.mxu2 %v3095_v41  ;;  %v379_v3 = vadd.f32 %v315_v57, %v185_v48  ;;  %441 = vst [vmem:[#allocation10 + $0x120] sm:$0xff] %v377_v30  ;;  %v505_v39 = vmul.f32 %v377_v30, %v377_v30  ;;  %v3212_v49 = vld [vmem:[#allocation9 + $0x1c8] sm:$0xf0]  ;;  %v3186_v53 = vld [vmem:[#allocation9 + $0x180] sm:$0xf]  ;;  %v254_v16 = vld [vmem:[#allocation7 + $0x150] sm:$0xff] }
  0x58   :  { %v506_v40 = vmul.f32 %v378_v31, %v378_v31  ;;  %v3019_v41 = vor.u32 %v3385_v37, %v3018_v36  ;;  %442 = vst [vmem:[#allocation10 + $0x128] sm:$0xff] %v378_v31  ;;  %v3023_v48 = vor.u32 %v3382_v43, %v3020_v45  ;;  %v2995_v57 = vor.u32 %v3379_v52, %v2994_v51  ;;  %v3427_v58 = vld [vmem:[#allocation9 + $0x194] sm:$0xf0]  ;;  %v2996_v60 = vld [vmem:[#allocation9 + $0x18] sm:$0xf0]  ;;  %v122_v2 = vld [vmem:[#allocation6 + $0x140] sm:$0xff] }
  0x59   :  { %1962 = vmatpush.bf16.msra.mxu3 %v3287_v46  ;;  %1696 = vmatpush.bf16.msra.mxu0 %v3067_v59  ;;  %443 = vst [vmem:[#allocation10 + $0x130] sm:$0xff] %v379_v3  ;;  %v507_v13 = vmul.f32 %v379_v3, %v379_v3  ;;  %v3430_v46 = vld [vmem:[#allocation9 + $0x1b4] sm:$0xf]  ;;  %v3376_v59 = vld [vmem:[#allocation9 + $0x4] sm:$0xf]  ;;  %v3187_v62 = vor.u32 %v3427_v58, %v3186_v53  ;;  %v255_v21 = vld [vmem:[#allocation7 + $0x158] sm:$0xff] }
  0x5a   :  { %1785 = vmatpush.bf16.msra.mxu1 %v3259_v63  ;;  %v587_v47 = vadd.f32 %v506_v40, %v505_v39  ;;  %v3215_v50 = vor.u32 %v3430_v46, %v3212_v49  ;;  %v2999_v63 = vor.u32 %v3376_v59, %v2996_v60  ;;  %v3188_v1 = vld [vmem:[#allocation9 + $0x198] sm:$0xf0]  ;;  %v187_v18 = vmul.f32 %v3816_v8, %v122_v2  ;;  %v252_v6 = vld [vmem:[#allocation7 + $0x140] sm:$0xff]  ;;  %v3172_v39 = vld [vmem:[#allocation9 + $0x170] sm:$0xf0] }
  0x5b   :  { %1874 = vmatpush.bf16.msra.mxu2 %v3071_v0  ;;  %v590_v25 = vadd.f32 %v508_v15, %v507_v13  ;;  %v3424_v0 = vld [vmem:[#allocation9 + $0x184] sm:$0xf]  ;;  %v317_v11 = vmul.f32 %v3820_v14, %v252_v6  ;;  %v124_v13 = vld [vmem:[#allocation6 + $0x150] sm:$0xff]  ;;  %v125_v15 = vld [vmem:[#allocation6 + $0x158] sm:$0xff] }
  0x5c   :  { %588 = vadd.xlane.f32.xlu0 %v587_v47  ;;  %v3191_v4 = vor.u32 %v3424_v0, %v3188_v1  ;;  %v189_v19 = vmul.f32 %v3816_v8, %v124_v13  ;;  %v190_v20 = vmul.f32 %v3816_v8, %v125_v15  ;;  %v3419_v38 = vld [vmem:[#allocation9 + $0x15c] sm:$0xf]  ;;  %v3170_v45 = vld [vmem:[#allocation9 + $0x158] sm:$0xf]  ;;  %v3422_v49 = vld [vmem:[#allocation9 + $0x16c] sm:$0xf0] }
  0x5d   :  { %1963 = vmatpush.bf16.msra.mxu3 %v3263_v7  ;;  %1697 = vmatpush.bf16.msra.mxu0 %v3043_v22  ;;  %v253_v7 = vld [vmem:[#allocation7 + $0x148] sm:$0xff]  ;;  %v319_v22 = vmul.f32 %v3820_v14, %v254_v16  ;;  %v381_v24 = vadd.f32 %v317_v11, %v187_v18  ;;  %v3467_v40 = vld [vmem:[#allocation9 + $0x2dc] sm:$0xf]  ;;  %v3175_v43 = vor.u32 %v3419_v38, %v3172_v39  ;;  %v3362_v53 = vld [vmem:[#allocation9 + $0x2d8] sm:$0xf] }
  0x5e   :  { %591 = vadd.xlane.f32.xlu1 %v590_v25  ;;  %1786 = vmatpush.bf16.msra.mxu1 %v3235_v26  ;;  %v318_v12 = vmul.f32 %v3820_v14, %v253_v7  ;;  %v320_v26 = vmul.f32 %v3820_v14, %v255_v21  ;;  %v3171_v52 = vor.u32 %v3422_v49, %v3170_v45  ;;  %v257_v38 = vld [vmem:[#allocation7 + $0x168] sm:$0xff] }
  0x5f   :  { %1875 = vmatpush.bf16.msra.mxu2 %v3047_v32  ;;  %v383_v27 = vadd.f32 %v319_v22, %v189_v19  ;;  %445 = vst [vmem:[#allocation10 + $0x140] sm:$0xff] %v381_v24  ;;  %v509_v28 = vmul.f32 %v381_v24, %v381_v24  ;;  %v126_v24 = vld [vmem:[#allocation6 + $0x160] sm:$0xff]  ;;  %v322_v49 = vmul.f32 %v3820_v14, %v257_v38 }
  0x60   :  { %v382_v25 = vadd.f32 %v318_v12, %v188_v10  ;;  %v384_v31 = vadd.f32 %v320_v26, %v190_v20 }
  0x61   :  { %1964 = vmatpush.bf16.msra.mxu3 %v3239_v35  ;;  %1698 = vmatpush.bf16.msra.mxu0 %v3019_v41  ;;  %v511_v32 = vmul.f32 %v383_v27, %v383_v27  ;;  %447 = vst [vmem:[#allocation10 + $0x150] sm:$0xff] %v383_v27 }
  0x62   :  { %1787 = vmatpush.bf16.msra.mxu1 %v3211_v44  ;;  %v510_v29 = vmul.f32 %v382_v25, %v382_v25  ;;  %446 = vst [vmem:[#allocation10 + $0x148] sm:$0xff] %v382_v25  ;;  %v512_v41 = vmul.f32 %v384_v31, %v384_v31  ;;  %v3364_v44 = vld [vmem:[#allocation9 + $0x2f0] sm:$0xf0] }
  0x63   :  { %1876 = vmatpush.bf16.msra.mxu2 %v3023_v48  ;;  %448 = vst [vmem:[#allocation10 + $0x158] sm:$0xff] %v384_v31  ;;  %v3367_v47 = vor.u32 %v3467_v40, %v3364_v44  ;;  %v256_v31 = vld [vmem:[#allocation7 + $0x160] sm:$0xff] }
  0x64   :  { %v593_v35 = vadd.f32 %v510_v29, %v509_v28  ;;  %v596_v48 = vadd.f32 %v512_v41, %v511_v32  ;;  %v191_v29 = vmul.f32 %v3816_v8, %v126_v24  ;;  %v321_v41 = vmul.f32 %v3820_v14, %v256_v31  ;;  %v133_v24 = vld [vmem:[#allocation6 + $0x198] sm:$0xff]  ;;  %v130_v31 = vld [vmem:[#allocation6 + $0x180] sm:$0xff] }
  0x65   :  { %1965 = vmatpush.bf16.msra.mxu3 %v3215_v50  ;;  %1699 = vmatpush.bf16.msra.mxu0 %v2995_v57  ;;  %v3470_v57 = vld [vmem:[#allocation9 + $0x2ec] sm:$0xf0] }
  0x66   :  { %1788 = vmatpush.bf16.msra.mxu1 %v3187_v62  ;;  %594 = vadd.xlane.f32.xlu2 %v593_v35  ;;  %v3363_v60 = vor.u32 %v3470_v57, %v3362_v53  ;;  %v129_v62 = vld [vmem:[#allocation6 + $0x178] sm:$0xff]  ;;  %v3552_v53 = vld [vmem:[#allocation10 + $0x8] sm:$0xff] }
  0x67   :  { %1877 = vmatpush.bf16.msra.mxu2 %v2999_v63  ;;  %597 = vadd.xlane.f32.xlu0 %v596_v48  ;;  %v258_v63 = vld [vmem:[#allocation7 + $0x170] sm:$0xff]  ;;  %v194_v2 = vmul.f32 %v3816_v8, %v129_v62 }
  0x69   :  { %1966 = vmatpush.bf16.msra.mxu3 %v3191_v4  ;;  %2048 = vmatpush.bf16.msrb.mxu0 %v3171_v52  ;;  %v323_v4 = vmul.f32 %v3820_v14, %v258_v63 }
  0x6a   :  { %2137 = vmatpush.bf16.msrb.mxu1 %v3363_v60 }
  0x6b   :  { %2226 = vmatpush.bf16.msrb.mxu2 %v3175_v43 }
  0x6d   :  { %2315 = vmatpush.bf16.msrb.mxu3 %v3367_v47 }
  0x9a   :  { %v541_v61 = vpop.xlane.xlu1 %540 }
  0x9b   :  { %v535_v3 = vpop.xlane.xlu0 %534  ;;  %v638_v17 = vmul.f32 %v3917_v54, %v541_v61  ;;  %v128_v61 = vld [vmem:[#allocation6 + $0x170] sm:$0xff] }
  0x9c   :  { %v636_v9 = vmul.f32 %v3917_v54, %v535_v3  ;;  %v193_v1 = vmul.f32 %v3816_v8, %v128_v61  ;;  %v259_v3 = vld [vmem:[#allocation7 + $0x178] sm:$0xff] }
  0x9d   :  { %v3932_v30 = vadd.f32 1.1920929e-07, %v638_v17  ;;  %v324_v7 = vmul.f32 %v3820_v14, %v259_v3 }
  0x9e   :  { %v3928_v23 = vadd.f32 1.1920929e-07, %v636_v9  ;;  %v387_v9 = vadd.f32 %v323_v4, %v193_v1 }
  0x9f   :  { %v388_v12 = vadd.f32 %v324_v7, %v194_v2  ;;  %vm726_vm7 = vweird.f32 %v3932_v30  ;;  %v3413_v7 = vld [vmem:[#allocation9 + $0x12c] sm:$0xf] }
  0xa0   :  { %3487 = vrsqrt.f32 %v3928_v23  ;;  %451 = vst [vmem:[#allocation10 + $0x170] sm:$0xff] %v387_v9  ;;  %vm706_vm2 = vweird.f32 %v3928_v23 }
  0xa1   :  { %3489 = vrsqrt.f32 %v3932_v30  ;;  %452 = vst [vmem:[#allocation10 + $0x178] sm:$0xff] %v388_v12  ;;  %v516_v35 = vmul.f32 %v388_v12, %v388_v12 }
  0xa2   :  { %v544_v33 = vpop.xlane.xlu1 %543  ;;  %v547_v34 = vpop.xlane.xlu2 %546 }
  0xa3   :  { %v639_v36 = vmul.f32 %v3917_v54, %v544_v33  ;;  %v538_v37 = vpop.xlane.xlu0 %537  ;;  %v640_v6 = vmul.f32 %v3917_v54, %v547_v34  ;;  %v515_v34 = vmul.f32 %v387_v9, %v387_v9  ;;  %v3148_v9 = vld [vmem:[#allocation9 + $0x140] sm:$0xf0] }
  0xa4   :  { %v637_v42 = vmul.f32 %v3917_v54, %v538_v37  ;;  %v127_v37 = vld [vmem:[#allocation6 + $0x168] sm:$0xff] }
  0xa5   :  { %v3937_v46 = vadd.f32 1.1920929e-07, %v639_v36  ;;  %v3961_v19 = vadd.f32 1.1920929e-07, %v640_v6  ;;  %v602_v40 = vadd.f32 %v516_v35, %v515_v34  ;;  %v192_v48 = vmul.f32 %v3816_v8, %v127_v37  ;;  %v261_v34 = vld [vmem:[#allocation7 + $0x188] sm:$0xff] }
  0xa6   :  { %v3939_v50 = vpop.eup %3487  ;;  %v3941_v51 = vadd.f32 1.1920929e-07, %v637_v42 }
  0xa7   :  { %v701_v58 = vmul.f32 %v3939_v50, %v3928_v23  ;;  %3491 = vrsqrt.f32 %v3937_v46  ;;  %v3951_v5 = vpop.eup %3489  ;;  %vm707_vm1 = vweird.f32 %v3939_v50  ;;  %603 = vadd.xlane.f32.xlu2 %v602_v40  ;;  %vm736_vm9 = vweird.f32 %v3937_v46 }
  0xa8   :  { %3493 = vrsqrt.f32 %v3941_v51  ;;  %v721_v15 = vmul.f32 %v3951_v5, %v3932_v30  ;;  %vm708_vm4 = vmor %vm706_vm2, %vm707_vm1  ;;  %vm716_vm5 = vweird.f32 %v3941_v51  ;;  %vm727_vm8 = vweird.f32 %v3951_v5 }
  0xa9   :  { %v702_v59 = vmul.f32 %v3939_v50, %v701_v58  ;;  %3495 = vrsqrt.f32 %v3961_v19  ;;  %vm4012_vm11 = vmor %vm726_vm7, %vm727_vm8  ;;  %v195_v40 = vmul.f32 %v3816_v8, %v130_v31  ;;  %vm746_vm13 = vweird.f32 %v3961_v19  ;;  %v264_v31 = vld [vmem:[#allocation7 + $0x1a0] sm:$0xff] }
  0xaa   :  { %v550_v0 = vpop.xlane.xlu2 %549  ;;  %v722_v25 = vmul.f32 %v3951_v5, %v721_v15  ;;  %v556_v33 = vpop.xlane.xlu1 %555 }
  0xab   :  { %v703_v18 = vmul.f32 0.5, %v702_v59  ;;  %v641_v11 = vmul.f32 %v3917_v54, %v550_v0  ;;  %v643_v43 = vmul.f32 %v3917_v54, %v556_v33  ;;  %v553_v44 = vpop.xlane.xlu0 %552  ;;  %v260_v33 = vld [vmem:[#allocation7 + $0x180] sm:$0xff] }
  0xac   :  { %v723_v36 = vmul.f32 0.5, %v722_v25  ;;  %v642_v62 = vmul.f32 %v3917_v54, %v553_v44  ;;  %v3553_v44 = vld [vmem:[#allocation10 + $0x30] sm:$0xff] }
  0xad   :  { %v3955_v10 = vpop.eup %3491  ;;  %v704_v16 = vsub.f32 1.5, %v703_v18  ;;  %v3965_v22 = vadd.f32 1.1920929e-07, %v641_v11  ;;  %v4003_v3 = vadd.f32 1.1920929e-07, %v643_v43  ;;  %v326_v43 = vmul.f32 %v3820_v14, %v261_v34  ;;  %v3464_v11 = vld [vmem:[#allocation9 + $0x2bc] sm:$0xf0] }
  0xae   :  { %v3494_v13 = vpop.eup %3493  ;;  %v731_v20 = vmul.f32 %v3955_v10, %v3937_v46  ;;  %v724_v61 = vsub.f32 1.5, %v723_v36  ;;  %vm737_vm10 = vweird.f32 %v3955_v10  ;;  %v4018_v15 = vadd.f32 1.1920929e-07, %v642_v62 }
  0xaf   :  { %v711_v17 = vmul.f32 %v3494_v13, %v3941_v51  ;;  %v705_v26 = vmul.f32 %v3939_v50, %v704_v16  ;;  %vm717_vm3 = vweird.f32 %v3494_v13  ;;  %3497 = vrsqrt.f32 %v3965_v22  ;;  %v3980_v45 = vpop.eup %3495  ;;  %v3461_v16 = vld [vmem:[#allocation9 + $0x2ac] sm:$0xf]  ;;  %vm4024_vm12 = vmor %vm736_vm9, %vm737_vm10 }
  0xb0   :  { %v732_v28 = vmul.f32 %v3955_v10, %v731_v20  ;;  %vm718_vm6 = vmor %vm716_vm5, %vm717_vm3  ;;  %v385_v51 = vadd.f32 %v321_v41, %v191_v29  ;;  %v741_v2 = vmul.f32 %v3980_v45, %v3961_v19  ;;  %v725_v18 = vmul.f32 %v3951_v5, %v724_v61  ;;  %v263_v29 = vld [vmem:[#allocation7 + $0x198] sm:$0xff] }
  0xb1   :  { %v712_v21 = vmul.f32 %v3494_v13, %v711_v17  ;;  %v709_v23 = vsel %vm708_vm4, %v3939_v50, %v705_v26  ;;  %v3551_v50 = vld [vmem:[#allocation10] sm:$0xff]  ;;  %3499 = vrsqrt.f32 %v4003_v3  ;;  %v3151_v26 = vor.u32 %v3413_v7, %v3148_v9  ;;  %v3338_v9 = vld [vmem:[#allocation9 + $0x2a8] sm:$0xf] }
  0xb2   :  { %v733_v42 = vmul.f32 0.5, %v732_v28  ;;  %v1020_v52 = vmul.f32 %v3551_v50, %v709_v23  ;;  %v1021_v57 = vmul.f32 %v3552_v53, %v709_v23  ;;  %449 = vst [vmem:[#allocation10 + $0x160] sm:$0xff] %v385_v51  ;;  %v513_v4 = vmul.f32 %v385_v51, %v385_v51  ;;  %v3340_v17 = vld [vmem:[#allocation9 + $0x2c0] sm:$0xf0]  ;;  %v262_v28 = vld [vmem:[#allocation7 + $0x190] sm:$0xff]  ;;  %v559_v38 = vpop.xlane.xlu2 %558  ;;  %v3555_v53 = vld [vmem:[#allocation10 + $0x38] sm:$0xff] }
  0xb3   :  { %v713_v27 = vmul.f32 0.5, %v712_v21  ;;  %v132_v21 = vld [vmem:[#allocation6 + $0x190] sm:$0xff]  ;;  %v729_v46 = vsel %vm4012_vm11, %v3951_v5, %v725_v18  ;;  %3501 = vrsqrt.f32 %v4018_v15  ;;  %2227 = vmatpush.bf16.msrb.mxu2 %v3151_v26  ;;  %v198_v23 = vmul.f32 %v3816_v8, %v133_v24  ;;  %v3554_v50 = vld [vmem:[#allocation10 + $0x20] sm:$0xff] }
  0xb4   :  { %v734_v63 = vsub.f32 1.5, %v733_v42  ;;  %v197_v37 = vmul.f32 %v3816_v8, %v132_v21  ;;  %v327_v5 = vmul.f32 %v3820_v14, %v262_v28  ;;  %vm747_vm14 = vweird.f32 %v3980_v45  ;;  %v134_v24 = vld [vmem:[#allocation6 + $0x1a0] sm:$0xff] }
  0xb5   :  { %v714_v32 = vsub.f32 1.5, %v713_v27  ;;  %v3986_v60 = vpop.eup %3497  ;;  %v3343_v27 = vor.u32 %v3461_v16, %v3340_v17  ;;  %vm756_vm15 = vweird.f32 %v3965_v22  ;;  %vm4072_vm1 = vmor %vm746_vm13, %vm747_vm14  ;;  %vm776_vm3 = vweird.f32 %v4003_v3 }
  0xb6   :  { %v735_v12 = vmul.f32 %v3955_v10, %v734_v63  ;;  %vm757_vm0 = vweird.f32 %v3986_v60  ;;  %vm766_vm5 = vweird.f32 %v4018_v15 }
  0xb7   :  { %v715_v39 = vmul.f32 %v3494_v13, %v714_v32  ;;  %v131_v32 = vld [vmem:[#allocation6 + $0x188] sm:$0xff]  ;;  %2316 = vmatpush.bf16.msrb.mxu3 %v3343_v27  ;;  %v4047_v51 = vpop.eup %3499  ;;  %v562_v27 = vpop.xlane.xlu0 %561  ;;  %vm758_vm2 = vmor %vm756_vm15, %vm757_vm0 }
  0xb8   :  { %v739_v35 = vsel %vm4024_vm12, %v3955_v10, %v735_v12  ;;  %v196_v42 = vmul.f32 %v3816_v8, %v131_v32  ;;  %v325_v10 = vmul.f32 %v3820_v14, %v260_v33  ;;  %v645_v19 = vmul.f32 %v3917_v54, %v562_v27  ;;  %v270_v27 = vld [vmem:[#allocation7 + $0x1d0] sm:$0xff] }
  0xb9   :  { %v719_v47 = vsel %vm718_vm6, %v3494_v13, %v715_v39  ;;  %v742_v13 = vmul.f32 %v3980_v45, %v741_v2  ;;  %v328_v39 = vmul.f32 %v3820_v14, %v263_v29  ;;  %v3339_v29 = vor.u32 %v3464_v11, %v3338_v9 }
  0xba   :  { %v1022_v58 = vmul.f32 %v719_v47, %v3838_v55  ;;  %v1023_v59 = vmul.f32 %v719_v47, %v3840_v56  ;;  %v386_v55 = vadd.f32 %v322_v49, %v192_v48  ;;  %v751_v56 = vmul.f32 %v3986_v60, %v3965_v22  ;;  %v3146_v48 = vld [vmem:[#allocation9 + $0x128] sm:$0xf]  ;;  %v3416_v49 = vld [vmem:[#allocation9 + $0x13c] sm:$0xf0] }
  0xbb   :  { %v743_v36 = vmul.f32 0.5, %v742_v13  ;;  %v1026_v47 = vmul.f32 %v3553_v44, %v739_v35  ;;  %v392_v62 = vadd.f32 %v328_v39, %v198_v23  ;;  %v389_v63 = vadd.f32 %v325_v10, %v195_v40  ;;  %v136_v23 = vld [vmem:[#allocation6 + $0x1b0] sm:$0xff]  ;;  %v137_v40 = vld [vmem:[#allocation6 + $0x1b8] sm:$0xff]  ;;  %2138 = vmatpush.bf16.msrb.mxu1 %v3339_v29 }
  0xbc   :  { %v3989_v0 = vpack.c.bf16 %v1022_v58, %v1020_v52  ;;  %v3991_v1 = vpack.c.bf16 %v1023_v59, %v1021_v57  ;;  %450 = vst [vmem:[#allocation10 + $0x168] sm:$0xff] %v386_v55  ;;  %v514_v6 = vmul.f32 %v386_v55, %v386_v55  ;;  %v752_v25 = vmul.f32 %v3986_v60, %v751_v56  ;;  %v4050_v55 = vpop.eup %3501  ;;  %v3556_v56 = vld [vmem:[#allocation10 + $0x28] sm:$0xff]  ;;  %v267_v10 = vld [vmem:[#allocation7 + $0x1b8] sm:$0xff] }
  0xbd   :  { %v1024_v52 = vmul.f32 %v3554_v50, %v729_v46  ;;  %v1027_v57 = vmul.f32 %v3555_v53, %v739_v35  ;;  %v644_v58 = vmul.f32 %v3917_v54, %v559_v38  ;;  %v391_v59 = vadd.f32 %v327_v5, %v197_v37  ;;  %456 = vst [vmem:[#allocation10 + $0x198] sm:$0xff] %v392_v62  ;;  %v268_v35 = vld [vmem:[#allocation7 + $0x1c0] sm:$0xff] }
  0xbe   :  { %1700 = vmatmul.bf16.vlgmr.msra.gmra.mxu0 %v3989_v0  ;;  %1789 = vmatmul.bf16.vlgmr.msra.gmra.mxu1 %v3991_v1  ;;  %v599_v30 = vadd.f32 %v514_v6, %v513_v4  ;;  %v753_v41 = vmul.f32 0.5, %v752_v25  ;;  %v744_v61 = vsub.f32 1.5, %v743_v36  ;;  %v390_v2 = vadd.f32 %v326_v43, %v196_v42  ;;  %453 = vst [vmem:[#allocation10 + $0x180] sm:$0xff] %v389_v63  ;;  %v135_v25 = vld [vmem:[#allocation6 + $0x1a8] sm:$0xff]  ;;  %v266_v42 = vld [vmem:[#allocation7 + $0x1b0] sm:$0xff] }
  0xbf   :  { %1878 = vmatmul.bf16.vlgmr.msra.gmra.mxu2 %v3989_v0  ;;  %1967 = vmatmul.bf16.vlgmr.msra.gmra.mxu3 %v3991_v1  ;;  %v1025_v4 = vmul.f32 %v3556_v56, %v729_v46  ;;  %455 = vst [vmem:[#allocation10 + $0x190] sm:$0xff] %v391_v59  ;;  %v519_v6 = vmul.f32 %v391_v59, %v391_v59  ;;  %v4059_v20 = vadd.f32 1.1920929e-07, %v644_v58  ;;  %v265_v46 = vld [vmem:[#allocation7 + $0x1a8] sm:$0xff]  ;;  %vm777_vm4 = vweird.f32 %v4047_v51 }
  0xc0   :  { %600 = vadd.xlane.f32.xlu1 %v599_v30  ;;  %v754_v18 = vsub.f32 1.5, %v753_v41  ;;  %v3147_v7 = vor.u32 %v3416_v49, %v3146_v48  ;;  %v4052_v12 = vpack.c.bf16 %v1026_v47, %v1024_v52  ;;  %v771_v13 = vmul.f32 %v4047_v51, %v4003_v3  ;;  %454 = vst [vmem:[#allocation10 + $0x188] sm:$0xff] %v390_v2  ;;  %v3558_v56 = vld [vmem:[#allocation10 + $0x48] sm:$0xff]  ;;  %vm4136_vm7 = vmor %vm776_vm3, %vm777_vm4 }
  0xc1   :  { %v520_v16 = vmul.f32 %v392_v62, %v392_v62  ;;  %v4057_v17 = vpack.c.bf16 %v1027_v57, %v1025_v4  ;;  %v517_v30 = vmul.f32 %v389_v63, %v389_v63  ;;  %v518_v21 = vmul.f32 %v390_v2, %v390_v2  ;;  %v3557_v62 = vld [vmem:[#allocation10 + $0x40] sm:$0xff] }
  0xc2   :  { %2049 = vmatpush.bf16.msrb.mxu0 %v3147_v7  ;;  %v761_v26 = vmul.f32 %v4050_v55, %v4018_v15  ;;  %v745_v32 = vmul.f32 %v3980_v45, %v744_v61  ;;  %v755_v33 = vmul.f32 %v3986_v60, %v754_v18  ;;  %v772_v36 = vmul.f32 %v4047_v51, %v771_v13  ;;  %v3559_v18 = vld [vmem:[#allocation10 + $0x50] sm:$0xff]  ;;  %v3560_v7 = vld [vmem:[#allocation10 + $0x58] sm:$0xff] }
  0xc3   :  { %v608_v28 = vadd.f32 %v520_v16, %v519_v6  ;;  %v605_v34 = vadd.f32 %v518_v21, %v517_v30  ;;  %v199_v37 = vmul.f32 %v3816_v8, %v134_v24  ;;  %v200_v38 = vmul.f32 %v3816_v8, %v135_v25  ;;  %v140_v25 = vld [vmem:[#allocation6 + $0x1d0] sm:$0xff] }
  0xc4   :  { %3503 = vrsqrt.f32 %v4059_v20  ;;  %v329_v5 = vmul.f32 %v3820_v14, %v264_v31  ;;  %v330_v39 = vmul.f32 %v3820_v14, %v265_v46  ;;  %v762_v41 = vmul.f32 %v4050_v55, %v761_v26  ;;  %v141_v26 = vld [vmem:[#allocation6 + $0x1d8] sm:$0xff]  ;;  %v568_v46 = vpop.xlane.xlu2 %567 }
  0xc5   :  { %606 = vadd.xlane.f32.xlu0 %v605_v34  ;;  %v749_v22 = vsel %vm4072_vm1, %v3980_v45, %v745_v32  ;;  %v201_v43 = vmul.f32 %v3816_v8, %v136_v23  ;;  %v759_v44 = vsel %vm758_vm2, %v3986_v60, %v755_v33  ;;  %v202_v49 = vmul.f32 %v3816_v8, %v137_v40  ;;  %v138_v34 = vld [vmem:[#allocation6 + $0x1c0] sm:$0xff] }
  0xc6   :  { %v393_v47 = vadd.f32 %v329_v5, %v199_v37  ;;  %v394_v48 = vadd.f32 %v330_v39, %v200_v38  ;;  %v773_v50 = vmul.f32 0.5, %v772_v36  ;;  %v4096_v52 = vadd.f32 1.1920929e-07, %v645_v19  ;;  %v565_v37 = vpop.xlane.xlu1 %564  ;;  %v139_v5 = vld [vmem:[#allocation6 + $0x1c8] sm:$0xff] }
  0xc7   :  { %v331_v53 = vmul.f32 %v3820_v14, %v266_v42  ;;  %v332_v57 = vmul.f32 %v3820_v14, %v267_v10  ;;  %v763_v58 = vmul.f32 0.5, %v762_v41  ;;  %v1028_v63 = vmul.f32 %v3557_v62, %v749_v22  ;;  %v269_v39 = vld [vmem:[#allocation7 + $0x1c8] sm:$0xff]  ;;  %v3316_v62 = vld [vmem:[#allocation9 + $0x290] sm:$0xf0] }
  0xc8   :  { %609 = vadd.xlane.f32.xlu1 %v608_v28  ;;  %457 = vst [vmem:[#allocation10 + $0x1a0] sm:$0xff] %v393_v47  ;;  %v521_v59 = vmul.f32 %v393_v47, %v393_v47  ;;  %v522_v61 = vmul.f32 %v394_v48, %v394_v48  ;;  %v1029_v4 = vmul.f32 %v3558_v56, %v749_v22  ;;  %v774_v13 = vsub.f32 1.5, %v773_v50  ;;  %v271_v28 = vld [vmem:[#allocation7 + $0x1d8] sm:$0xff]  ;;  %v3124_v50 = vld [vmem:[#allocation9 + $0x110] sm:$0xf0] }
  0xc9   :  { %458 = vst [vmem:[#allocation10 + $0x1a8] sm:$0xff] %v394_v48  ;;  %v395_v60 = vadd.f32 %v331_v53, %v201_v43  ;;  %v396_v2 = vadd.f32 %v332_v57, %v202_v49  ;;  %v1030_v6 = vmul.f32 %v3559_v18, %v759_v44  ;;  %v1031_v9 = vmul.f32 %v3560_v7, %v759_v44  ;;  %v3407_v49 = vld [vmem:[#allocation9 + $0xfc] sm:$0xf]  ;;  %v3410_v18 = vld [vmem:[#allocation9 + $0x10c] sm:$0xf0] }
  0xca   :  { %v4100_v45 = vpop.eup %3503  ;;  %v611_v11 = vadd.f32 %v522_v61, %v521_v59  ;;  %3505 = vrsqrt.f32 %v4096_v52  ;;  %v764_v16 = vsub.f32 1.5, %v763_v58  ;;  %v205_v33 = vmul.f32 %v3816_v8, %v140_v25  ;;  %v3455_v61 = vld [vmem:[#allocation9 + $0x27c] sm:$0xf]  ;;  %v3314_v7 = vld [vmem:[#allocation9 + $0x278] sm:$0xf] }
  0xcb   :  { %459 = vst [vmem:[#allocation10 + $0x1b0] sm:$0xff] %v395_v60  ;;  %v781_v30 = vmul.f32 %v4100_v45, %v4059_v20  ;;  %v523_v21 = vmul.f32 %v395_v60, %v395_v60  ;;  %v524_v24 = vmul.f32 %v396_v2, %v396_v2  ;;  %v4108_v29 = vpack.c.bf16 %v1030_v6, %v1028_v63 }
  0xcc   :  { %612 = vadd.xlane.f32.xlu2 %v611_v11  ;;  %460 = vst [vmem:[#allocation10 + $0x1b8] sm:$0xff] %v396_v2  ;;  %v4110_v31 = vpack.c.bf16 %v1031_v9, %v1029_v4  ;;  %v775_v36 = vmul.f32 %v4047_v51, %v774_v13  ;;  %v206_v38 = vmul.f32 %v3816_v8, %v141_v26  ;;  %vm767_vm6 = vweird.f32 %v4050_v55  ;;  %v3122_v4 = vld [vmem:[#allocation9 + $0xf8] sm:$0xf]  ;;  %v3458_v9 = vld [vmem:[#allocation9 + $0x28c] sm:$0xf0] }
  0xcd   :  { %v614_v32 = vadd.f32 %v524_v24, %v523_v21  ;;  %v335_v23 = vmul.f32 %v3820_v14, %v270_v27  ;;  %v336_v19 = vmul.f32 %v3820_v14, %v271_v28  ;;  %v765_v40 = vmul.f32 %v4050_v55, %v764_v16  ;;  %vm768_vm8 = vmor %vm766_vm5, %vm767_vm6 }
  0xce   :  { %1705 = vmatmul.bf16.gmra.mxu0 %v4052_v12  ;;  %1794 = vmatmul.bf16.gmra.mxu1 %v4057_v17  ;;  %v782_v41 = vmul.f32 %v4100_v45, %v781_v30  ;;  %v203_v42 = vmul.f32 %v3816_v8, %v138_v34  ;;  %v333_v10 = vmul.f32 %v3820_v14, %v268_v35  ;;  %v3564_v35 = vld [vmem:[#allocation10 + $0x68] sm:$0xff]  ;;  %vm786_vm9 = vweird.f32 %v4059_v20 }
  0xcf   :  { %1883 = vmatmul.bf16.gmra.mxu2 %v4052_v12  ;;  %1972 = vmatmul.bf16.gmra.mxu3 %v4057_v17  ;;  %v647_v43 = vmul.f32 %v3917_v54, %v568_v46  ;;  %v399_v44 = vadd.f32 %v335_v23, %v205_v33  ;;  %v400_v47 = vadd.f32 %v336_v19, %v206_v38  ;;  %v3561_v46 = vld [vmem:[#allocation10 + $0x70] sm:$0xff]  ;;  %vm787_vm10 = vweird.f32 %v4100_v45 }
  0xd0   :  { %615 = vadd.xlane.f32.xlu0 %v614_v32  ;;  %v4121_v22 = vpop.eup %3505  ;;  %v646_v48 = vmul.f32 %v3917_v54, %v565_v37  ;;  %v204_v53 = vmul.f32 %v3816_v8, %v139_v5  ;;  %v334_v57 = vmul.f32 %v3820_v14, %v269_v39  ;;  %v3127_v59 = vor.u32 %v3407_v49, %v3124_v50  ;;  %v144_v19 = vld [vmem:[#allocation6 + $0x1f0] sm:$0xff]  ;;  %v145_v5 = vld [vmem:[#allocation6 + $0x1f8] sm:$0xff]  ;;  %v574_v50 = vpop.xlane.xlu1 %573  ;;  %vm788_vm13 = vmor %vm786_vm9, %vm787_vm10 }
  0xd1   :  { %463 = vst [vmem:[#allocation10 + $0x1d0] sm:$0xff] %v399_v44  ;;  %v527_v63 = vmul.f32 %v399_v44, %v399_v44  ;;  %v528_v60 = vmul.f32 %v400_v47, %v400_v47  ;;  %v397_v2 = vadd.f32 %v333_v10, %v203_v42  ;;  %v791_v56 = vmul.f32 %v4121_v22, %v4096_v52  ;;  %v274_v39 = vld [vmem:[#allocation7 + $0x1f0] sm:$0xff]  ;;  %v143_v44 = vld [vmem:[#allocation6 + $0x1e8] sm:$0xff] }
  0xd2   :  { %v3319_v3 = vor.u32 %v3455_v61, %v3316_v62  ;;  %464 = vst [vmem:[#allocation10 + $0x1d8] sm:$0xff] %v400_v47  ;;  %2228 = vmatpush.bf16.msrb.mxu2 %v3127_v59  ;;  %v779_v11 = vsel %vm4136_vm7, %v4047_v51, %v775_v36  ;;  %v4149_v13 = vadd.f32 1.1920929e-07, %v647_v43  ;;  %v769_v15 = vsel %vm768_vm8, %v4050_v55, %v765_v40  ;;  %v3562_v51 = vld [vmem:[#allocation10 + $0x78] sm:$0xff]  ;;  %v3563_v55 = vld [vmem:[#allocation10 + $0x60] sm:$0xff] }
  0xd3   :  { %v620_v6 = vadd.f32 %v528_v60, %v527_v63  ;;  %461 = vst [vmem:[#allocation10 + $0x1c0] sm:$0xff] %v397_v2  ;;  %v783_v16 = vmul.f32 0.5, %v782_v41  ;;  %v4152_v30 = vadd.f32 1.1920929e-07, %v646_v48  ;;  %v398_v21 = vadd.f32 %v334_v57, %v204_v53  ;;  %v275_v41 = vld [vmem:[#allocation7 + $0x1f8] sm:$0xff]  ;;  %v142_v43 = vld [vmem:[#allocation6 + $0x1e0] sm:$0xff]  ;;  %v571_v53 = vpop.xlane.xlu0 %570  ;;  %v273_v63 = vld [vmem:[#allocation7 + $0x1e8] sm:$0xff] }
  0xd4   :  { %2317 = vmatpush.bf16.msrb.mxu3 %v3319_v3  ;;  %v792_v24 = vmul.f32 %v4121_v22, %v791_v56  ;;  %v525_v25 = vmul.f32 %v397_v2, %v397_v2  ;;  %v3123_v26 = vor.u32 %v3410_v18, %v3122_v4  ;;  %v3315_v27 = vor.u32 %v3458_v9, %v3314_v7  ;;  %v272_v47 = vld [vmem:[#allocation7 + $0x1e0] sm:$0xff] }
  0xd5   :  { %621 = vadd.xlane.f32.xlu2 %v620_v6  ;;  %462 = vst [vmem:[#allocation10 + $0x1c8] sm:$0xff] %v398_v21  ;;  %v526_v28 = vmul.f32 %v398_v21, %v398_v21  ;;  %v1034_v32 = vmul.f32 %v3561_v46, %v779_v11  ;;  %v1035_v33 = vmul.f32 %v3562_v51, %v779_v11  ;;  %3507 = vrsqrt.f32 %v4149_v13 }
  0xd6   :  { %2050 = vmatpush.bf16.msrb.mxu0 %v3123_v26  ;;  %2139 = vmatpush.bf16.msrb.mxu1 %v3315_v27  ;;  %v1032_v34 = vmul.f32 %v3563_v55, %v769_v15  ;;  %v1033_v36 = vmul.f32 %v3564_v35, %v769_v15  ;;  %3509 = vrsqrt.f32 %v4152_v30  ;;  %v784_v38 = vsub.f32 1.5, %v783_v16 }
  0xd7   :  { %v617_v37 = vadd.f32 %v526_v28, %v525_v25  ;;  %v793_v23 = vmul.f32 0.5, %v792_v24  ;;  %v209_v40 = vmul.f32 %v3816_v8, %v144_v19  ;;  %v339_v42 = vmul.f32 %v3820_v14, %v274_v39 }
  0xd8   :  { %v210_v10 = vmul.f32 %v3816_v8, %v145_v5  ;;  %v4161_v48 = vpack.c.bf16 %v1034_v32, %v1032_v34  ;;  %v4163_v49 = vpack.c.bf16 %v1035_v33, %v1033_v36  ;;  %vm796_vm11 = vweird.f32 %v4096_v52  ;;  %v3565_v33 = vld [vmem:[#allocation10 + $0x80] sm:$0xff]  ;;  %v3566_v34 = vld [vmem:[#allocation10 + $0x88] sm:$0xff]  ;;  %v3567_v36 = vld [vmem:[#allocation10 + $0x90] sm:$0xff] }
  0xd9   :  { %618 = vadd.xlane.f32.xlu1 %v617_v37  ;;  %v785_v58 = vmul.f32 %v4100_v45, %v784_v38  ;;  %v794_v59 = vsub.f32 1.5, %v793_v23  ;;  %v340_v61 = vmul.f32 %v3820_v14, %v275_v41  ;;  %v403_v62 = vadd.f32 %v339_v42, %v209_v40  ;;  %v3568_v37 = vld [vmem:[#allocation10 + $0x98] sm:$0xff]  ;;  %v577_v40 = vpop.xlane.xlu2 %576 }
  0xda   :  { %vm797_vm12 = vweird.f32 %v4121_v22  ;;  %v207_v2 = vmul.f32 %v3816_v8, %v142_v43  ;;  %v208_v56 = vmul.f32 %v3816_v8, %v143_v44  ;;  %v337_v3 = vmul.f32 %v3820_v14, %v272_v47  ;;  %v3401_v47 = vld [vmem:[#allocation9 + $0xcc] sm:$0xf] }
  0xdb   :  { %v4167_v57 = vpop.eup %3507  ;;  %v649_v4 = vmul.f32 %v3917_v54, %v574_v50  ;;  %v648_v18 = vmul.f32 %v3917_v54, %v571_v53  ;;  %v404_v6 = vadd.f32 %v340_v61, %v210_v10  ;;  %467 = vst [vmem:[#allocation10 + $0x1f0] sm:$0xff] %v403_v62  ;;  %v531_v9 = vmul.f32 %v403_v62, %v403_v62  ;;  %vm798_vm14 = vmor %vm796_vm11, %vm797_vm12  ;;  %v580_v10 = vpop.xlane.xlu0 %579  ;;  %v3100_v50 = vld [vmem:[#allocation9 + $0xe0] sm:$0xf0]  ;;  %v3449_v53 = vld [vmem:[#allocation9 + $0x24c] sm:$0xf] }
  0xdc   :  { %v4171_v60 = vpop.eup %3509  ;;  %v811_v7 = vmul.f32 %v4167_v57, %v4149_v13  ;;  %v338_v11 = vmul.f32 %v3820_v14, %v273_v63  ;;  %v401_v15 = vadd.f32 %v337_v3, %v207_v2  ;;  %v795_v8 = vmul.f32 %v4121_v22, %v794_v59  ;;  %v3292_v63 = vld [vmem:[#allocation9 + $0x260] sm:$0xf0]  ;;  %v3098_v2 = vld [vmem:[#allocation9 + $0xc8] sm:$0xf] }
  0xdd   :  { %v801_v16 = vmul.f32 %v4171_v60, %v4152_v30  ;;  %468 = vst [vmem:[#allocation10 + $0x1f8] sm:$0xff] %v404_v6  ;;  %v532_v21 = vmul.f32 %v404_v6, %v404_v6  ;;  %v4197_v25 = vadd.f32 1.1920929e-07, %v649_v4  ;;  %v789_v20 = vsel %vm788_vm13, %v4100_v45, %v785_v58 }
  0xde   :  { %1710 = vmatmul.bf16.gmra.mxu0 %v4108_v29  ;;  %1799 = vmatmul.bf16.gmra.mxu1 %v4110_v31  ;;  %v402_v24 = vadd.f32 %v338_v11, %v208_v56  ;;  %465 = vst [vmem:[#allocation10 + $0x1e0] sm:$0xff] %v401_v15  ;;  %v529_v14 = vmul.f32 %v401_v15, %v401_v15  ;;  %v4201_v28 = vadd.f32 1.1920929e-07, %v648_v18  ;;  %vm816_vm15 = vweird.f32 %v4149_v13  ;;  %v3404_v56 = vld [vmem:[#allocation9 + $0xdc] sm:$0xf0] }
  0xdf   :  { %1888 = vmatmul.bf16.gmra.mxu2 %v4108_v29  ;;  %1977 = vmatmul.bf16.gmra.mxu3 %v4110_v31  ;;  %v626_v26 = vadd.f32 %v532_v21, %v531_v9  ;;  %v812_v27 = vmul.f32 %v4167_v57, %v811_v7  ;;  %v799_v32 = vsel %vm798_vm14, %v4121_v22, %v795_v8  ;;  %3511 = vrsqrt.f32 %v4197_v25  ;;  %v3290_v7 = vld [vmem:[#allocation9 + $0x248] sm:$0xf]  ;;  %v3452_v9 = vld [vmem:[#allocation9 + $0x25c] sm:$0xf0] }
  0xe0   :  { %466 = vst [vmem:[#allocation10 + $0x1e8] sm:$0xff] %v402_v24  ;;  %v530_v46 = vmul.f32 %v402_v24, %v402_v24  ;;  %v802_v51 = vmul.f32 %v4171_v60, %v801_v16  ;;  %v1036_v55 = vmul.f32 %v3565_v33, %v789_v20  ;;  %v1037_v35 = vmul.f32 %v3566_v34, %v789_v20 }
  0xe1   :  { %627 = vadd.xlane.f32.xlu1 %v626_v26  ;;  %v1038_v45 = vmul.f32 %v3567_v36, %v799_v32  ;;  %v1039_v38 = vmul.f32 %v3568_v37, %v799_v32  ;;  %v813_v23 = vmul.f32 0.5, %v812_v27  ;;  %3513 = vrsqrt.f32 %v4201_v28  ;;  %v3570_v26 = vld [vmem:[#allocation10 + $0xb8] sm:$0xff]  ;;  %v3571_v27 = vld [vmem:[#allocation10 + $0xa0] sm:$0xff]  ;;  %v3572_v32 = vld [vmem:[#allocation10 + $0xa8] sm:$0xff]  ;;  %v586_v34 = vpop.xlane.xlu2 %585  ;;  %2964 = dma.vmem_to_hbm [thread:$0]  %s2957_s15, 8192, %s2959_s18, [#allocation4], %s3756_s26, %s3756_s26, %s3757_s27  }
  0xe2   :  { %v623_v52 = vadd.f32 %v530_v46, %v529_v14  ;;  %v803_v19 = vmul.f32 0.5, %v802_v51  ;;  %vm817_vm0 = vweird.f32 %v4167_v57  ;;  %vm806_vm1 = vweird.f32 %v4152_v30  ;;  %v3569_v14 = vld [vmem:[#allocation10 + $0xb0] sm:$0xff] }
  0xe3   :  { %v4207_v22 = vpack.c.bf16 %v1038_v45, %v1036_v55  ;;  %v4209_v5 = vpack.c.bf16 %v1039_v38, %v1037_v35  ;;  %v814_v39 = vsub.f32 1.5, %v813_v23  ;;  %vm807_vm2 = vweird.f32 %v4171_v60  ;;  %vm818_vm3 = vmor %vm816_vm15, %vm817_vm0  ;;  %v583_v45 = vpop.xlane.xlu1 %582 }
  0xe4   :  { %624 = vadd.xlane.f32.xlu0 %v623_v52  ;;  %v804_v42 = vsub.f32 1.5, %v803_v19  ;;  %v650_v44 = vmul.f32 %v3917_v54, %v577_v40  ;;  %v651_v61 = vmul.f32 %v3917_v54, %v580_v10  ;;  %v3103_v62 = vor.u32 %v3401_v47, %v3100_v50  ;;  %vm808_vm4 = vmor %vm806_vm1, %vm807_vm2 }
  0xe5   :  { %v4211_v41 = vpop.eup %3511  ;;  %v815_v58 = vmul.f32 %v4167_v57, %v814_v39  ;;  %v3295_v18 = vor.u32 %v3449_v53, %v3292_v63  ;;  %v3099_v6 = vor.u32 %v3404_v56, %v3098_v2  ;;  %v3291_v11 = vor.u32 %v3452_v9, %v3290_v7  ;;  %v3573_v53 = vld [vmem:[#allocation10 + $0xd0] sm:$0xff]  ;;  %v3576_v2 = vld [vmem:[#allocation10 + $0xc8] sm:$0xff]  ;;  %v589_v7 = vpop.xlane.xlu0 %588 }
  0xe6   :  { %v831_v59 = vmul.f32 %v4211_v41, %v4197_v25  ;;  %v805_v3 = vmul.f32 %v4171_v60, %v804_v42  ;;  %2229 = vmatpush.bf16.msrb.mxu2 %v3103_v62  ;;  %v4239_v15 = vadd.f32 1.1920929e-07, %v650_v44  ;;  %v4243_v16 = vadd.f32 1.1920929e-07, %v651_v61  ;;  %v3575_v62 = vld [vmem:[#allocation10 + $0xc0] sm:$0xff] }
  0xe7   :  { %v4213_v43 = vpop.eup %3513  ;;  %2318 = vmatpush.bf16.msrb.mxu3 %v3295_v18  ;;  %2051 = vmatpush.bf16.msrb.mxu0 %v3099_v6  ;;  %v819_v13 = vsel %vm818_vm3, %v4167_v57, %v815_v58  ;;  %vm836_vm5 = vweird.f32 %v4197_v25  ;;  %vm837_vm6 = vweird.f32 %v4211_v41  ;;  %vm826_vm7 = vweird.f32 %v4201_v28 }
  0xe8   :  { %v821_v4 = vmul.f32 %v4213_v43, %v4201_v28  ;;  %v832_v8 = vmul.f32 %v4211_v41, %v831_v59  ;;  %2140 = vmatpush.bf16.msrb.mxu1 %v3291_v11  ;;  %v809_v21 = vsel %vm808_vm4, %v4171_v60, %v805_v3  ;;  %v1042_v30 = vmul.f32 %v3569_v14, %v819_v13  ;;  %vm838_vm9 = vmor %vm836_vm5, %vm837_vm6  ;;  %v3574_v59 = vld [vmem:[#allocation10 + $0xd8] sm:$0xff]  ;;  %v3076_v14 = vld [vmem:[#allocation9 + $0xb0] sm:$0xf0] }
  0xe9   :  { %v1043_v20 = vmul.f32 %v3570_v26, %v819_v13  ;;  %3515 = vrsqrt.f32 %v4239_v15  ;;  %v1040_v46 = vmul.f32 %v3571_v27, %v809_v21  ;;  %v1041_v51 = vmul.f32 %v3572_v32, %v809_v21 }
  0xea   :  { %v822_v24 = vmul.f32 %v4213_v43, %v821_v4  ;;  %v833_v57 = vmul.f32 0.5, %v832_v8  ;;  %3517 = vrsqrt.f32 %v4243_v16  ;;  %vm827_vm8 = vweird.f32 %v4213_v43 }
  0xeb   :  { %v4249_v33 = vpack.c.bf16 %v1042_v30, %v1040_v46  ;;  %v4251_v55 = vpack.c.bf16 %v1043_v20, %v1041_v51  ;;  %v653_v38 = vmul.f32 %v3917_v54, %v586_v34  ;;  %v652_v19 = vmul.f32 %v3917_v54, %v583_v45  ;;  %vm828_vm10 = vmor %vm826_vm7, %vm827_vm8  ;;  %v592_v4 = vpop.xlane.xlu1 %591  ;;  %v3443_v30 = vld [vmem:[#allocation9 + $0x21c] sm:$0xf]  ;;  %v3268_v46 = vld [vmem:[#allocation9 + $0x230] sm:$0xf0] }
  0xec   :  { %v823_v52 = vmul.f32 0.5, %v822_v24  ;;  %v834_v60 = vsub.f32 1.5, %v833_v57  ;;  %vm846_vm11 = vweird.f32 %v4239_v15  ;;  %v655_v8 = vmul.f32 %v3917_v54, %v592_v4  ;;  %v3395_v24 = vld [vmem:[#allocation9 + $0x9c] sm:$0xf] }
  0xed   :  { %v4273_v40 = vadd.f32 1.1920929e-07, %v653_v38  ;;  %v4277_v44 = vadd.f32 1.1920929e-07, %v652_v19  ;;  %vm856_vm13 = vweird.f32 %v4243_v16  ;;  %v654_v21 = vmul.f32 %v3917_v54, %v589_v7  ;;  %v3074_v38 = vld [vmem:[#allocation9 + $0x98] sm:$0xf]  ;;  %v598_v4 = vpop.xlane.xlu0 %597 }
  0xee   :  { %1715 = vmatmul.bf16.gmra.mxu0 %v4161_v48  ;;  %1804 = vmatmul.bf16.gmra.mxu1 %v4163_v49  ;;  %v824_v36 = vsub.f32 1.5, %v823_v52  ;;  %v835_v23 = vmul.f32 %v4211_v41, %v834_v60  ;;  %v3079_v27 = vor.u32 %v3395_v24, %v3076_v14  ;;  %v3271_v57 = vor.u32 %v3443_v30, %v3268_v46 }
  0xef   :  { %1893 = vmatmul.bf16.gmra.mxu2 %v4161_v48  ;;  %1982 = vmatmul.bf16.gmra.mxu3 %v4163_v49  ;;  %v4253_v35 = vpop.eup %3515  ;;  %3519 = vrsqrt.f32 %v4273_v40  ;;  %v4315_v52 = vadd.f32 1.1920929e-07, %v655_v8  ;;  %v4317_v60 = vadd.f32 1.1920929e-07, %v654_v21  ;;  %vm876_vm1 = vweird.f32 %v4273_v40 }
  0xf0   :  { %v4255_v37 = vpop.eup %3517  ;;  %v841_v25 = vmul.f32 %v4253_v35, %v4239_v15  ;;  %v825_v39 = vmul.f32 %v4213_v43, %v824_v36  ;;  %v839_v42 = vsel %vm838_vm9, %v4211_v41, %v835_v23  ;;  %3521 = vrsqrt.f32 %v4277_v44  ;;  %2230 = vmatpush.bf16.msrb.mxu2 %v3079_v27  ;;  %2319 = vmatpush.bf16.msrb.mxu3 %v3271_v57  ;;  %v3398_v23 = vld [vmem:[#allocation9 + $0xac] sm:$0xf0] }
  0xf1   :  { %v851_v28 = vmul.f32 %v4255_v37, %v4243_v16  ;;  %v1046_v58 = vmul.f32 %v3573_v53, %v839_v42  ;;  %v1047_v61 = vmul.f32 %v3574_v59, %v839_v42  ;;  %vm847_vm12 = vweird.f32 %v4253_v35  ;;  %v3266_v16 = vld [vmem:[#allocation9 + $0x218] sm:$0xf]  ;;  %v3581_v27 = vld [vmem:[#allocation10 + $0x110] sm:$0xff] }
  0xf2   :  { %v842_v10 = vmul.f32 %v4253_v35, %v841_v25  ;;  %v829_v47 = vsel %vm828_vm10, %v4213_v43, %v825_v39  ;;  %vm857_vm14 = vweird.f32 %v4255_v37  ;;  %vm848_vm15 = vmor %vm846_vm11, %vm847_vm12  ;;  %3523 = vrsqrt.f32 %v4315_v52  ;;  %v3577_v25 = vld [vmem:[#allocation10 + $0xe0] sm:$0xff]  ;;  %v3578_v39 = vld [vmem:[#allocation10 + $0xe8] sm:$0xff] }
  0xf3   :  { %v852_v50 = vmul.f32 %v4255_v37, %v851_v28  ;;  %v1044_v63 = vmul.f32 %v3575_v62, %v829_v47  ;;  %v1045_v56 = vmul.f32 %v3576_v2, %v829_v47  ;;  %vm858_vm0 = vmor %vm856_vm13, %vm857_vm14  ;;  %3525 = vrsqrt.f32 %v4317_v60 }
  0xf4   :  { %v843_v3 = vmul.f32 0.5, %v842_v10  ;;  %v3075_v42 = vor.u32 %v3398_v23, %v3074_v38  ;;  %v3446_v10 = vld [vmem:[#allocation9 + $0x22c] sm:$0xf0]  ;;  %vm866_vm3 = vweird.f32 %v4277_v44  ;;  %v657_v8 = vmul.f32 %v3917_v54, %v598_v4  ;;  %v3244_v4 = vld [vmem:[#allocation9 + $0x200] sm:$0xf0] }
  0xf5   :  { %v853_v41 = vmul.f32 0.5, %v852_v50  ;;  %v4283_v18 = vpack.c.bf16 %v1046_v58, %v1044_v63  ;;  %v4285_v43 = vpack.c.bf16 %v1047_v61, %v1045_v56  ;;  %v4287_v9 = vpop.eup %3519  ;;  %v3580_v50 = vld [vmem:[#allocation10 + $0xf8] sm:$0xff]  ;;  %v3267_v58 = vor.u32 %v3446_v10, %v3266_v16  ;;  %v595_v56 = vpop.xlane.xlu2 %594 }
  0xf6   :  { %v844_v6 = vsub.f32 1.5, %v843_v3  ;;  %v4289_v13 = vpop.eup %3521  ;;  %v871_v20 = vmul.f32 %v4287_v9, %v4273_v40  ;;  %2052 = vmatpush.bf16.msrb.mxu0 %v3075_v42  ;;  %vm877_vm2 = vweird.f32 %v4287_v9  ;;  %v656_v7 = vmul.f32 %v3917_v54, %v595_v56 }
  0xf7   :  { %v854_v11 = vsub.f32 1.5, %v853_v41  ;;  %v861_v51 = vmul.f32 %v4289_v13, %v4277_v44  ;;  %2141 = vmatpush.bf16.msrb.mxu1 %v3267_v58  ;;  %vm867_vm4 = vweird.f32 %v4289_v13  ;;  %vm878_vm5 = vmor %vm876_vm1, %vm877_vm2  ;;  %vm896_vm7 = vweird.f32 %v4315_v52  ;;  %v3437_v58 = vld [vmem:[#allocation9 + $0x1ec] sm:$0xf] }
  0xf8   :  { %v845_v26 = vmul.f32 %v4253_v35, %v844_v6  ;;  %v872_v34 = vmul.f32 %v4287_v9, %v871_v20  ;;  %v4325_v61 = vpop.eup %3523  ;;  %vm868_vm6 = vmor %vm866_vm3, %vm867_vm4  ;;  %v4350_v24 = vadd.f32 1.1920929e-07, %v656_v7  ;;  %vm886_vm9 = vweird.f32 %v4317_v60 }
  0xf9   :  { %v855_v32 = vmul.f32 %v4255_v37, %v854_v11  ;;  %v862_v45 = vmul.f32 %v4289_v13, %v861_v51  ;;  %v4331_v3 = vpop.eup %3525  ;;  %v891_v6 = vmul.f32 %v4325_v61, %v4315_v52  ;;  %vm897_vm8 = vweird.f32 %v4325_v61 }
  0xfa   :  { %v849_v15 = vsel %vm848_vm15, %v4253_v35, %v845_v26  ;;  %v3579_v35 = vld [vmem:[#allocation10 + $0xf0] sm:$0xff]  ;;  %v881_v11 = vmul.f32 %v4331_v3, %v4317_v60  ;;  %v4354_v26 = vadd.f32 1.1920929e-07, %v657_v8  ;;  %3527 = vrsqrt.f32 %v4350_v24  ;;  %vm898_vm11 = vmor %vm896_vm7, %vm897_vm8 }
  0xfb   :  { %v859_v36 = vsel %vm858_vm0, %v4255_v37, %v855_v32  ;;  %v1048_v19 = vmul.f32 %v3577_v25, %v849_v15  ;;  %v1049_v28 = vmul.f32 %v3578_v39, %v849_v15  ;;  %v873_v37 = vmul.f32 0.5, %v872_v34  ;;  %v3582_v32 = vld [vmem:[#allocation10 + $0x118] sm:$0xff]  ;;  %v3583_v15 = vld [vmem:[#allocation10 + $0x100] sm:$0xff] }
  0xfc   :  { %v1050_v47 = vmul.f32 %v3579_v35, %v859_v36  ;;  %v1051_v53 = vmul.f32 %v3580_v50, %v859_v36  ;;  %v863_v59 = vmul.f32 0.5, %v862_v45  ;;  %v892_v21 = vmul.f32 %v4325_v61, %v891_v6  ;;  %v3584_v36 = vld [vmem:[#allocation10 + $0x108] sm:$0xff] }
  0xfd   :  { %v874_v2 = vsub.f32 1.5, %v873_v37  ;;  %v882_v30 = vmul.f32 %v4331_v3, %v881_v11  ;;  %3529 = vrsqrt.f32 %v4354_v26  ;;  %vm887_vm10 = vweird.f32 %v4331_v3  ;;  %v3052_v37 = vld [vmem:[#allocation9 + $0x80] sm:$0xf0] }
  0xfe   :  { %1720 = vmatmul.bf16.gmra.mxu0 %v4207_v22  ;;  %1809 = vmatmul.bf16.gmra.mxu1 %v4209_v5  ;;  %v4327_v62 = vpack.c.bf16 %v1050_v47, %v1048_v19  ;;  %v4329_v63 = vpack.c.bf16 %v1051_v53, %v1049_v28  ;;  %v864_v41 = vsub.f32 1.5, %v863_v59  ;;  %v893_v57 = vmul.f32 0.5, %v892_v21  ;;  %v3389_v53 = vld [vmem:[#allocation9 + $0x6c] sm:$0xf]  ;;  %vm888_vm12 = vmor %vm886_vm9, %vm887_vm10 }
  0xff   :  { %1898 = vmatmul.bf16.gmra.mxu2 %v4207_v22  ;;  %1987 = vmatmul.bf16.gmra.mxu3 %v4209_v5  ;;  %v875_v40 = vmul.f32 %v4287_v9, %v874_v2  ;;  %v883_v38 = vmul.f32 0.5, %v882_v30  ;;  %v3247_v7 = vor.u32 %v3437_v58, %v3244_v4  ;;  %vm906_vm13 = vweird.f32 %v4350_v24 }
 0x100   :  { %v865_v44 = vmul.f32 %v4289_v13, %v864_v41  ;;  %v4363_v42 = vpop.eup %3527  ;;  %v3055_v41 = vor.u32 %v3389_v53, %v3052_v37  ;;  %vm916_vm15 = vweird.f32 %v4354_v26 }
 0x101   :  { %v879_v14 = vsel %vm878_vm5, %v4287_v9, %v875_v40  ;;  %v894_v9 = vsub.f32 1.5, %v893_v57  ;;  %v884_v19 = vsub.f32 1.5, %v883_v38  ;;  %v901_v2 = vmul.f32 %v4363_v42, %v4350_v24  ;;  %2320 = vmatpush.bf16.msrb.mxu3 %v3247_v7  ;;  %v3392_v57 = vld [vmem:[#allocation9 + $0x7c] sm:$0xf0]  ;;  %v3242_v38 = vld [vmem:[#allocation9 + $0x1e8] sm:$0xf] }
 0x102   :  { %v869_v20 = vsel %vm868_vm6, %v4289_v13, %v865_v44  ;;  %v1054_v46 = vmul.f32 %v3581_v27, %v879_v14  ;;  %v1055_v51 = vmul.f32 %v3582_v32, %v879_v14  ;;  %2231 = vmatpush.bf16.msrb.mxu2 %v3055_v41  ;;  %v3585_v32 = vld [vmem:[#allocation10 + $0x130] sm:$0xff]  ;;  %vm907_vm14 = vweird.f32 %v4363_v42 }
 0x103   :  { %v1052_v34 = vmul.f32 %v3583_v15, %v869_v20  ;;  %v1053_v45 = vmul.f32 %v3584_v36, %v869_v20  ;;  %v4367_v35 = vpop.eup %3529  ;;  %v895_v47 = vmul.f32 %v4325_v61, %v894_v9  ;;  %v885_v59 = vmul.f32 %v4331_v3, %v884_v19  ;;  %v3586_v15 = vld [vmem:[#allocation10 + $0x138] sm:$0xff]  ;;  %v3587_v36 = vld [vmem:[#allocation10 + $0x120] sm:$0xff]  ;;  %vm908_vm1 = vmor %vm906_vm13, %vm907_vm14 }
 0x104   :  { %v911_v6 = vmul.f32 %v4367_v35, %v4354_v26  ;;  %v902_v60 = vmul.f32 %v4363_v42, %v901_v2  ;;  %v3440_v9 = vld [vmem:[#allocation9 + $0x1fc] sm:$0xf0]  ;;  %vm917_vm0 = vweird.f32 %v4367_v35 }
 0x105   :  { %v4359_v25 = vpack.c.bf16 %v1054_v46, %v1052_v34  ;;  %v4361_v13 = vpack.c.bf16 %v1055_v51, %v1053_v45  ;;  %v899_v11 = vsel %vm898_vm11, %v4325_v61, %v895_v47  ;;  %v889_v30 = vsel %vm888_vm12, %v4331_v3, %v885_v59  ;;  %v3050_v61 = vld [vmem:[#allocation9 + $0x68] sm:$0xf]  ;;  %vm918_vm2 = vmor %vm916_vm15, %vm917_vm0 }
 0x106   :  { %v912_v46 = vmul.f32 %v4367_v35, %v911_v6  ;;  %v1058_v51 = vmul.f32 %v3585_v32, %v899_v11  ;;  %v1059_v34 = vmul.f32 %v3586_v15, %v899_v11  ;;  %v1056_v45 = vmul.f32 %v3587_v36, %v889_v30 }
 0x107   :  { %v3051_v3 = vor.u32 %v3392_v57, %v3050_v61  ;;  %v903_v19 = vmul.f32 0.5, %v902_v60 }
 0x108   :  { %v4401_v58 = vpack.c.bf16 %v1058_v51, %v1056_v45  ;;  %v3589_v45 = vld [vmem:[#allocation10 + $0x140] sm:$0xff] }
 0x109   :  { %2053 = vmatpush.bf16.msrb.mxu0 %v3051_v3  ;;  %v904_v2 = vsub.f32 1.5, %v903_v19 }
 0x10b   :  { %v905_v11 = vmul.f32 %v4363_v42, %v904_v2 }
 0x10d   :  { %v909_v51 = vsel %vm908_vm1, %v4363_v42, %v905_v11  ;;  %v3592_v42 = vld [vmem:[#allocation10 + $0x158] sm:$0xff] }
 0x10e   :  { %1725 = vmatmul.bf16.gmra.mxu0 %v4249_v33  ;;  %1814 = vmatmul.bf16.gmra.mxu1 %v4251_v55  ;;  %v1060_v3 = vmul.f32 %v3589_v45, %v909_v51 }
 0x10f   :  { %1903 = vmatmul.bf16.gmra.mxu2 %v4249_v33  ;;  %1992 = vmatmul.bf16.gmra.mxu3 %v4251_v55 }
 0x11a   :  { %v604_v28 = vpop.xlane.xlu2 %603 }
 0x11b   :  { %v659_v50 = vmul.f32 %v3917_v54, %v604_v28  ;;  %v913_v28 = vmul.f32 0.5, %v912_v46 }
 0x11d   :  { %v4392_v14 = vadd.f32 1.1920929e-07, %v659_v50  ;;  %v914_v6 = vsub.f32 1.5, %v913_v28 }
 0x11e   :  { %1730 = vmatmul.bf16.gmra.mxu0 %v4283_v18  ;;  %1819 = vmatmul.bf16.gmra.mxu1 %v4285_v43 }
 0x11f   :  { %1908 = vmatmul.bf16.gmra.mxu2 %v4283_v18  ;;  %1997 = vmatmul.bf16.gmra.mxu3 %v4285_v43  ;;  %3531 = vrsqrt.f32 %v4392_v14  ;;  %vm936_vm3 = vweird.f32 %v4392_v14 }
 0x125   :  { %v4405_v4 = vpop.eup %3531 }
 0x126   :  { %v931_v24 = vmul.f32 %v4405_v4, %v4392_v14  ;;  %vm937_vm4 = vweird.f32 %v4405_v4 }
 0x127   :  { %vm938_vm7 = vmor %vm936_vm3, %vm937_vm4 }
 0x128   :  { %v932_v61 = vmul.f32 %v4405_v4, %v931_v24 }
 0x12e   :  { %1735 = vmatmul.bf16.gmra.mxu0 %v4327_v62  ;;  %1824 = vmatmul.bf16.gmra.mxu1 %v4329_v63 }
 0x12f   :  { %1913 = vmatmul.bf16.gmra.mxu2 %v4327_v62  ;;  %2002 = vmatmul.bf16.gmra.mxu3 %v4329_v63 }
 0x133   :  { %v601_v10 = vpop.xlane.xlu1 %600 }
 0x134   :  { %v658_v56 = vmul.f32 %v3917_v54, %v601_v10 }
 0x136   :  { %v4396_v27 = vadd.f32 1.1920929e-07, %v658_v56 }
 0x138   :  { %3533 = vrsqrt.f32 %v4396_v27  ;;  %v607_v7 = vpop.xlane.xlu0 %606  ;;  %vm926_vm5 = vweird.f32 %v4396_v27 }
 0x13b   :  { %v1701_v23 = vpop.f32.mrf.mxu0  ;;  %v1790_v16 = vpop.f32.mrf.mxu1 }
 0x13c   :  { %v1791_v39 = vadd.f32 %v1790_v16, %v1701_v23  ;;  %v3588_v23 = vld [vmem:[#allocation10 + $0x128] sm:$0xff]  ;;  %v610_v41 = vpop.xlane.xlu1 %609 }
 0x13d   :  { %v1057_v16 = vmul.f32 %v3588_v23, %v889_v30  ;;  %v3591_v23 = vld [vmem:[#allocation10 + $0x150] sm:$0xff] }
 0x13e   :  { %2760 = vst [vmem:[#allocation11] sm:$0xff] %v1791_v39  ;;  %1740 = vmatmul.bf16.gmra.mxu0 %v4359_v25  ;;  %1829 = vmatmul.bf16.gmra.mxu1 %v4361_v13  ;;  %v3243_v39 = vor.u32 %v3440_v9, %v3242_v38  ;;  %v3590_v38 = vld [vmem:[#allocation10 + $0x148] sm:$0xff] }
 0x13f   :  { %1918 = vmatmul.bf16.gmra.mxu2 %v4359_v25  ;;  %2007 = vmatmul.bf16.gmra.mxu3 %v4361_v13  ;;  %v4403_v59 = vpack.c.bf16 %v1059_v34, %v1057_v16  ;;  %v1061_v9 = vmul.f32 %v3590_v38, %v909_v51  ;;  %v3220_v51 = vld [vmem:[#allocation9 + $0x1d0] sm:$0xf0] }
 0x140   :  { %2142 = vmatpush.bf16.msrb.mxu1 %v3243_v39  ;;  %v933_v39 = vmul.f32 0.5, %v932_v61 }
 0x142   :  { %v1879_v52 = vpop.f32.mrf.mxu2  ;;  %v1968_v40 = vpop.f32.mrf.mxu3 }
 0x143   :  { %v1969_v8 = vadd.f32 %v1968_v40, %v1879_v52  ;;  %v1703_v44 = vpop.f32.mrf.mxu0  ;;  %v1792_v21 = vpop.f32.mrf.mxu1  ;;  %v661_v40 = vmul.f32 %v3917_v54, %v610_v41  ;;  %v934_v41 = vsub.f32 1.5, %v933_v39 }
 0x144   :  { %v1793_v20 = vadd.f32 %v1792_v21, %v1703_v44  ;;  %v4407_v52 = vpop.eup %3533  ;;  %v915_v44 = vmul.f32 %v4367_v35, %v914_v6 }
 0x145   :  { %2761 = vst [vmem:[#allocation11 + $0x8] sm:$0xff] %v1969_v8  ;;  %v660_v8 = vmul.f32 %v3917_v54, %v607_v7  ;;  %v921_v26 = vmul.f32 %v4407_v52, %v4396_v27  ;;  %v4425_v32 = vadd.f32 1.1920929e-07, %v661_v40  ;;  %v616_v7 = vpop.xlane.xlu0 %615  ;;  %vm927_vm6 = vweird.f32 %v4407_v52 }
 0x146   :  { %2766 = vst [vmem:[#allocation11 + $0x30] sm:$0xff] %v1793_v20  ;;  %v919_v34 = vsel %vm918_vm2, %v4367_v35, %v915_v44  ;;  %v663_v44 = vmul.f32 %v3917_v54, %v616_v7  ;;  %vm928_vm8 = vmor %vm926_vm5, %vm927_vm6 }
 0x147   :  { %v4429_v15 = vadd.f32 1.1920929e-07, %v660_v8  ;;  %v922_v36 = vmul.f32 %v4407_v52, %v921_v26  ;;  %3535 = vrsqrt.f32 %v4425_v32  ;;  %v1062_v16 = vmul.f32 %v3591_v23, %v919_v34  ;;  %v3383_v26 = vld [vmem:[#allocation9 + $0x3c] sm:$0xf] }
 0x148   :  { %v1063_v19 = vmul.f32 %v3592_v42, %v919_v34  ;;  %v4469_v23 = vadd.f32 1.1920929e-07, %v663_v44  ;;  %vm956_vm9 = vweird.f32 %v4425_v32 }
 0x149   :  { %3537 = vrsqrt.f32 %v4429_v15  ;;  %v923_v28 = vmul.f32 0.5, %v922_v36  ;;  %v4435_v2 = vpack.c.bf16 %v1062_v16, %v1060_v3  ;;  %vm946_vm11 = vweird.f32 %v4429_v15 }
 0x14a   :  { %v1881_v10 = vpop.f32.mrf.mxu2  ;;  %v1970_v47 = vpop.f32.mrf.mxu3  ;;  %vm976_vm1 = vweird.f32 %v4469_v23 }
 0x14b   :  { %v1971_v50 = vadd.f32 %v1970_v47, %v1881_v10  ;;  %v1706_v53 = vpop.f32.mrf.mxu0  ;;  %v1795_v37 = vpop.f32.mrf.mxu1  ;;  %v924_v11 = vsub.f32 1.5, %v923_v28  ;;  %v3026_v28 = vld [vmem:[#allocation9 + $0x38] sm:$0xf] }
 0x14c   :  { %v1796_v56 = vadd.f32 %v1795_v37, %v1706_v53  ;;  %v613_v10 = vpop.xlane.xlu2 %612 }
 0x14d   :  { %2767 = vst [vmem:[#allocation11 + $0x38] sm:$0xff] %v1971_v50  ;;  %v4439_v40 = vpop.eup %3535  ;;  %v662_v8 = vmul.f32 %v3917_v54, %v613_v10  ;;  %v925_v61 = vmul.f32 %v4407_v52, %v924_v11  ;;  %v3386_v10 = vld [vmem:[#allocation9 + $0x4c] sm:$0xf0] }
 0x14e   :  { %2772 = vst [vmem:[#allocation11 + $0x60] sm:$0xff] %v1796_v56  ;;  %1745 = vmatmul.bf16.gmra.mxu0 %v4401_v58  ;;  %1834 = vmatmul.bf16.gmra.mxu1 %v4403_v59  ;;  %v4437_v56 = vpack.c.bf16 %v1063_v19, %v1061_v9  ;;  %vm957_vm10 = vweird.f32 %v4439_v40 }
 0x14f   :  { %1923 = vmatmul.bf16.gmra.mxu2 %v4401_v58  ;;  %2012 = vmatmul.bf16.gmra.mxu3 %v4403_v59  ;;  %v4441_v24 = vpop.eup %3537  ;;  %v4467_v3 = vadd.f32 1.1920929e-07, %v662_v8  ;;  %v929_v39 = vsel %vm928_vm8, %v4407_v52, %v925_v61  ;;  %v3596_v52 = vld [vmem:[#allocation10 + $0x168] sm:$0xff]  ;;  %vm958_vm13 = vmor %vm956_vm9, %vm957_vm10 }
 0x150   :  { %v1065_v11 = vmul.f32 %v3596_v52, %v929_v39  ;;  %vm947_vm12 = vweird.f32 %v4441_v24  ;;  %v3597_v52 = vld [vmem:[#allocation10 + $0x190] sm:$0xff] }
 0x151   :  { %3539 = vrsqrt.f32 %v4467_v3  ;;  %vm948_vm14 = vmor %vm946_vm11, %vm947_vm12  ;;  %vm966_vm15 = vweird.f32 %v4467_v3 }
 0x152   :  { %v1884_v21 = vpop.f32.mrf.mxu2  ;;  %v1973_v30 = vpop.f32.mrf.mxu3  ;;  %3541 = vrsqrt.f32 %v4469_v23 }
 0x153   :  { %v1974_v60 = vadd.f32 %v1973_v30, %v1884_v21  ;;  %v1708_v20 = vpop.f32.mrf.mxu0  ;;  %v1797_v46 = vpop.f32.mrf.mxu1  ;;  %v3028_v21 = vld [vmem:[#allocation9 + $0x50] sm:$0xf0]  ;;  %v3431_v30 = vld [vmem:[#allocation9 + $0x1bc] sm:$0xf] }
 0x154   :  { %v1798_v57 = vadd.f32 %v1797_v46, %v1708_v20  ;;  %v951_v20 = vmul.f32 %v4439_v40, %v4425_v32  ;;  %v3031_v46 = vor.u32 %v3383_v26, %v3028_v21  ;;  %v3223_v34 = vor.u32 %v3431_v30, %v3220_v51 }
 0x155   :  { %2773 = vst [vmem:[#allocation11 + $0x68] sm:$0xff] %v1974_v60  ;;  %v935_v60 = vmul.f32 %v4405_v4, %v934_v41  ;;  %v3434_v41 = vld [vmem:[#allocation9 + $0x1cc] sm:$0xf0] }
 0x156   :  { %2778 = vst [vmem:[#allocation11 + $0x90] sm:$0xff] %v1798_v57  ;;  %v941_v57 = vmul.f32 %v4441_v24, %v4429_v15  ;;  %2232 = vmatpush.bf16.msrb.mxu2 %v3031_v46  ;;  %2321 = vmatpush.bf16.msrb.mxu3 %v3223_v34  ;;  %v952_v42 = vmul.f32 %v4439_v40, %v951_v20 }
 0x157   :  { %v939_v16 = vsel %vm938_vm7, %v4405_v4, %v935_v60  ;;  %v3027_v4 = vor.u32 %v3386_v10, %v3026_v28  ;;  %v4477_v51 = vpop.eup %3539 }
 0x158   :  { %v942_v27 = vmul.f32 %v4441_v24, %v941_v57  ;;  %v953_v8 = vmul.f32 0.5, %v952_v42  ;;  %vm967_vm0 = vweird.f32 %v4477_v51 }
 0x159   :  { %2054 = vmatpush.bf16.msrb.mxu0 %v3027_v4  ;;  %vm968_vm3 = vmor %vm966_vm15, %vm967_vm0 }
 0x15a   :  { %v1886_v35 = vpop.f32.mrf.mxu2  ;;  %v1975_v47 = vpop.f32.mrf.mxu3  ;;  %v943_v26 = vmul.f32 0.5, %v942_v27  ;;  %v954_v34 = vsub.f32 1.5, %v953_v8  ;;  %v3598_v8 = vld [vmem:[#allocation10 + $0x198] sm:$0xff] }
 0x15b   :  { %v1976_v50 = vadd.f32 %v1975_v47, %v1886_v35  ;;  %v1711_v53 = vpop.f32.mrf.mxu0  ;;  %v1800_v37 = vpop.f32.mrf.mxu1  ;;  %v3593_v35 = vld [vmem:[#allocation10 + $0x170] sm:$0xff] }
 0x15c   :  { %v1801_v6 = vadd.f32 %v1800_v37, %v1711_v53  ;;  %v1066_v47 = vmul.f32 %v3593_v35, %v939_v16  ;;  %v3218_v37 = vld [vmem:[#allocation9 + $0x1b8] sm:$0xf]  ;;  %v955_v42 = vmul.f32 %v4439_v40, %v954_v34 }
 0x15d   :  { %2779 = vst [vmem:[#allocation11 + $0x98] sm:$0xff] %v1976_v50  ;;  %v3594_v50 = vld [vmem:[#allocation10 + $0x178] sm:$0xff]  ;;  %v3219_v44 = vor.u32 %v3434_v41, %v3218_v37 }
 0x15e   :  { %2784 = vst [vmem:[#allocation11 + $0xc0] sm:$0xff] %v1801_v6  ;;  %1750 = vmatmul.bf16.gmra.mxu0 %v4435_v2  ;;  %1839 = vmatmul.bf16.gmra.mxu1 %v4437_v56  ;;  %v1067_v53 = vmul.f32 %v3594_v50, %v939_v16  ;;  %v3595_v6 = vld [vmem:[#allocation10 + $0x160] sm:$0xff]  ;;  %v961_v16 = vmul.f32 %v4477_v51, %v4467_v3 }
 0x15f   :  { %1928 = vmatmul.bf16.gmra.mxu2 %v4435_v2  ;;  %2017 = vmatmul.bf16.gmra.mxu3 %v4437_v56  ;;  %v1064_v7 = vmul.f32 %v3595_v6, %v929_v39  ;;  %v959_v4 = vsel %vm958_vm13, %v4439_v40, %v955_v42 }
 0x160   :  { %2143 = vmatpush.bf16.msrb.mxu1 %v3219_v44  ;;  %v4481_v57 = vpack.c.bf16 %v1067_v53, %v1065_v11  ;;  %v962_v10 = vmul.f32 %v4477_v51, %v961_v16  ;;  %v1070_v11 = vmul.f32 %v3597_v52, %v959_v4  ;;  %v1071_v44 = vmul.f32 %v3598_v8, %v959_v4  ;;  %v3196_v52 = vld [vmem:[#allocation9 + $0x1a0] sm:$0xf0] }
 0x161   :  { %v4479_v61 = vpack.c.bf16 %v1066_v47, %v1064_v7 }
 0x162   :  { %v1889_v36 = vpop.f32.mrf.mxu2  ;;  %v1978_v45 = vpop.f32.mrf.mxu3 }
 0x163   :  { %v1979_v38 = vadd.f32 %v1978_v45, %v1889_v36  ;;  %v1713_v9 = vpop.f32.mrf.mxu0  ;;  %v1802_v14 = vpop.f32.mrf.mxu1 }
 0x164   :  { %v1803_v19 = vadd.f32 %v1802_v14, %v1713_v9  ;;  %v622_v45 = vpop.xlane.xlu2 %621  ;;  %v944_v9 = vsub.f32 1.5, %v943_v26  ;;  %v619_v14 = vpop.xlane.xlu1 %618  ;;  %v963_v26 = vmul.f32 0.5, %v962_v10 }
 0x165   :  { %2785 = vst [vmem:[#allocation11 + $0xc8] sm:$0xff] %v1979_v38  ;;  %v4483_v38 = vpop.eup %3541  ;;  %v665_v32 = vmul.f32 %v3917_v54, %v622_v45  ;;  %v664_v39 = vmul.f32 %v3917_v54, %v619_v14 }
 0x166   :  { %2790 = vst [vmem:[#allocation11 + $0xf0] sm:$0xff] %v1803_v19  ;;  %v971_v19 = vmul.f32 %v4483_v38, %v4469_v23  ;;  %v945_v15 = vmul.f32 %v4441_v24, %v944_v9  ;;  %vm977_vm2 = vweird.f32 %v4483_v38 }
 0x167   :  { %v4502_v53 = vadd.f32 1.1920929e-07, %v665_v32  ;;  %v4506_v6 = vadd.f32 1.1920929e-07, %v664_v39  ;;  %vm978_vm4 = vmor %vm976_vm1, %vm977_vm2 }
 0x168   :  { %v972_v37 = vmul.f32 %v4483_v38, %v971_v19  ;;  %v949_v7 = vsel %vm948_vm14, %v4441_v24, %v945_v15  ;;  %v625_v15 = vpop.xlane.xlu0 %624 }
 0x169   :  { %3543 = vrsqrt.f32 %v4502_v53  ;;  %vm996_vm5 = vweird.f32 %v4502_v53  ;;  %vm986_vm7 = vweird.f32 %v4506_v6 }
 0x16a   :  { %v1891_v21 = vpop.f32.mrf.mxu2  ;;  %v1980_v30 = vpop.f32.mrf.mxu3  ;;  %3545 = vrsqrt.f32 %v4506_v6 }
 0x16b   :  { %v1981_v60 = vadd.f32 %v1980_v30, %v1891_v21  ;;  %v1716_v20 = vpop.f32.mrf.mxu0  ;;  %v1805_v46 = vpop.f32.mrf.mxu1  ;;  %v3599_v21 = vld [vmem:[#allocation10 + $0x180] sm:$0xff] }
 0x16c   :  { %v1806_v36 = vadd.f32 %v1805_v46, %v1716_v20  ;;  %v1068_v30 = vmul.f32 %v3599_v21, %v949_v7  ;;  %v973_v20 = vmul.f32 0.5, %v972_v37  ;;  %v628_v19 = vpop.xlane.xlu1 %627 }
 0x16d   :  { %2791 = vst [vmem:[#allocation11 + $0xf8] sm:$0xff] %v1981_v60  ;;  %v3600_v60 = vld [vmem:[#allocation10 + $0x188] sm:$0xff]  ;;  %v667_v10 = vmul.f32 %v3917_v54, %v628_v19 }
 0x16e   :  { %2796 = vst [vmem:[#allocation11 + $0x120] sm:$0xff] %v1806_v36  ;;  %1755 = vmatmul.bf16.gmra.mxu0 %v4479_v61  ;;  %1844 = vmatmul.bf16.gmra.mxu1 %v4481_v57  ;;  %v1069_v40 = vmul.f32 %v3600_v60, %v949_v7  ;;  %v964_v36 = vsub.f32 1.5, %v963_v26  ;;  %v4511_v14 = vpack.c.bf16 %v1070_v11, %v1068_v30  ;;  %v974_v32 = vsub.f32 1.5, %v973_v20 }
 0x16f   :  { %1933 = vmatmul.bf16.gmra.mxu2 %v4479_v61  ;;  %2022 = vmatmul.bf16.gmra.mxu3 %v4481_v57  ;;  %v4515_v39 = vpop.eup %3543 }
 0x170   :  { %v4513_v16 = vpack.c.bf16 %v1071_v44, %v1069_v40  ;;  %v975_v4 = vmul.f32 %v4483_v38, %v974_v32  ;;  %v991_v37 = vmul.f32 %v4515_v39, %v4502_v53  ;;  %vm997_vm6 = vweird.f32 %v4515_v39 }
 0x171   :  { %vm998_vm9 = vmor %vm996_vm5, %vm997_vm6 }
 0x172   :  { %v1894_v27 = vpop.f32.mrf.mxu2  ;;  %v1983_v28 = vpop.f32.mrf.mxu3  ;;  %v979_v40 = vsel %vm978_vm4, %v4483_v38, %v975_v4  ;;  %v992_v23 = vmul.f32 %v4515_v39, %v991_v37 }
 0x173   :  { %v1984_v35 = vadd.f32 %v1983_v28, %v1894_v27  ;;  %v1718_v47 = vpop.f32.mrf.mxu0  ;;  %v1807_v50 = vpop.f32.mrf.mxu1  ;;  %v965_v28 = vmul.f32 %v4477_v51, %v964_v36  ;;  %v3601_v36 = vld [vmem:[#allocation10 + $0x1a0] sm:$0xff] }
 0x174   :  { %v1808_v41 = vadd.f32 %v1807_v50, %v1718_v47  ;;  %v4519_v27 = vpop.eup %3545  ;;  %v3004_v47 = vld [vmem:[#allocation9 + $0x20] sm:$0xf0]  ;;  %v3425_v50 = vld [vmem:[#allocation9 + $0x18c] sm:$0xf] }
 0x175   :  { %2797 = vst [vmem:[#allocation11 + $0x128] sm:$0xff] %v1984_v35  ;;  %v3377_v35 = vld [vmem:[#allocation9 + $0xc] sm:$0xf]  ;;  %v981_v11 = vmul.f32 %v4519_v27, %v4506_v6  ;;  %v3199_v8 = vor.u32 %v3425_v50, %v3196_v52  ;;  %v969_v26 = vsel %vm968_vm3, %v4477_v51, %v965_v28  ;;  %v3002_v51 = vld [vmem:[#allocation9 + $0x8] sm:$0xf]  ;;  %vm987_vm8 = vweird.f32 %v4519_v27 }
 0x176   :  { %2802 = vst [vmem:[#allocation11 + $0x150] sm:$0xff] %v1808_v41  ;;  %v666_v41 = vmul.f32 %v3917_v54, %v625_v15  ;;  %v3007_v7 = vor.u32 %v3377_v35, %v3004_v47  ;;  %v4544_v54 = vadd.f32 1.1920929e-07, %v667_v10  ;;  %v3194_v15 = vld [vmem:[#allocation9 + $0x188] sm:$0xf]  ;;  %v3428_v28 = vld [vmem:[#allocation9 + $0x19c] sm:$0xf0]  ;;  %vm988_vm10 = vmor %vm986_vm7, %vm987_vm8 }
 0x177   :  { %2322 = vmatpush.bf16.msrb.mxu3 %v3199_v8  ;;  %v3604_v10 = vld [vmem:[#allocation10 + $0x1b8] sm:$0xff]  ;;  %v993_v47 = vmul.f32 0.5, %v992_v23  ;;  %v3195_v50 = vor.u32 %v3428_v28, %v3194_v15 }
 0x178   :  { %2233 = vmatpush.bf16.msrb.mxu2 %v3007_v7  ;;  %3547 = vrsqrt.f32 %v4544_v54  ;;  %v1075_v35 = vmul.f32 %v3604_v10, %v979_v40  ;;  %v3606_v28 = vld [vmem:[#allocation10 + $0x1d8] sm:$0xff]  ;;  %vm1016_vm11 = vweird.f32 %v4544_v54 }
 0x179   :  { %2144 = vmatpush.bf16.msrb.mxu1 %v3195_v50  ;;  %v3608_v50 = vld [vmem:[#allocation10 + $0x1c8] sm:$0xff] }
 0x17a   :  { %v1896_v46 = vpop.f32.mrf.mxu2  ;;  %v1985_v34 = vpop.f32.mrf.mxu3 }
 0x17b   :  { %v1986_v24 = vadd.f32 %v1985_v34, %v1896_v46  ;;  %v1721_v45 = vpop.f32.mrf.mxu0  ;;  %v1810_v9 = vpop.f32.mrf.mxu1  ;;  %v4548_v46 = vadd.f32 1.1920929e-07, %v666_v41  ;;  %v982_v34 = vmul.f32 %v4519_v27, %v981_v11 }
 0x17c   :  { %v1811_v42 = vadd.f32 %v1810_v9, %v1721_v45  ;;  %v3380_v45 = vld [vmem:[#allocation9 + $0x1c] sm:$0xf0]  ;;  %v3602_v9 = vld [vmem:[#allocation10 + $0x1a8] sm:$0xff] }
 0x17d   :  { %2803 = vst [vmem:[#allocation11 + $0x158] sm:$0xff] %v1986_v24  ;;  %v1072_v24 = vmul.f32 %v3601_v36, %v969_v26  ;;  %v1073_v32 = vmul.f32 %v3602_v9, %v969_v26  ;;  %v3003_v38 = vor.u32 %v3380_v45, %v3002_v51  ;;  %3549 = vrsqrt.f32 %v4548_v46 }
 0x17e   :  { %2808 = vst [vmem:[#allocation11 + $0x180] sm:$0xff] %v1811_v42  ;;  %1760 = vmatmul.bf16.gmra.mxu0 %v4511_v14  ;;  %1849 = vmatmul.bf16.gmra.mxu1 %v4513_v16  ;;  %v3603_v42 = vld [vmem:[#allocation10 + $0x1b0] sm:$0xff]  ;;  %v983_v4 = vmul.f32 0.5, %v982_v34  ;;  %vm1006_vm13 = vweird.f32 %v4548_v46 }
 0x17f   :  { %1938 = vmatmul.bf16.gmra.mxu2 %v4511_v14  ;;  %2027 = vmatmul.bf16.gmra.mxu3 %v4513_v16  ;;  %v1074_v19 = vmul.f32 %v3603_v42, %v979_v40 }
 0x180   :  { %2055 = vmatpush.bf16.msrb.mxu0 %v3003_v38  ;;  %v3605_v38 = vld [vmem:[#allocation10 + $0x1d0] sm:$0xff] }
 0x181   :  { %v4553_v8 = vpack.c.bf16 %v1074_v19, %v1072_v24 }
 0x182   :  { %v1899_v3 = vpop.f32.mrf.mxu2  ;;  %v1988_v44 = vpop.f32.mrf.mxu3 }
 0x183   :  { %v1989_v21 = vadd.f32 %v1988_v44, %v1899_v3  ;;  %v1723_v30 = vpop.f32.mrf.mxu0  ;;  %v1812_v60 = vpop.f32.mrf.mxu1  ;;  %v4555_v3 = vpack.c.bf16 %v1075_v35, %v1073_v32  ;;  %v994_v44 = vsub.f32 1.5, %v993_v47  ;;  %v3607_v35 = vld [vmem:[#allocation10 + $0x1c0] sm:$0xff] }
 0x184   :  { %v1813_v20 = vadd.f32 %v1812_v60, %v1723_v30  ;;  %v984_v30 = vsub.f32 1.5, %v983_v4 }
 0x185   :  { %2809 = vst [vmem:[#allocation11 + $0x188] sm:$0xff] %v1989_v21  ;;  %v4557_v21 = vpop.eup %3547  ;;  %v995_v40 = vmul.f32 %v4515_v39, %v994_v44 }
 0x186   :  { %2814 = vst [vmem:[#allocation11 + $0x1b0] sm:$0xff] %v1813_v20  ;;  %v4559_v60 = vpop.eup %3549  ;;  %v1011_v53 = vmul.f32 %v4557_v21, %v4544_v54  ;;  %v985_v23 = vmul.f32 %v4519_v27, %v984_v30  ;;  %vm1017_vm12 = vweird.f32 %v4557_v21  ;;  %v3178_v54 = vld [vmem:[#allocation9 + $0x160] sm:$0xf] }
 0x187   :  { %v1001_v20 = vmul.f32 %v4559_v60, %v4548_v46  ;;  %v999_v45 = vsel %vm998_vm9, %v4515_v39, %v995_v40  ;;  %vm1007_vm14 = vweird.f32 %v4559_v60  ;;  %vm1018_vm15 = vmor %vm1016_vm11, %vm1017_vm12 }
 0x188   :  { %v1012_v9 = vmul.f32 %v4557_v21, %v1011_v53  ;;  %v989_v42 = vsel %vm988_vm10, %v4519_v27, %v985_v23  ;;  %v1078_v15 = vmul.f32 %v3605_v38, %v999_v45  ;;  %v1079_v10 = vmul.f32 %v3606_v28, %v999_v45  ;;  %v3420_v23 = vld [vmem:[#allocation9 + $0x164] sm:$0xf]  ;;  %vm1008_vm0 = vmor %vm1006_vm13, %vm1007_vm14 }
 0x189   :  { %v1002_v19 = vmul.f32 %v4559_v60, %v1001_v20  ;;  %v1076_v47 = vmul.f32 %v3607_v35, %v989_v42  ;;  %v1077_v4 = vmul.f32 %v3608_v50, %v989_v42  ;;  %v3180_v20 = vld [vmem:[#allocation9 + $0x178] sm:$0xf0]  ;;  %v3609_v35 = vld [vmem:[#allocation10 + $0x1f0] sm:$0xff] }
 0x18a   :  { %v1901_v37 = vpop.f32.mrf.mxu2  ;;  %v1990_v41 = vpop.f32.mrf.mxu3 }
 0x18b   :  { %v1991_v7 = vadd.f32 %v1990_v41, %v1901_v37  ;;  %v1726_v52 = vpop.f32.mrf.mxu0  ;;  %v1815_v11 = vpop.f32.mrf.mxu1  ;;  %v1013_v37 = vmul.f32 0.5, %v1012_v9  ;;  %v1003_v41 = vmul.f32 0.5, %v1002_v19  ;;  %v4579_v27 = vpack.c.bf16 %v1078_v15, %v1076_v47 }
 0x18c   :  { %v1816_v26 = vadd.f32 %v1815_v11, %v1726_v52 }
 0x18d   :  { %2815 = vst [vmem:[#allocation11 + $0x1b8] sm:$0xff] %v1991_v7  ;;  %v1014_v30 = vsub.f32 1.5, %v1013_v37  ;;  %v1004_v53 = vsub.f32 1.5, %v1003_v41  ;;  %v3471_v37 = vld [vmem:[#allocation9 + $0x2f4] sm:$0xf0] }
 0x18e   :  { %2820 = vst [vmem:[#allocation11 + $0x1e0] sm:$0xff] %v1816_v26  ;;  %1765 = vmatmul.bf16.gmra.mxu0 %v4553_v8  ;;  %1854 = vmatmul.bf16.gmra.mxu1 %v4555_v3  ;;  %v4581_v26 = vpack.c.bf16 %v1079_v10, %v1077_v4  ;;  %v3423_v10 = vld [vmem:[#allocation9 + $0x174] sm:$0xf0]  ;;  %v3370_v4 = vld [vmem:[#allocation9 + $0x2e0] sm:$0xf] }
 0x18f   :  { %1943 = vmatmul.bf16.gmra.mxu2 %v4553_v8  ;;  %2032 = vmatmul.bf16.gmra.mxu3 %v4555_v3  ;;  %v3179_v50 = vor.u32 %v3423_v10, %v3178_v54  ;;  %v3610_v41 = vld [vmem:[#allocation10 + $0x1f8] sm:$0xff]  ;;  %v3414_v54 = vld [vmem:[#allocation9 + $0x134] sm:$0xf]  ;;  %v3156_v10 = vld [vmem:[#allocation9 + $0x148] sm:$0xf0] }
 0x191   :  { %2404 = vmatpush.bf16.msra.mxu0 %v3179_v50  ;;  %v3348_v50 = vld [vmem:[#allocation9 + $0x2c8] sm:$0xf0] }
 0x192   :  { %v1904_v34 = vpop.f32.mrf.mxu2  ;;  %v1993_v6 = vpop.f32.mrf.mxu3 }
 0x193   :  { %v1994_v36 = vadd.f32 %v1993_v6, %v1904_v34  ;;  %v1728_v24 = vpop.f32.mrf.mxu0  ;;  %v1817_v51 = vpop.f32.mrf.mxu1  ;;  %v3468_v34 = vld [vmem:[#allocation9 + $0x2e4] sm:$0xf]  ;;  %v1015_v6 = vmul.f32 %v4557_v21, %v1014_v30  ;;  %v3371_v30 = vor.u32 %v3471_v37, %v3370_v4 }
 0x194   :  { %v1818_v32 = vadd.f32 %v1817_v51, %v1728_v24  ;;  %v3372_v24 = vld [vmem:[#allocation9 + $0x2f8] sm:$0xf0]  ;;  %v1005_v51 = vmul.f32 %v4559_v60, %v1004_v53 }
 0x195   :  { %2821 = vst [vmem:[#allocation11 + $0x1e8] sm:$0xff] %v1994_v36  ;;  %v3183_v36 = vor.u32 %v3420_v23, %v3180_v20  ;;  %v3375_v45 = vor.u32 %v3468_v34, %v3372_v24  ;;  %v1019_v38 = vsel %vm1018_vm15, %v4557_v21, %v1015_v6  ;;  %2493 = vmatpush.bf16.msra.mxu1 %v3371_v30  ;;  %v3417_v30 = vld [vmem:[#allocation9 + $0x144] sm:$0xf0] }
 0x196   :  { %2826 = vst [vmem:[#allocation11 + $0x210] sm:$0xff] %v1818_v32  ;;  %v1009_v28 = vsel %vm1008_vm0, %v4559_v60, %v1005_v51  ;;  %v1082_v47 = vmul.f32 %v3609_v35, %v1019_v38  ;;  %v3462_v35 = vld [vmem:[#allocation9 + $0x2b4] sm:$0xf] }
 0x197   :  { %2582 = vmatpush.bf16.msra.mxu2 %v3183_v36  ;;  %2671 = vmatpush.bf16.msra.mxu3 %v3375_v45  ;;  %v3351_v4 = vor.u32 %v3462_v35, %v3348_v50  ;;  %v3408_v50 = vld [vmem:[#allocation9 + $0x104] sm:$0xf] }
 0x19a   :  { %v1906_v39 = vpop.f32.mrf.mxu2  ;;  %v1995_v7 = vpop.f32.mrf.mxu3 }
 0x19b   :  { %v1996_v52 = vadd.f32 %v1995_v7, %v1906_v39  ;;  %v1731_v11 = vpop.f32.mrf.mxu0  ;;  %v1820_v44 = vpop.f32.mrf.mxu1  ;;  %v1083_v39 = vmul.f32 %v3610_v41, %v1019_v38  ;;  %v3611_v7 = vld [vmem:[#allocation10 + $0x1e0] sm:$0xff]  ;;  %2672 = vmatpush.bf16.msra.mxu3 %v3351_v4  ;;  %v3132_v4 = vld [vmem:[#allocation9 + $0x118] sm:$0xf0] }
 0x19c   :  { %v1821_v40 = vadd.f32 %v1820_v44, %v1731_v11  ;;  %v3612_v11 = vld [vmem:[#allocation10 + $0x1e8] sm:$0xff] }
 0x19d   :  { %2827 = vst [vmem:[#allocation11 + $0x218] sm:$0xff] %v1996_v52  ;;  %v1080_v52 = vmul.f32 %v3611_v7, %v1009_v28  ;;  %v1081_v44 = vmul.f32 %v3612_v11, %v1009_v28 }
 0x19e   :  { %2832 = vst [vmem:[#allocation11 + $0x240] sm:$0xff] %v1821_v40  ;;  %1770 = vmatmul.bf16.gmra.mxu0 %v4579_v27  ;;  %1859 = vmatmul.bf16.gmra.mxu1 %v4581_v26 }
 0x19f   :  { %1948 = vmatmul.bf16.gmra.mxu2 %v4579_v27  ;;  %2037 = vmatmul.bf16.gmra.mxu3 %v4581_v26  ;;  %v4597_v20 = vpack.c.bf16 %v1082_v47, %v1080_v52  ;;  %v4599_v34 = vpack.c.bf16 %v1083_v39, %v1081_v44  ;;  %v3159_v47 = vor.u32 %v3414_v54, %v3156_v10  ;;  %v3154_v44 = vld [vmem:[#allocation9 + $0x130] sm:$0xf] }
 0x1a1   :  { %2583 = vmatpush.bf16.msra.mxu2 %v3159_v47 }
 0x1a2   :  { %v1909_v46 = vpop.f32.mrf.mxu2  ;;  %v1998_v9 = vpop.f32.mrf.mxu3 }
 0x1a3   :  { %v1999_v32 = vadd.f32 %v1998_v9, %v1909_v46  ;;  %v1733_v42 = vpop.f32.mrf.mxu0  ;;  %v1822_v19 = vpop.f32.mrf.mxu1 }
 0x1a4   :  { %v1823_v15 = vadd.f32 %v1822_v19, %v1733_v42 }
 0x1a5   :  { %2833 = vst [vmem:[#allocation11 + $0x248] sm:$0xff] %v1999_v32 }
 0x1a6   :  { %2838 = vst [vmem:[#allocation11 + $0x270] sm:$0xff] %v1823_v15 }
 0x1aa   :  { %v1911_v21 = vpop.f32.mrf.mxu2  ;;  %v2000_v40 = vpop.f32.mrf.mxu3 }
 0x1ab   :  { %v2001_v60 = vadd.f32 %v2000_v40, %v1911_v21  ;;  %v1736_v53 = vpop.f32.mrf.mxu0  ;;  %v1825_v23 = vpop.f32.mrf.mxu1  ;;  %v3155_v21 = vor.u32 %v3417_v30, %v3154_v44  ;;  %v3346_v40 = vld [vmem:[#allocation9 + $0x2b0] sm:$0xf] }
 0x1ac   :  { %v1826_v6 = vadd.f32 %v1825_v23, %v1736_v53 }
 0x1ad   :  { %2839 = vst [vmem:[#allocation11 + $0x278] sm:$0xff] %v2001_v60  ;;  %v3465_v60 = vld [vmem:[#allocation9 + $0x2c4] sm:$0xf0]  ;;  %2405 = vmatpush.bf16.msra.mxu0 %v3155_v21 }
 0x1ae   :  { %2844 = vst [vmem:[#allocation11 + $0x2a0] sm:$0xff] %v1826_v6  ;;  %1775 = vmatmul.bf16.gmra.mxu0 %v4597_v20  ;;  %1864 = vmatmul.bf16.gmra.mxu1 %v4599_v34  ;;  %v3347_v53 = vor.u32 %v3465_v60, %v3346_v40  ;;  %v3130_v60 = vld [vmem:[#allocation9 + $0x100] sm:$0xf] }
 0x1af   :  { %1953 = vmatmul.bf16.gmra.mxu2 %v4597_v20  ;;  %2042 = vmatmul.bf16.gmra.mxu3 %v4599_v34 }
 0x1b0   :  { %2494 = vmatpush.bf16.msra.mxu1 %v3347_v53  ;;  %v3411_v53 = vld [vmem:[#allocation9 + $0x114] sm:$0xf0] }
 0x1b2   :  { %v1914_v36 = vpop.f32.mrf.mxu2  ;;  %v2003_v24 = vpop.f32.mrf.mxu3 }
 0x1b3   :  { %v2004_v51 = vadd.f32 %v2003_v24, %v1914_v36  ;;  %v1738_v45 = vpop.f32.mrf.mxu0  ;;  %v1827_v46 = vpop.f32.mrf.mxu1 }
 0x1b4   :  { %v1828_v9 = vadd.f32 %v1827_v46, %v1738_v45 }
 0x1b5   :  { %2845 = vst [vmem:[#allocation11 + $0x2a8] sm:$0xff] %v2004_v51 }
 0x1b6   :  { %2850 = vst [vmem:[#allocation11 + $0x2d0] sm:$0xff] %v1828_v9 }
 0x1ba   :  { %v1916_v32 = vpop.f32.mrf.mxu2  ;;  %v2005_v42 = vpop.f32.mrf.mxu3 }
 0x1bb   :  { %v2006_v19 = vadd.f32 %v2005_v42, %v1916_v32  ;;  %v1741_v38 = vpop.f32.mrf.mxu0  ;;  %v1830_v15 = vpop.f32.mrf.mxu1 }
 0x1bc   :  { %v1831_v28 = vadd.f32 %v1830_v15, %v1741_v38 }
 0x1bd   :  { %2851 = vst [vmem:[#allocation11 + $0x2d8] sm:$0xff] %v2006_v19 }
 0x1be   :  { %2856 = vst [vmem:[#allocation11 + $0x300] sm:$0xff] %v1831_v28  ;;  %2056 = vmatmul.bf16.vlgmr.msrb.gmra.mxu0 %v3989_v0  ;;  %2145 = vmatmul.bf16.vlgmr.msrb.gmra.mxu1 %v3991_v1 }
 0x1bf   :  { %2234 = vmatmul.bf16.vlgmr.msrb.gmra.mxu2 %v3989_v0  ;;  %2323 = vmatmul.bf16.vlgmr.msrb.gmra.mxu3 %v3991_v1 }
 0x1c2   :  { %v1919_v37 = vpop.f32.mrf.mxu2  ;;  %v2008_v41 = vpop.f32.mrf.mxu3 }
 0x1c3   :  { %v2009_v39 = vadd.f32 %v2008_v41, %v1919_v37  ;;  %v1743_v7 = vpop.f32.mrf.mxu0  ;;  %v1832_v52 = vpop.f32.mrf.mxu1  ;;  %v3456_v37 = vld [vmem:[#allocation9 + $0x284] sm:$0xf]  ;;  %v3135_v41 = vor.u32 %v3408_v50, %v3132_v4 }
 0x1c4   :  { %v1833_v11 = vadd.f32 %v1832_v52, %v1743_v7 }
 0x1c5   :  { %2857 = vst [vmem:[#allocation11 + $0x308] sm:$0xff] %v2009_v39  ;;  %v3324_v39 = vld [vmem:[#allocation9 + $0x298] sm:$0xf0]  ;;  %2584 = vmatpush.bf16.msra.mxu2 %v3135_v41 }
 0x1c6   :  { %2862 = vst [vmem:[#allocation11 + $0x330] sm:$0xff] %v1833_v11  ;;  %v3327_v7 = vor.u32 %v3456_v37, %v3324_v39  ;;  %v3402_v39 = vld [vmem:[#allocation9 + $0xd4] sm:$0xf] }
 0x1c8   :  { %2673 = vmatpush.bf16.msra.mxu3 %v3327_v7  ;;  %v3108_v7 = vld [vmem:[#allocation9 + $0xe8] sm:$0xf0] }
 0x1ca   :  { %v1921_v23 = vpop.f32.mrf.mxu2  ;;  %v2010_v6 = vpop.f32.mrf.mxu3 }
 0x1cb   :  { %v2011_v36 = vadd.f32 %v2010_v6, %v1921_v23  ;;  %v1746_v24 = vpop.f32.mrf.mxu0  ;;  %v1835_v51 = vpop.f32.mrf.mxu1  ;;  %v3131_v23 = vor.u32 %v3411_v53, %v3130_v60  ;;  %v3322_v6 = vld [vmem:[#allocation9 + $0x280] sm:$0xf] }
 0x1cc   :  { %v1836_v45 = vadd.f32 %v1835_v51, %v1746_v24 }
 0x1cd   :  { %2863 = vst [vmem:[#allocation11 + $0x338] sm:$0xff] %v2011_v36  ;;  %v3459_v36 = vld [vmem:[#allocation9 + $0x294] sm:$0xf0]  ;;  %2406 = vmatpush.bf16.msra.mxu0 %v3131_v23 }
 0x1ce   :  { %2868 = vst [vmem:[#allocation11 + $0x360] sm:$0xff] %v1836_v45  ;;  %2061 = vmatmul.bf16.gmra.mxu0 %v4052_v12  ;;  %2150 = vmatmul.bf16.gmra.mxu1 %v4057_v17  ;;  %v3323_v24 = vor.u32 %v3459_v36, %v3322_v6  ;;  %v3106_v36 = vld [vmem:[#allocation9 + $0xd0] sm:$0xf] }
 0x1cf   :  { %2239 = vmatmul.bf16.gmra.mxu2 %v4052_v12  ;;  %2328 = vmatmul.bf16.gmra.mxu3 %v4057_v17 }
 0x1d0   :  { %2495 = vmatpush.bf16.msra.mxu1 %v3323_v24  ;;  %v3405_v24 = vld [vmem:[#allocation9 + $0xe4] sm:$0xf0] }
 0x1d2   :  { %v1924_v46 = vpop.f32.mrf.mxu2  ;;  %v2013_v9 = vpop.f32.mrf.mxu3 }
 0x1d3   :  { %v2014_v32 = vadd.f32 %v2013_v9, %v1924_v46  ;;  %v1748_v42 = vpop.f32.mrf.mxu0  ;;  %v1837_v19 = vpop.f32.mrf.mxu1 }
 0x1d4   :  { %v1838_v38 = vadd.f32 %v1837_v19, %v1748_v42 }
 0x1d5   :  { %2869 = vst [vmem:[#allocation11 + $0x368] sm:$0xff] %v2014_v32 }
 0x1d6   :  { %2874 = vst [vmem:[#allocation11 + $0x390] sm:$0xff] %v1838_v38 }
 0x1da   :  { %v1926_v15 = vpop.f32.mrf.mxu2  ;;  %v2015_v28 = vpop.f32.mrf.mxu3 }
 0x1db   :  { %v2016_v54 = vadd.f32 %v2015_v28, %v1926_v15  ;;  %v1751_v10 = vpop.f32.mrf.mxu0  ;;  %v1840_v35 = vpop.f32.mrf.mxu1 }
 0x1dc   :  { %v1841_v47 = vadd.f32 %v1840_v35, %v1751_v10 }
 0x1dd   :  { %2875 = vst [vmem:[#allocation11 + $0x398] sm:$0xff] %v2016_v54 }
 0x1de   :  { %2880 = vst [vmem:[#allocation11 + $0x3c0] sm:$0xff] %v1841_v47  ;;  %2066 = vmatmul.bf16.gmra.mxu0 %v4108_v29  ;;  %2155 = vmatmul.bf16.gmra.mxu1 %v4110_v31 }
 0x1df   :  { %2244 = vmatmul.bf16.gmra.mxu2 %v4108_v29  ;;  %2333 = vmatmul.bf16.gmra.mxu3 %v4110_v31 }
 0x1e2   :  { %v1929_v52 = vpop.f32.mrf.mxu2  ;;  %v2018_v11 = vpop.f32.mrf.mxu3 }
 0x1e3   :  { %v2019_v44 = vadd.f32 %v2018_v11, %v1929_v52  ;;  %v1753_v30 = vpop.f32.mrf.mxu0  ;;  %v1842_v21 = vpop.f32.mrf.mxu1  ;;  %v3450_v52 = vld [vmem:[#allocation9 + $0x254] sm:$0xf]  ;;  %v3111_v11 = vor.u32 %v3402_v39, %v3108_v7 }
 0x1e4   :  { %v1843_v40 = vadd.f32 %v1842_v21, %v1753_v30 }
 0x1e5   :  { %2881 = vst [vmem:[#allocation11 + $0x3c8] sm:$0xff] %v2019_v44  ;;  %v3300_v44 = vld [vmem:[#allocation9 + $0x268] sm:$0xf0]  ;;  %2585 = vmatpush.bf16.msra.mxu2 %v3111_v11 }
 0x1e6   :  { %2886 = vst [vmem:[#allocation11 + $0x3f0] sm:$0xff] %v1843_v40  ;;  %v3303_v30 = vor.u32 %v3450_v52, %v3300_v44  ;;  %v3396_v44 = vld [vmem:[#allocation9 + $0xa4] sm:$0xf] }
 0x1e8   :  { %2674 = vmatpush.bf16.msra.mxu3 %v3303_v30  ;;  %v3084_v30 = vld [vmem:[#allocation9 + $0xb8] sm:$0xf0] }
 0x1ea   :  { %v1931_v51 = vpop.f32.mrf.mxu2  ;;  %v2020_v45 = vpop.f32.mrf.mxu3 }
 0x1eb   :  { %v2021_v46 = vadd.f32 %v2020_v45, %v1931_v51  ;;  %v1756_v9 = vpop.f32.mrf.mxu0  ;;  %v1845_v32 = vpop.f32.mrf.mxu1  ;;  %v3107_v51 = vor.u32 %v3405_v24, %v3106_v36  ;;  %v3298_v45 = vld [vmem:[#allocation9 + $0x250] sm:$0xf] }
 0x1ec   :  { %v1846_v42 = vadd.f32 %v1845_v32, %v1756_v9 }
 0x1ed   :  { %2887 = vst [vmem:[#allocation11 + $0x3f8] sm:$0xff] %v2021_v46  ;;  %v3453_v46 = vld [vmem:[#allocation9 + $0x264] sm:$0xf0]  ;;  %2407 = vmatpush.bf16.msra.mxu0 %v3107_v51 }
 0x1ee   :  { %2892 = vst [vmem:[#allocation11 + $0x420] sm:$0xff] %v1846_v42  ;;  %2071 = vmatmul.bf16.gmra.mxu0 %v4161_v48  ;;  %2160 = vmatmul.bf16.gmra.mxu1 %v4163_v49  ;;  %v3299_v9 = vor.u32 %v3453_v46, %v3298_v45  ;;  %v3082_v46 = vld [vmem:[#allocation9 + $0xa0] sm:$0xf] }
 0x1ef   :  { %2249 = vmatmul.bf16.gmra.mxu2 %v4161_v48  ;;  %2338 = vmatmul.bf16.gmra.mxu3 %v4163_v49 }
 0x1f0   :  { %2496 = vmatpush.bf16.msra.mxu1 %v3299_v9  ;;  %v3399_v9 = vld [vmem:[#allocation9 + $0xb4] sm:$0xf0] }
 0x1f2   :  { %v1934_v19 = vpop.f32.mrf.mxu2  ;;  %v2023_v38 = vpop.f32.mrf.mxu3 }
 0x1f3   :  { %v2024_v15 = vadd.f32 %v2023_v38, %v1934_v19  ;;  %v1758_v28 = vpop.f32.mrf.mxu0  ;;  %v1847_v54 = vpop.f32.mrf.mxu1 }
 0x1f4   :  { %v1848_v10 = vadd.f32 %v1847_v54, %v1758_v28 }
 0x1f5   :  { %2893 = vst [vmem:[#allocation11 + $0x428] sm:$0xff] %v2024_v15 }
 0x1f6   :  { %2898 = vst [vmem:[#allocation11 + $0x450] sm:$0xff] %v1848_v10 }
 0x1fa   :  { %v1936_v35 = vpop.f32.mrf.mxu2  ;;  %v2025_v47 = vpop.f32.mrf.mxu3 }
 0x1fb   :  { %v2026_v50 = vadd.f32 %v2025_v47, %v1936_v35  ;;  %v1761_v4 = vpop.f32.mrf.mxu0  ;;  %v1850_v37 = vpop.f32.mrf.mxu1 }
 0x1fc   :  { %v1851_v41 = vadd.f32 %v1850_v37, %v1761_v4 }
 0x1fd   :  { %2899 = vst [vmem:[#allocation11 + $0x458] sm:$0xff] %v2026_v50 }
 0x1fe   :  { %2904 = vst [vmem:[#allocation11 + $0x480] sm:$0xff] %v1851_v41  ;;  %2076 = vmatmul.bf16.gmra.mxu0 %v4207_v22  ;;  %2165 = vmatmul.bf16.gmra.mxu1 %v4209_v5 }
 0x1ff   :  { %2254 = vmatmul.bf16.gmra.mxu2 %v4207_v22  ;;  %2343 = vmatmul.bf16.gmra.mxu3 %v4209_v5 }
 0x202   :  { %v1939_v21 = vpop.f32.mrf.mxu2  ;;  %v2028_v40 = vpop.f32.mrf.mxu3 }
 0x203   :  { %v2029_v60 = vadd.f32 %v2028_v40, %v1939_v21  ;;  %v1763_v53 = vpop.f32.mrf.mxu0  ;;  %v1852_v23 = vpop.f32.mrf.mxu1  ;;  %v3444_v21 = vld [vmem:[#allocation9 + $0x224] sm:$0xf]  ;;  %v3087_v40 = vor.u32 %v3396_v44, %v3084_v30 }
 0x204   :  { %v1853_v6 = vadd.f32 %v1852_v23, %v1763_v53 }
 0x205   :  { %2905 = vst [vmem:[#allocation11 + $0x488] sm:$0xff] %v2029_v60  ;;  %v3276_v60 = vld [vmem:[#allocation9 + $0x238] sm:$0xf0]  ;;  %2586 = vmatpush.bf16.msra.mxu2 %v3087_v40 }
 0x206   :  { %2910 = vst [vmem:[#allocation11 + $0x4b0] sm:$0xff] %v1853_v6  ;;  %v3279_v53 = vor.u32 %v3444_v21, %v3276_v60  ;;  %v3390_v60 = vld [vmem:[#allocation9 + $0x74] sm:$0xf] }
 0x208   :  { %2675 = vmatpush.bf16.msra.mxu3 %v3279_v53  ;;  %v3060_v53 = vld [vmem:[#allocation9 + $0x88] sm:$0xf0] }
 0x20a   :  { %v1941_v32 = vpop.f32.mrf.mxu2  ;;  %v2030_v42 = vpop.f32.mrf.mxu3 }
 0x20b   :  { %v2031_v19 = vadd.f32 %v2030_v42, %v1941_v32  ;;  %v1766_v38 = vpop.f32.mrf.mxu0  ;;  %v1855_v15 = vpop.f32.mrf.mxu1  ;;  %v3083_v32 = vor.u32 %v3399_v9, %v3082_v46  ;;  %v3274_v42 = vld [vmem:[#allocation9 + $0x220] sm:$0xf] }
 0x20c   :  { %v1856_v28 = vadd.f32 %v1855_v15, %v1766_v38 }
 0x20d   :  { %2911 = vst [vmem:[#allocation11 + $0x4b8] sm:$0xff] %v2031_v19  ;;  %v3447_v19 = vld [vmem:[#allocation9 + $0x234] sm:$0xf0]  ;;  %2408 = vmatpush.bf16.msra.mxu0 %v3083_v32 }
 0x20e   :  { %2916 = vst [vmem:[#allocation11 + $0x4e0] sm:$0xff] %v1856_v28  ;;  %2081 = vmatmul.bf16.gmra.mxu0 %v4249_v33  ;;  %2170 = vmatmul.bf16.gmra.mxu1 %v4251_v55  ;;  %v3275_v38 = vor.u32 %v3447_v19, %v3274_v42  ;;  %v3058_v19 = vld [vmem:[#allocation9 + $0x70] sm:$0xf] }
 0x20f   :  { %2259 = vmatmul.bf16.gmra.mxu2 %v4249_v33  ;;  %2348 = vmatmul.bf16.gmra.mxu3 %v4251_v55 }
 0x210   :  { %2497 = vmatpush.bf16.msra.mxu1 %v3275_v38  ;;  %v3393_v38 = vld [vmem:[#allocation9 + $0x84] sm:$0xf0] }
 0x212   :  { %v1944_v54 = vpop.f32.mrf.mxu2  ;;  %v2033_v10 = vpop.f32.mrf.mxu3 }
 0x213   :  { %v2034_v35 = vadd.f32 %v2033_v10, %v1944_v54  ;;  %v1768_v47 = vpop.f32.mrf.mxu0  ;;  %v1857_v50 = vpop.f32.mrf.mxu1 }
 0x214   :  { %v1858_v4 = vadd.f32 %v1857_v50, %v1768_v47 }
 0x215   :  { %2917 = vst [vmem:[#allocation11 + $0x4e8] sm:$0xff] %v2034_v35 }
 0x216   :  { %2922 = vst [vmem:[#allocation11 + $0x510] sm:$0xff] %v1858_v4 }
 0x21a   :  { %v1946_v37 = vpop.f32.mrf.mxu2  ;;  %v2035_v41 = vpop.f32.mrf.mxu3 }
 0x21b   :  { %v2036_v39 = vadd.f32 %v2035_v41, %v1946_v37  ;;  %v1771_v7 = vpop.f32.mrf.mxu0  ;;  %v1860_v52 = vpop.f32.mrf.mxu1 }
 0x21c   :  { %v1861_v11 = vadd.f32 %v1860_v52, %v1771_v7 }
 0x21d   :  { %2923 = vst [vmem:[#allocation11 + $0x518] sm:$0xff] %v2036_v39 }
 0x21e   :  { %2928 = vst [vmem:[#allocation11 + $0x540] sm:$0xff] %v1861_v11  ;;  %2086 = vmatmul.bf16.gmra.mxu0 %v4283_v18  ;;  %2175 = vmatmul.bf16.gmra.mxu1 %v4285_v43 }
 0x21f   :  { %2264 = vmatmul.bf16.gmra.mxu2 %v4283_v18  ;;  %2353 = vmatmul.bf16.gmra.mxu3 %v4285_v43 }
 0x222   :  { %v1949_v23 = vpop.f32.mrf.mxu2  ;;  %v2038_v6 = vpop.f32.mrf.mxu3 }
 0x223   :  { %v2039_v36 = vadd.f32 %v2038_v6, %v1949_v23  ;;  %v1773_v24 = vpop.f32.mrf.mxu0  ;;  %v1862_v51 = vpop.f32.mrf.mxu1  ;;  %v3438_v23 = vld [vmem:[#allocation9 + $0x1f4] sm:$0xf]  ;;  %v3063_v6 = vor.u32 %v3390_v60, %v3060_v53 }
 0x224   :  { %v1863_v45 = vadd.f32 %v1862_v51, %v1773_v24 }
 0x225   :  { %2929 = vst [vmem:[#allocation11 + $0x548] sm:$0xff] %v2039_v36  ;;  %v3252_v36 = vld [vmem:[#allocation9 + $0x208] sm:$0xf0]  ;;  %2587 = vmatpush.bf16.msra.mxu2 %v3063_v6 }
 0x226   :  { %2934 = vst [vmem:[#allocation11 + $0x570] sm:$0xff] %v1863_v45  ;;  %v3255_v24 = vor.u32 %v3438_v23, %v3252_v36  ;;  %v3384_v36 = vld [vmem:[#allocation9 + $0x44] sm:$0xf] }
 0x228   :  { %2676 = vmatpush.bf16.msra.mxu3 %v3255_v24  ;;  %v3036_v24 = vld [vmem:[#allocation9 + $0x58] sm:$0xf0] }
 0x22a   :  { %v1951_v15 = vpop.f32.mrf.mxu2  ;;  %v2040_v28 = vpop.f32.mrf.mxu3 }
 0x22b   :  { %v2041_v54 = vadd.f32 %v2040_v28, %v1951_v15  ;;  %v1776_v10 = vpop.f32.mrf.mxu0  ;;  %v1865_v35 = vpop.f32.mrf.mxu1  ;;  %v3059_v15 = vor.u32 %v3393_v38, %v3058_v19  ;;  %v3250_v28 = vld [vmem:[#allocation9 + $0x1f0] sm:$0xf] }
 0x22c   :  { %v1866_v47 = vadd.f32 %v1865_v35, %v1776_v10 }
 0x22d   :  { %2935 = vst [vmem:[#allocation11 + $0x578] sm:$0xff] %v2041_v54  ;;  %v3441_v54 = vld [vmem:[#allocation9 + $0x204] sm:$0xf0]  ;;  %2409 = vmatpush.bf16.msra.mxu0 %v3059_v15 }
 0x22e   :  { %2940 = vst [vmem:[#allocation11 + $0x5a0] sm:$0xff] %v1866_v47  ;;  %2091 = vmatmul.bf16.gmra.mxu0 %v4327_v62  ;;  %2180 = vmatmul.bf16.gmra.mxu1 %v4329_v63  ;;  %v3251_v10 = vor.u32 %v3441_v54, %v3250_v28  ;;  %v3034_v54 = vld [vmem:[#allocation9 + $0x40] sm:$0xf] }
 0x22f   :  { %2269 = vmatmul.bf16.gmra.mxu2 %v4327_v62  ;;  %2358 = vmatmul.bf16.gmra.mxu3 %v4329_v63 }
 0x230   :  { %2498 = vmatpush.bf16.msra.mxu1 %v3251_v10  ;;  %v3387_v10 = vld [vmem:[#allocation9 + $0x54] sm:$0xf0] }
 0x232   :  { %v1954_v50 = vpop.f32.mrf.mxu2  ;;  %v2043_v4 = vpop.f32.mrf.mxu3 }
 0x233   :  { %v2044_v37 = vadd.f32 %v2043_v4, %v1954_v50  ;;  %v1778_v41 = vpop.f32.mrf.mxu0  ;;  %v1867_v39 = vpop.f32.mrf.mxu1 }
 0x234   :  { %v1868_v7 = vadd.f32 %v1867_v39, %v1778_v41 }
 0x235   :  { %2941 = vst [vmem:[#allocation11 + $0x5a8] sm:$0xff] %v2044_v37 }
 0x236   :  { %2946 = vst [vmem:[#allocation11 + $0x5d0] sm:$0xff] %v1868_v7 }
 0x23a   :  { %v1956_v52 = vpop.f32.mrf.mxu2  ;;  %v2045_v11 = vpop.f32.mrf.mxu3 }
 0x23b   :  { %v2046_v44 = vadd.f32 %v2045_v11, %v1956_v52  ;;  %v2057_v30 = vpop.f32.mrf.mxu0  ;;  %v2146_v21 = vpop.f32.mrf.mxu1 }
 0x23c   :  { %v2147_v40 = vadd.f32 %v2146_v21, %v2057_v30 }
 0x23d   :  { %2947 = vst [vmem:[#allocation11 + $0x5d8] sm:$0xff] %v2046_v44 }
 0x23e   :  { %2762 = vst [vmem:[#allocation11 + $0x10] sm:$0xff] %v2147_v40  ;;  %2096 = vmatmul.bf16.gmra.mxu0 %v4359_v25  ;;  %2185 = vmatmul.bf16.gmra.mxu1 %v4361_v13 }
 0x23f   :  { %2274 = vmatmul.bf16.gmra.mxu2 %v4359_v25  ;;  %2363 = vmatmul.bf16.gmra.mxu3 %v4361_v13 }
 0x242   :  { %v2235_v51 = vpop.f32.mrf.mxu2  ;;  %v2324_v45 = vpop.f32.mrf.mxu3 }
 0x243   :  { %v2325_v46 = vadd.f32 %v2324_v45, %v2235_v51  ;;  %v2059_v9 = vpop.f32.mrf.mxu0  ;;  %v2148_v32 = vpop.f32.mrf.mxu1  ;;  %v3432_v51 = vld [vmem:[#allocation9 + $0x1c4] sm:$0xf]  ;;  %v3039_v45 = vor.u32 %v3384_v36, %v3036_v24 }
 0x244   :  { %v2149_v42 = vadd.f32 %v2148_v32, %v2059_v9 }
 0x245   :  { %2763 = vst [vmem:[#allocation11 + $0x18] sm:$0xff] %v2325_v46  ;;  %v3228_v46 = vld [vmem:[#allocation9 + $0x1d8] sm:$0xf0]  ;;  %2588 = vmatpush.bf16.msra.mxu2 %v3039_v45 }
 0x246   :  { %2768 = vst [vmem:[#allocation11 + $0x40] sm:$0xff] %v2149_v42  ;;  %v3231_v9 = vor.u32 %v3432_v51, %v3228_v46  ;;  %v3378_v46 = vld [vmem:[#allocation9 + $0x14] sm:$0xf] }
 0x248   :  { %2677 = vmatpush.bf16.msra.mxu3 %v3231_v9  ;;  %v3012_v9 = vld [vmem:[#allocation9 + $0x28] sm:$0xf0] }
 0x24a   :  { %v2237_v35 = vpop.f32.mrf.mxu2  ;;  %v2326_v47 = vpop.f32.mrf.mxu3 }
 0x24b   :  { %v2327_v50 = vadd.f32 %v2326_v47, %v2237_v35  ;;  %v2062_v4 = vpop.f32.mrf.mxu0  ;;  %v2151_v37 = vpop.f32.mrf.mxu1  ;;  %v3035_v35 = vor.u32 %v3387_v10, %v3034_v54  ;;  %v3226_v47 = vld [vmem:[#allocation9 + $0x1c0] sm:$0xf] }
 0x24c   :  { %v2152_v41 = vadd.f32 %v2151_v37, %v2062_v4 }
 0x24d   :  { %2769 = vst [vmem:[#allocation11 + $0x48] sm:$0xff] %v2327_v50  ;;  %v3435_v50 = vld [vmem:[#allocation9 + $0x1d4] sm:$0xf0]  ;;  %2410 = vmatpush.bf16.msra.mxu0 %v3035_v35 }
 0x24e   :  { %2774 = vst [vmem:[#allocation11 + $0x70] sm:$0xff] %v2152_v41  ;;  %2101 = vmatmul.bf16.gmra.mxu0 %v4401_v58  ;;  %2190 = vmatmul.bf16.gmra.mxu1 %v4403_v59  ;;  %v3227_v4 = vor.u32 %v3435_v50, %v3226_v47  ;;  %v3010_v50 = vld [vmem:[#allocation9 + $0x10] sm:$0xf] }
 0x24f   :  { %2279 = vmatmul.bf16.gmra.mxu2 %v4401_v58  ;;  %2368 = vmatmul.bf16.gmra.mxu3 %v4403_v59 }
 0x250   :  { %2499 = vmatpush.bf16.msra.mxu1 %v3227_v4  ;;  %v3381_v4 = vld [vmem:[#allocation9 + $0x24] sm:$0xf0] }
 0x252   :  { %v2240_v39 = vpop.f32.mrf.mxu2  ;;  %v2329_v7 = vpop.f32.mrf.mxu3 }
 0x253   :  { %v2330_v52 = vadd.f32 %v2329_v7, %v2240_v39  ;;  %v2064_v11 = vpop.f32.mrf.mxu0  ;;  %v2153_v44 = vpop.f32.mrf.mxu1 }
 0x254   :  { %v2154_v30 = vadd.f32 %v2153_v44, %v2064_v11 }
 0x255   :  { %2775 = vst [vmem:[#allocation11 + $0x78] sm:$0xff] %v2330_v52 }
 0x256   :  { %2780 = vst [vmem:[#allocation11 + $0xa0] sm:$0xff] %v2154_v30 }
 0x25a   :  { %v2242_v21 = vpop.f32.mrf.mxu2  ;;  %v2331_v40 = vpop.f32.mrf.mxu3 }
 0x25b   :  { %v2332_v60 = vadd.f32 %v2331_v40, %v2242_v21  ;;  %v2067_v53 = vpop.f32.mrf.mxu0  ;;  %v2156_v23 = vpop.f32.mrf.mxu1 }
 0x25c   :  { %v2157_v6 = vadd.f32 %v2156_v23, %v2067_v53 }
 0x25d   :  { %2781 = vst [vmem:[#allocation11 + $0xa8] sm:$0xff] %v2332_v60 }
 0x25e   :  { %2786 = vst [vmem:[#allocation11 + $0xd0] sm:$0xff] %v2157_v6  ;;  %2106 = vmatmul.bf16.gmra.mxu0 %v4435_v2  ;;  %2195 = vmatmul.bf16.gmra.mxu1 %v4437_v56 }
 0x25f   :  { %2284 = vmatmul.bf16.gmra.mxu2 %v4435_v2  ;;  %2373 = vmatmul.bf16.gmra.mxu3 %v4437_v56 }
 0x262   :  { %v2245_v32 = vpop.f32.mrf.mxu2  ;;  %v2334_v42 = vpop.f32.mrf.mxu3 }
 0x263   :  { %v2335_v19 = vadd.f32 %v2334_v42, %v2245_v32  ;;  %v2069_v38 = vpop.f32.mrf.mxu0  ;;  %v2158_v15 = vpop.f32.mrf.mxu1  ;;  %v3426_v32 = vld [vmem:[#allocation9 + $0x194] sm:$0xf]  ;;  %v3015_v42 = vor.u32 %v3378_v46, %v3012_v9 }
 0x264   :  { %v2159_v28 = vadd.f32 %v2158_v15, %v2069_v38 }
 0x265   :  { %2787 = vst [vmem:[#allocation11 + $0xd8] sm:$0xff] %v2335_v19  ;;  %v3204_v19 = vld [vmem:[#allocation9 + $0x1a8] sm:$0xf0]  ;;  %2589 = vmatpush.bf16.msra.mxu2 %v3015_v42 }
 0x266   :  { %2792 = vst [vmem:[#allocation11 + $0x100] sm:$0xff] %v2159_v28  ;;  %v3207_v38 = vor.u32 %v3426_v32, %v3204_v19 }
 0x268   :  { %2678 = vmatpush.bf16.msra.mxu3 %v3207_v38 }
 0x26a   :  { %v2247_v37 = vpop.f32.mrf.mxu2  ;;  %v2336_v41 = vpop.f32.mrf.mxu3 }
 0x26b   :  { %v2337_v39 = vadd.f32 %v2336_v41, %v2247_v37  ;;  %v2072_v7 = vpop.f32.mrf.mxu0  ;;  %v2161_v52 = vpop.f32.mrf.mxu1  ;;  %v3011_v37 = vor.u32 %v3381_v4, %v3010_v50  ;;  %v3202_v41 = vld [vmem:[#allocation9 + $0x190] sm:$0xf] }
 0x26c   :  { %v2162_v11 = vadd.f32 %v2161_v52, %v2072_v7 }
 0x26d   :  { %2793 = vst [vmem:[#allocation11 + $0x108] sm:$0xff] %v2337_v39  ;;  %v3429_v39 = vld [vmem:[#allocation9 + $0x1a4] sm:$0xf0]  ;;  %2411 = vmatpush.bf16.msra.mxu0 %v3011_v37 }
 0x26e   :  { %2798 = vst [vmem:[#allocation11 + $0x130] sm:$0xff] %v2162_v11  ;;  %2111 = vmatmul.bf16.gmra.mxu0 %v4479_v61  ;;  %2200 = vmatmul.bf16.gmra.mxu1 %v4481_v57  ;;  %v3203_v7 = vor.u32 %v3429_v39, %v3202_v41 }
 0x26f   :  { %2289 = vmatmul.bf16.gmra.mxu2 %v4479_v61  ;;  %2378 = vmatmul.bf16.gmra.mxu3 %v4481_v57 }
 0x270   :  { %2500 = vmatpush.bf16.msra.mxu1 %v3203_v7 }
 0x272   :  { %v2250_v44 = vpop.f32.mrf.mxu2  ;;  %v2339_v30 = vpop.f32.mrf.mxu3 }
 0x273   :  { %v2340_v21 = vadd.f32 %v2339_v30, %v2250_v44  ;;  %v2074_v40 = vpop.f32.mrf.mxu0  ;;  %v2163_v60 = vpop.f32.mrf.mxu1 }
 0x274   :  { %v2164_v53 = vadd.f32 %v2163_v60, %v2074_v40 }
 0x275   :  { %2799 = vst [vmem:[#allocation11 + $0x138] sm:$0xff] %v2340_v21 }
 0x276   :  { %2804 = vst [vmem:[#allocation11 + $0x160] sm:$0xff] %v2164_v53 }
 0x27a   :  { %v2252_v23 = vpop.f32.mrf.mxu2  ;;  %v2341_v6 = vpop.f32.mrf.mxu3 }
 0x27b   :  { %v2342_v36 = vadd.f32 %v2341_v6, %v2252_v23  ;;  %v2077_v24 = vpop.f32.mrf.mxu0  ;;  %v2166_v51 = vpop.f32.mrf.mxu1 }
 0x27c   :  { %v2167_v45 = vadd.f32 %v2166_v51, %v2077_v24 }
 0x27d   :  { %2805 = vst [vmem:[#allocation11 + $0x168] sm:$0xff] %v2342_v36 }
 0x27e   :  { %2810 = vst [vmem:[#allocation11 + $0x190] sm:$0xff] %v2167_v45  ;;  %2116 = vmatmul.bf16.gmra.mxu0 %v4511_v14  ;;  %2205 = vmatmul.bf16.gmra.mxu1 %v4513_v16 }
 0x27f   :  { %2294 = vmatmul.bf16.gmra.mxu2 %v4511_v14  ;;  %2383 = vmatmul.bf16.gmra.mxu3 %v4513_v16 }
 0x282   :  { %v2255_v15 = vpop.f32.mrf.mxu2  ;;  %v2344_v28 = vpop.f32.mrf.mxu3 }
 0x283   :  { %v2345_v54 = vadd.f32 %v2344_v28, %v2255_v15  ;;  %v2079_v10 = vpop.f32.mrf.mxu0  ;;  %v2168_v35 = vpop.f32.mrf.mxu1 }
 0x284   :  { %v2169_v47 = vadd.f32 %v2168_v35, %v2079_v10 }
 0x285   :  { %2811 = vst [vmem:[#allocation11 + $0x198] sm:$0xff] %v2345_v54 }
 0x286   :  { %2816 = vst [vmem:[#allocation11 + $0x1c0] sm:$0xff] %v2169_v47 }
 0x28a   :  { %v2257_v52 = vpop.f32.mrf.mxu2  ;;  %v2346_v11 = vpop.f32.mrf.mxu3 }
 0x28b   :  { %v2347_v44 = vadd.f32 %v2346_v11, %v2257_v52  ;;  %v2082_v30 = vpop.f32.mrf.mxu0  ;;  %v2171_v21 = vpop.f32.mrf.mxu1 }
 0x28c   :  { %v2172_v40 = vadd.f32 %v2171_v21, %v2082_v30 }
 0x28d   :  { %2817 = vst [vmem:[#allocation11 + $0x1c8] sm:$0xff] %v2347_v44 }
 0x28e   :  { %2822 = vst [vmem:[#allocation11 + $0x1f0] sm:$0xff] %v2172_v40  ;;  %2121 = vmatmul.bf16.gmra.mxu0 %v4553_v8  ;;  %2210 = vmatmul.bf16.gmra.mxu1 %v4555_v3 }
 0x28f   :  { %2299 = vmatmul.bf16.gmra.mxu2 %v4553_v8  ;;  %2388 = vmatmul.bf16.gmra.mxu3 %v4555_v3 }
 0x292   :  { %v2260_v60 = vpop.f32.mrf.mxu2  ;;  %v2349_v53 = vpop.f32.mrf.mxu3 }
 0x293   :  { %v2350_v23 = vadd.f32 %v2349_v53, %v2260_v60  ;;  %v2084_v6 = vpop.f32.mrf.mxu0  ;;  %v2173_v36 = vpop.f32.mrf.mxu1 }
 0x294   :  { %v2174_v24 = vadd.f32 %v2173_v36, %v2084_v6 }
 0x295   :  { %2823 = vst [vmem:[#allocation11 + $0x1f8] sm:$0xff] %v2350_v23 }
 0x296   :  { %2828 = vst [vmem:[#allocation11 + $0x220] sm:$0xff] %v2174_v24 }
 0x29a   :  { %v2262_v51 = vpop.f32.mrf.mxu2  ;;  %v2351_v45 = vpop.f32.mrf.mxu3 }
 0x29b   :  { %v2352_v46 = vadd.f32 %v2351_v45, %v2262_v51  ;;  %v2087_v9 = vpop.f32.mrf.mxu0  ;;  %v2176_v32 = vpop.f32.mrf.mxu1 }
 0x29c   :  { %v2177_v42 = vadd.f32 %v2176_v32, %v2087_v9 }
 0x29d   :  { %2829 = vst [vmem:[#allocation11 + $0x228] sm:$0xff] %v2352_v46 }
 0x29e   :  { %2834 = vst [vmem:[#allocation11 + $0x250] sm:$0xff] %v2177_v42  ;;  %2126 = vmatmul.bf16.gmra.mxu0 %v4579_v27  ;;  %2215 = vmatmul.bf16.gmra.mxu1 %v4581_v26 }
 0x29f   :  { %2304 = vmatmul.bf16.gmra.mxu2 %v4579_v27  ;;  %2393 = vmatmul.bf16.gmra.mxu3 %v4581_v26 }
 0x2a2   :  { %v2265_v19 = vpop.f32.mrf.mxu2  ;;  %v2354_v38 = vpop.f32.mrf.mxu3 }
 0x2a3   :  { %v2355_v15 = vadd.f32 %v2354_v38, %v2265_v19  ;;  %v2089_v28 = vpop.f32.mrf.mxu0  ;;  %v2178_v54 = vpop.f32.mrf.mxu1 }
 0x2a4   :  { %v2179_v10 = vadd.f32 %v2178_v54, %v2089_v28 }
 0x2a5   :  { %2835 = vst [vmem:[#allocation11 + $0x258] sm:$0xff] %v2355_v15 }
 0x2a6   :  { %2840 = vst [vmem:[#allocation11 + $0x280] sm:$0xff] %v2179_v10 }
 0x2aa   :  { %v2267_v35 = vpop.f32.mrf.mxu2  ;;  %v2356_v47 = vpop.f32.mrf.mxu3 }
 0x2ab   :  { %v2357_v50 = vadd.f32 %v2356_v47, %v2267_v35  ;;  %v2092_v4 = vpop.f32.mrf.mxu0  ;;  %v2181_v37 = vpop.f32.mrf.mxu1 }
 0x2ac   :  { %v2182_v41 = vadd.f32 %v2181_v37, %v2092_v4 }
 0x2ad   :  { %2841 = vst [vmem:[#allocation11 + $0x288] sm:$0xff] %v2357_v50 }
 0x2ae   :  { %2846 = vst [vmem:[#allocation11 + $0x2b0] sm:$0xff] %v2182_v41  ;;  %2131 = vmatmul.bf16.gmra.mxu0 %v4597_v20  ;;  %2220 = vmatmul.bf16.gmra.mxu1 %v4599_v34 }
 0x2af   :  { %2309 = vmatmul.bf16.gmra.mxu2 %v4597_v20  ;;  %2398 = vmatmul.bf16.gmra.mxu3 %v4599_v34 }
 0x2b2   :  { %v2270_v39 = vpop.f32.mrf.mxu2  ;;  %v2359_v7 = vpop.f32.mrf.mxu3 }
 0x2b3   :  { %v2360_v52 = vadd.f32 %v2359_v7, %v2270_v39  ;;  %v2094_v11 = vpop.f32.mrf.mxu0  ;;  %v2183_v44 = vpop.f32.mrf.mxu1 }
 0x2b4   :  { %v2184_v30 = vadd.f32 %v2183_v44, %v2094_v11 }
 0x2b5   :  { %2847 = vst [vmem:[#allocation11 + $0x2b8] sm:$0xff] %v2360_v52 }
 0x2b6   :  { %2852 = vst [vmem:[#allocation11 + $0x2e0] sm:$0xff] %v2184_v30 }
 0x2ba   :  { %v2272_v21 = vpop.f32.mrf.mxu2  ;;  %v2361_v40 = vpop.f32.mrf.mxu3 }
 0x2bb   :  { %v2362_v60 = vadd.f32 %v2361_v40, %v2272_v21  ;;  %v2097_v53 = vpop.f32.mrf.mxu0  ;;  %v2186_v23 = vpop.f32.mrf.mxu1 }
 0x2bc   :  { %v2187_v6 = vadd.f32 %v2186_v23, %v2097_v53 }
 0x2bd   :  { %2853 = vst [vmem:[#allocation11 + $0x2e8] sm:$0xff] %v2362_v60 }
 0x2be   :  { %2858 = vst [vmem:[#allocation11 + $0x310] sm:$0xff] %v2187_v6  ;;  %2412 = vmatmul.bf16.vlgmr.msra.gmra.mxu0 %v3989_v0  ;;  %2501 = vmatmul.bf16.vlgmr.msra.gmra.mxu1 %v3991_v1 }
 0x2bf   :  { %2590 = vmatmul.bf16.vlgmr.msra.gmra.mxu2 %v3989_v0  ;;  %2679 = vmatmul.bf16.vlgmr.msra.gmra.mxu3 %v3991_v1 }
 0x2c2   :  { %v2275_v36 = vpop.f32.mrf.mxu2  ;;  %v2364_v24 = vpop.f32.mrf.mxu3 }
 0x2c3   :  { %v2365_v51 = vadd.f32 %v2364_v24, %v2275_v36  ;;  %v2099_v45 = vpop.f32.mrf.mxu0  ;;  %v2188_v46 = vpop.f32.mrf.mxu1 }
 0x2c4   :  { %v2189_v9 = vadd.f32 %v2188_v46, %v2099_v45 }
 0x2c5   :  { %2859 = vst [vmem:[#allocation11 + $0x318] sm:$0xff] %v2365_v51 }
 0x2c6   :  { %2864 = vst [vmem:[#allocation11 + $0x340] sm:$0xff] %v2189_v9 }
 0x2ca   :  { %v2277_v32 = vpop.f32.mrf.mxu2  ;;  %v2366_v42 = vpop.f32.mrf.mxu3 }
 0x2cb   :  { %v2367_v19 = vadd.f32 %v2366_v42, %v2277_v32  ;;  %v2102_v38 = vpop.f32.mrf.mxu0  ;;  %v2191_v15 = vpop.f32.mrf.mxu1 }
 0x2cc   :  { %v2192_v28 = vadd.f32 %v2191_v15, %v2102_v38 }
 0x2cd   :  { %2865 = vst [vmem:[#allocation11 + $0x348] sm:$0xff] %v2367_v19 }
 0x2ce   :  { %2870 = vst [vmem:[#allocation11 + $0x370] sm:$0xff] %v2192_v28  ;;  %2417 = vmatmul.bf16.gmra.mxu0 %v4052_v12  ;;  %2506 = vmatmul.bf16.gmra.mxu1 %v4057_v17 }
 0x2cf   :  { %2595 = vmatmul.bf16.gmra.mxu2 %v4052_v12  ;;  %2684 = vmatmul.bf16.gmra.mxu3 %v4057_v17 }
 0x2d2   :  { %v2280_v0 = vpop.f32.mrf.mxu2  ;;  %v2369_v1 = vpop.f32.mrf.mxu3 }
 0x2d3   :  { %v2370_v54 = vadd.f32 %v2369_v1, %v2280_v0  ;;  %v2104_v10 = vpop.f32.mrf.mxu0  ;;  %v2193_v35 = vpop.f32.mrf.mxu1 }
 0x2d4   :  { %v2194_v47 = vadd.f32 %v2193_v35, %v2104_v10 }
 0x2d5   :  { %2871 = vst [vmem:[#allocation11 + $0x378] sm:$0xff] %v2370_v54 }
 0x2d6   :  { %2876 = vst [vmem:[#allocation11 + $0x3a0] sm:$0xff] %v2194_v47 }
 0x2da   :  { %v2282_v50 = vpop.f32.mrf.mxu2  ;;  %v2371_v4 = vpop.f32.mrf.mxu3 }
 0x2db   :  { %v2372_v37 = vadd.f32 %v2371_v4, %v2282_v50  ;;  %v2107_v41 = vpop.f32.mrf.mxu0  ;;  %v2196_v39 = vpop.f32.mrf.mxu1 }
 0x2dc   :  { %v2197_v7 = vadd.f32 %v2196_v39, %v2107_v41 }
 0x2dd   :  { %2877 = vst [vmem:[#allocation11 + $0x3a8] sm:$0xff] %v2372_v37 }
 0x2de   :  { %2882 = vst [vmem:[#allocation11 + $0x3d0] sm:$0xff] %v2197_v7  ;;  %2422 = vmatmul.bf16.gmra.mxu0 %v4108_v29  ;;  %2511 = vmatmul.bf16.gmra.mxu1 %v4110_v31 }
 0x2df   :  { %2600 = vmatmul.bf16.gmra.mxu2 %v4108_v29  ;;  %2689 = vmatmul.bf16.gmra.mxu3 %v4110_v31 }
 0x2e2   :  { %v2285_v12 = vpop.f32.mrf.mxu2  ;;  %v2374_v17 = vpop.f32.mrf.mxu3 }
 0x2e3   :  { %v2375_v52 = vadd.f32 %v2374_v17, %v2285_v12  ;;  %v2109_v11 = vpop.f32.mrf.mxu0  ;;  %v2198_v44 = vpop.f32.mrf.mxu1 }
 0x2e4   :  { %v2199_v30 = vadd.f32 %v2198_v44, %v2109_v11 }
 0x2e5   :  { %2883 = vst [vmem:[#allocation11 + $0x3d8] sm:$0xff] %v2375_v52 }
 0x2e6   :  { %2888 = vst [vmem:[#allocation11 + $0x400] sm:$0xff] %v2199_v30 }
 0x2ea   :  { %v2287_v21 = vpop.f32.mrf.mxu2  ;;  %v2376_v40 = vpop.f32.mrf.mxu3 }
 0x2eb   :  { %v2377_v60 = vadd.f32 %v2376_v40, %v2287_v21  ;;  %v2112_v53 = vpop.f32.mrf.mxu0  ;;  %v2201_v23 = vpop.f32.mrf.mxu1 }
 0x2ec   :  { %v2202_v6 = vadd.f32 %v2201_v23, %v2112_v53 }
 0x2ed   :  { %2889 = vst [vmem:[#allocation11 + $0x408] sm:$0xff] %v2377_v60 }
 0x2ee   :  { %2894 = vst [vmem:[#allocation11 + $0x430] sm:$0xff] %v2202_v6  ;;  %2427 = vmatmul.bf16.gmra.mxu0 %v4161_v48  ;;  %2516 = vmatmul.bf16.gmra.mxu1 %v4163_v49 }
 0x2ef   :  { %2605 = vmatmul.bf16.gmra.mxu2 %v4161_v48  ;;  %2694 = vmatmul.bf16.gmra.mxu3 %v4163_v49 }
 0x2f2   :  { %v2290_v29 = vpop.f32.mrf.mxu2  ;;  %v2379_v31 = vpop.f32.mrf.mxu3 }
 0x2f3   :  { %v2380_v36 = vadd.f32 %v2379_v31, %v2290_v29  ;;  %v2114_v24 = vpop.f32.mrf.mxu0  ;;  %v2203_v51 = vpop.f32.mrf.mxu1 }
 0x2f4   :  { %v2204_v45 = vadd.f32 %v2203_v51, %v2114_v24 }
 0x2f5   :  { %2895 = vst [vmem:[#allocation11 + $0x438] sm:$0xff] %v2380_v36 }
 0x2f6   :  { %2900 = vst [vmem:[#allocation11 + $0x460] sm:$0xff] %v2204_v45 }
 0x2fa   :  { %v2292_v46 = vpop.f32.mrf.mxu2  ;;  %v2381_v9 = vpop.f32.mrf.mxu3 }
 0x2fb   :  { %v2382_v32 = vadd.f32 %v2381_v9, %v2292_v46  ;;  %v2117_v42 = vpop.f32.mrf.mxu0  ;;  %v2206_v19 = vpop.f32.mrf.mxu1 }
 0x2fc   :  { %v2207_v38 = vadd.f32 %v2206_v19, %v2117_v42 }
 0x2fd   :  { %2901 = vst [vmem:[#allocation11 + $0x468] sm:$0xff] %v2382_v32 }
 0x2fe   :  { %2906 = vst [vmem:[#allocation11 + $0x490] sm:$0xff] %v2207_v38  ;;  %2432 = vmatmul.bf16.gmra.mxu0 %v4207_v22  ;;  %2521 = vmatmul.bf16.gmra.mxu1 %v4209_v5 }
 0x2ff   :  { %2610 = vmatmul.bf16.gmra.mxu2 %v4207_v22  ;;  %2699 = vmatmul.bf16.gmra.mxu3 %v4209_v5 }
 0x302   :  { %v2295_v48 = vpop.f32.mrf.mxu2  ;;  %v2384_v49 = vpop.f32.mrf.mxu3 }
 0x303   :  { %v2385_v15 = vadd.f32 %v2384_v49, %v2295_v48  ;;  %v2119_v28 = vpop.f32.mrf.mxu0  ;;  %v2208_v0 = vpop.f32.mrf.mxu1 }
 0x304   :  { %v2209_v1 = vadd.f32 %v2208_v0, %v2119_v28 }
 0x305   :  { %2907 = vst [vmem:[#allocation11 + $0x498] sm:$0xff] %v2385_v15 }
 0x306   :  { %2912 = vst [vmem:[#allocation11 + $0x4c0] sm:$0xff] %v2209_v1 }
 0x30a   :  { %v2297_v54 = vpop.f32.mrf.mxu2  ;;  %v2386_v10 = vpop.f32.mrf.mxu3 }
 0x30b   :  { %v2387_v35 = vadd.f32 %v2386_v10, %v2297_v54  ;;  %v2122_v47 = vpop.f32.mrf.mxu0  ;;  %v2211_v50 = vpop.f32.mrf.mxu1 }
 0x30c   :  { %v2212_v4 = vadd.f32 %v2211_v50, %v2122_v47 }
 0x30d   :  { %2913 = vst [vmem:[#allocation11 + $0x4c8] sm:$0xff] %v2387_v35 }
 0x30e   :  { %2918 = vst [vmem:[#allocation11 + $0x4f0] sm:$0xff] %v2212_v4  ;;  %2437 = vmatmul.bf16.gmra.mxu0 %v4249_v33  ;;  %2526 = vmatmul.bf16.gmra.mxu1 %v4251_v55 }
 0x30f   :  { %2615 = vmatmul.bf16.gmra.mxu2 %v4249_v33  ;;  %2704 = vmatmul.bf16.gmra.mxu3 %v4251_v55 }
 0x312   :  { %v2300_v22 = vpop.f32.mrf.mxu2  ;;  %v2389_v5 = vpop.f32.mrf.mxu3 }
 0x313   :  { %v2390_v37 = vadd.f32 %v2389_v5, %v2300_v22  ;;  %v2124_v41 = vpop.f32.mrf.mxu0  ;;  %v2213_v39 = vpop.f32.mrf.mxu1 }
 0x314   :  { %v2214_v7 = vadd.f32 %v2213_v39, %v2124_v41 }
 0x315   :  { %2919 = vst [vmem:[#allocation11 + $0x4f8] sm:$0xff] %v2390_v37 }
 0x316   :  { %2924 = vst [vmem:[#allocation11 + $0x520] sm:$0xff] %v2214_v7 }
 0x31a   :  { %v2302_v12 = vpop.f32.mrf.mxu2  ;;  %v2391_v17 = vpop.f32.mrf.mxu3 }
 0x31b   :  { %v2392_v52 = vadd.f32 %v2391_v17, %v2302_v12  ;;  %v2127_v11 = vpop.f32.mrf.mxu0  ;;  %v2216_v44 = vpop.f32.mrf.mxu1 }
 0x31c   :  { %v2217_v30 = vadd.f32 %v2216_v44, %v2127_v11 }
 0x31d   :  { %2925 = vst [vmem:[#allocation11 + $0x528] sm:$0xff] %v2392_v52 }
 0x31e   :  { %2930 = vst [vmem:[#allocation11 + $0x550] sm:$0xff] %v2217_v30  ;;  %2442 = vmatmul.bf16.gmra.mxu0 %v4283_v18  ;;  %2531 = vmatmul.bf16.gmra.mxu1 %v4285_v43 }
 0x31f   :  { %2620 = vmatmul.bf16.gmra.mxu2 %v4283_v18  ;;  %2709 = vmatmul.bf16.gmra.mxu3 %v4285_v43 }
 0x322   :  { %v2305_v33 = vpop.f32.mrf.mxu2  ;;  %v2394_v55 = vpop.f32.mrf.mxu3 }
 0x323   :  { %v2395_v21 = vadd.f32 %v2394_v55, %v2305_v33  ;;  %v2129_v40 = vpop.f32.mrf.mxu0  ;;  %v2218_v60 = vpop.f32.mrf.mxu1 }
 0x324   :  { %v2219_v53 = vadd.f32 %v2218_v60, %v2129_v40 }
 0x325   :  { %2931 = vst [vmem:[#allocation11 + $0x558] sm:$0xff] %v2395_v21 }
 0x326   :  { %2936 = vst [vmem:[#allocation11 + $0x580] sm:$0xff] %v2219_v53 }
 0x32a   :  { %v2307_v23 = vpop.f32.mrf.mxu2  ;;  %v2396_v6 = vpop.f32.mrf.mxu3 }
 0x32b   :  { %v2397_v29 = vadd.f32 %v2396_v6, %v2307_v23  ;;  %v2132_v31 = vpop.f32.mrf.mxu0  ;;  %v2221_v36 = vpop.f32.mrf.mxu1 }
 0x32c   :  { %v2222_v24 = vadd.f32 %v2221_v36, %v2132_v31 }
 0x32d   :  { %2937 = vst [vmem:[#allocation11 + $0x588] sm:$0xff] %v2397_v29 }
 0x32e   :  { %2942 = vst [vmem:[#allocation11 + $0x5b0] sm:$0xff] %v2222_v24  ;;  %2447 = vmatmul.bf16.gmra.mxu0 %v4327_v62  ;;  %2536 = vmatmul.bf16.gmra.mxu1 %v4329_v63 }
 0x32f   :  { %2625 = vmatmul.bf16.gmra.mxu2 %v4327_v62  ;;  %2714 = vmatmul.bf16.gmra.mxu3 %v4329_v63 }
 0x332   :  { %v2310_v18 = vpop.f32.mrf.mxu2  ;;  %v2399_v43 = vpop.f32.mrf.mxu3 }
 0x333   :  { %v2400_v51 = vadd.f32 %v2399_v43, %v2310_v18  ;;  %v2134_v45 = vpop.f32.mrf.mxu0  ;;  %v2223_v46 = vpop.f32.mrf.mxu1 }
 0x334   :  { %v2224_v9 = vadd.f32 %v2223_v46, %v2134_v45 }
 0x335   :  { %2943 = vst [vmem:[#allocation11 + $0x5b8] sm:$0xff] %v2400_v51 }
 0x336   :  { %2948 = vst [vmem:[#allocation11 + $0x5e0] sm:$0xff] %v2224_v9 }
 0x33a   :  { %v2312_v32 = vpop.f32.mrf.mxu2  ;;  %v2401_v42 = vpop.f32.mrf.mxu3 }
 0x33b   :  { %v2402_v19 = vadd.f32 %v2401_v42, %v2312_v32  ;;  %v2413_v38 = vpop.f32.mrf.mxu0  ;;  %v2502_v48 = vpop.f32.mrf.mxu1 }
 0x33c   :  { %v2503_v49 = vadd.f32 %v2502_v48, %v2413_v38 }
 0x33d   :  { %2949 = vst [vmem:[#allocation11 + $0x5e8] sm:$0xff] %v2402_v19 }
 0x33e   :  { %2764 = vst [vmem:[#allocation11 + $0x20] sm:$0xff] %v2503_v49  ;;  %2452 = vmatmul.bf16.gmra.mxu0 %v4359_v25  ;;  %2541 = vmatmul.bf16.gmra.mxu1 %v4361_v13 }
 0x33f   :  { %2630 = vmatmul.bf16.gmra.mxu2 %v4359_v25  ;;  %2719 = vmatmul.bf16.gmra.mxu3 %v4361_v13 }
 0x342   :  { %v2591_v62 = vpop.f32.mrf.mxu2  ;;  %v2680_v63 = vpop.f32.mrf.mxu3 }
 0x343   :  { %v2681_v15 = vadd.f32 %v2680_v63, %v2591_v62  ;;  %v2415_v28 = vpop.f32.mrf.mxu0  ;;  %v2504_v0 = vpop.f32.mrf.mxu1 }
 0x344   :  { %v2505_v1 = vadd.f32 %v2504_v0, %v2415_v28 }
 0x345   :  { %2765 = vst [vmem:[#allocation11 + $0x28] sm:$0xff] %v2681_v15 }
 0x346   :  { %2770 = vst [vmem:[#allocation11 + $0x50] sm:$0xff] %v2505_v1 }
 0x34a   :  { %v2593_v54 = vpop.f32.mrf.mxu2  ;;  %v2682_v10 = vpop.f32.mrf.mxu3 }
 0x34b   :  { %v2683_v35 = vadd.f32 %v2682_v10, %v2593_v54  ;;  %v2418_v47 = vpop.f32.mrf.mxu0  ;;  %v2507_v50 = vpop.f32.mrf.mxu1 }
 0x34c   :  { %v2508_v4 = vadd.f32 %v2507_v50, %v2418_v47 }
 0x34d   :  { %2771 = vst [vmem:[#allocation11 + $0x58] sm:$0xff] %v2683_v35 }
 0x34e   :  { %2776 = vst [vmem:[#allocation11 + $0x80] sm:$0xff] %v2508_v4  ;;  %2457 = vmatmul.bf16.gmra.mxu0 %v4401_v58  ;;  %2546 = vmatmul.bf16.gmra.mxu1 %v4403_v59 }
 0x34f   :  { %2635 = vmatmul.bf16.gmra.mxu2 %v4401_v58  ;;  %2724 = vmatmul.bf16.gmra.mxu3 %v4403_v59 }
 0x352   :  { %v2596_v25 = vpop.f32.mrf.mxu2  ;;  %v2685_v13 = vpop.f32.mrf.mxu3 }
 0x353   :  { %v2686_v22 = vadd.f32 %v2685_v13, %v2596_v25  ;;  %v2420_v5 = vpop.f32.mrf.mxu0  ;;  %v2509_v37 = vpop.f32.mrf.mxu1 }
 0x354   :  { %v2510_v41 = vadd.f32 %v2509_v37, %v2420_v5 }
 0x355   :  { %2777 = vst [vmem:[#allocation11 + $0x88] sm:$0xff] %v2686_v22 }
 0x356   :  { %2782 = vst [vmem:[#allocation11 + $0xb0] sm:$0xff] %v2510_v41 }
 0x35a   :  { %v2598_v39 = vpop.f32.mrf.mxu2  ;;  %v2687_v7 = vpop.f32.mrf.mxu3 }
 0x35b   :  { %v2688_v12 = vadd.f32 %v2687_v7, %v2598_v39  ;;  %v2423_v17 = vpop.f32.mrf.mxu0  ;;  %v2512_v52 = vpop.f32.mrf.mxu1 }
 0x35c   :  { %v2513_v11 = vadd.f32 %v2512_v52, %v2423_v17 }
 0x35d   :  { %2783 = vst [vmem:[#allocation11 + $0xb8] sm:$0xff] %v2688_v12 }
 0x35e   :  { %2788 = vst [vmem:[#allocation11 + $0xe0] sm:$0xff] %v2513_v11  ;;  %2462 = vmatmul.bf16.gmra.mxu0 %v4435_v2  ;;  %2551 = vmatmul.bf16.gmra.mxu1 %v4437_v56 }
 0x35f   :  { %2640 = vmatmul.bf16.gmra.mxu2 %v4435_v2  ;;  %2729 = vmatmul.bf16.gmra.mxu3 %v4437_v56 }
 0x362   :  { %v2601_v58 = vpop.f32.mrf.mxu2  ;;  %v2690_v59 = vpop.f32.mrf.mxu3 }
 0x363   :  { %v2691_v44 = vadd.f32 %v2690_v59, %v2601_v58  ;;  %v2425_v30 = vpop.f32.mrf.mxu0  ;;  %v2514_v33 = vpop.f32.mrf.mxu1 }
 0x364   :  { %v2515_v55 = vadd.f32 %v2514_v33, %v2425_v30 }
 0x365   :  { %2789 = vst [vmem:[#allocation11 + $0xe8] sm:$0xff] %v2691_v44 }
 0x366   :  { %2794 = vst [vmem:[#allocation11 + $0x110] sm:$0xff] %v2515_v55 }
 0x36a   :  { %v2603_v21 = vpop.f32.mrf.mxu2  ;;  %v2692_v40 = vpop.f32.mrf.mxu3 }
 0x36b   :  { %v2693_v60 = vadd.f32 %v2692_v40, %v2603_v21  ;;  %v2428_v53 = vpop.f32.mrf.mxu0  ;;  %v2517_v23 = vpop.f32.mrf.mxu1 }
 0x36c   :  { %v2518_v6 = vadd.f32 %v2517_v23, %v2428_v53 }
 0x36d   :  { %2795 = vst [vmem:[#allocation11 + $0x118] sm:$0xff] %v2693_v60 }
 0x36e   :  { %2800 = vst [vmem:[#allocation11 + $0x140] sm:$0xff] %v2518_v6  ;;  %2467 = vmatmul.bf16.gmra.mxu0 %v4479_v61  ;;  %2556 = vmatmul.bf16.gmra.mxu1 %v4481_v57 }
 0x36f   :  { %2645 = vmatmul.bf16.gmra.mxu2 %v4479_v61  ;;  %2734 = vmatmul.bf16.gmra.mxu3 %v4481_v57 }
 0x372   :  { %v2606_v2 = vpop.f32.mrf.mxu2  ;;  %v2695_v56 = vpop.f32.mrf.mxu3 }
 0x373   :  { %v2696_v29 = vadd.f32 %v2695_v56, %v2606_v2  ;;  %v2430_v31 = vpop.f32.mrf.mxu0  ;;  %v2519_v36 = vpop.f32.mrf.mxu1 }
 0x374   :  { %v2520_v24 = vadd.f32 %v2519_v36, %v2430_v31 }
 0x375   :  { %2801 = vst [vmem:[#allocation11 + $0x148] sm:$0xff] %v2696_v29 }
 0x376   :  { %2806 = vst [vmem:[#allocation11 + $0x170] sm:$0xff] %v2520_v24 }
 0x37a   :  { %v2608_v18 = vpop.f32.mrf.mxu2  ;;  %v2697_v43 = vpop.f32.mrf.mxu3 }
 0x37b   :  { %v2698_v51 = vadd.f32 %v2697_v43, %v2608_v18  ;;  %v2433_v45 = vpop.f32.mrf.mxu0  ;;  %v2522_v46 = vpop.f32.mrf.mxu1 }
 0x37c   :  { %v2523_v9 = vadd.f32 %v2522_v46, %v2433_v45 }
 0x37d   :  { %2807 = vst [vmem:[#allocation11 + $0x178] sm:$0xff] %v2698_v51 }
 0x37e   :  { %2812 = vst [vmem:[#allocation11 + $0x1a0] sm:$0xff] %v2523_v9  ;;  %2472 = vmatmul.bf16.gmra.mxu0 %v4511_v14  ;;  %2561 = vmatmul.bf16.gmra.mxu1 %v4513_v16 }
 0x37f   :  { %2650 = vmatmul.bf16.gmra.mxu2 %v4511_v14  ;;  %2739 = vmatmul.bf16.gmra.mxu3 %v4513_v16 }
 0x382   :  { %v2611_v61 = vpop.f32.mrf.mxu2  ;;  %v2700_v57 = vpop.f32.mrf.mxu3 }
 0x383   :  { %v2701_v32 = vadd.f32 %v2700_v57, %v2611_v61  ;;  %v2435_v42 = vpop.f32.mrf.mxu0  ;;  %v2524_v19 = vpop.f32.mrf.mxu1 }
 0x384   :  { %v2525_v38 = vadd.f32 %v2524_v19, %v2435_v42 }
 0x385   :  { %2813 = vst [vmem:[#allocation11 + $0x1a8] sm:$0xff] %v2701_v32 }
 0x386   :  { %2818 = vst [vmem:[#allocation11 + $0x1d0] sm:$0xff] %v2525_v38 }
 0x38a   :  { %v2613_v48 = vpop.f32.mrf.mxu2  ;;  %v2702_v49 = vpop.f32.mrf.mxu3 }
 0x38b   :  { %v2703_v62 = vadd.f32 %v2702_v49, %v2613_v48  ;;  %v2438_v63 = vpop.f32.mrf.mxu0  ;;  %v2527_v15 = vpop.f32.mrf.mxu1 }
 0x38c   :  { %v2528_v28 = vadd.f32 %v2527_v15, %v2438_v63 }
 0x38d   :  { %2819 = vst [vmem:[#allocation11 + $0x1d8] sm:$0xff] %v2703_v62 }
 0x38e   :  { %2824 = vst [vmem:[#allocation11 + $0x200] sm:$0xff] %v2528_v28  ;;  %2477 = vmatmul.bf16.gmra.mxu0 %v4553_v8  ;;  %2566 = vmatmul.bf16.gmra.mxu1 %v4555_v3 }
 0x38f   :  { %2655 = vmatmul.bf16.gmra.mxu2 %v4553_v8  ;;  %2744 = vmatmul.bf16.gmra.mxu3 %v4555_v3 }
 0x392   :  { %v2616_v14 = vpop.f32.mrf.mxu2  ;;  %v2705_v16 = vpop.f32.mrf.mxu3 }
 0x393   :  { %v2706_v0 = vadd.f32 %v2705_v16, %v2616_v14  ;;  %v2440_v1 = vpop.f32.mrf.mxu0  ;;  %v2529_v54 = vpop.f32.mrf.mxu1 }
 0x394   :  { %v2530_v10 = vadd.f32 %v2529_v54, %v2440_v1 }
 0x395   :  { %2825 = vst [vmem:[#allocation11 + $0x208] sm:$0xff] %v2706_v0 }
 0x396   :  { %2830 = vst [vmem:[#allocation11 + $0x230] sm:$0xff] %v2530_v10 }
 0x39a   :  { %v2618_v35 = vpop.f32.mrf.mxu2  ;;  %v2707_v47 = vpop.f32.mrf.mxu3 }
 0x39b   :  { %v2708_v50 = vadd.f32 %v2707_v47, %v2618_v35  ;;  %v2443_v4 = vpop.f32.mrf.mxu0  ;;  %v2532_v25 = vpop.f32.mrf.mxu1 }
 0x39c   :  { %v2533_v13 = vadd.f32 %v2532_v25, %v2443_v4 }
 0x39d   :  { %2831 = vst [vmem:[#allocation11 + $0x238] sm:$0xff] %v2708_v50 }
 0x39e   :  { %2836 = vst [vmem:[#allocation11 + $0x260] sm:$0xff] %v2533_v13  ;;  %2482 = vmatmul.bf16.gmra.mxu0 %v4579_v27  ;;  %2571 = vmatmul.bf16.gmra.mxu1 %v4581_v26 }
 0x39f   :  { %2660 = vmatmul.bf16.gmra.mxu2 %v4579_v27  ;;  %2749 = vmatmul.bf16.gmra.mxu3 %v4581_v26 }
 0x3a2   :  { %v2621_v8 = vpop.f32.mrf.mxu2  ;;  %v2710_v3 = vpop.f32.mrf.mxu3 }
 0x3a3   :  { %v2711_v22 = vadd.f32 %v2710_v3, %v2621_v8  ;;  %v2445_v5 = vpop.f32.mrf.mxu0  ;;  %v2534_v37 = vpop.f32.mrf.mxu1 }
 0x3a4   :  { %v2535_v41 = vadd.f32 %v2534_v37, %v2445_v5 }
 0x3a5   :  { %2837 = vst [vmem:[#allocation11 + $0x268] sm:$0xff] %v2711_v22 }
 0x3a6   :  { %2842 = vst [vmem:[#allocation11 + $0x290] sm:$0xff] %v2535_v41 }
 0x3aa   :  { %v2623_v39 = vpop.f32.mrf.mxu2  ;;  %v2712_v7 = vpop.f32.mrf.mxu3 }
 0x3ab   :  { %v2713_v12 = vadd.f32 %v2712_v7, %v2623_v39  ;;  %v2448_v17 = vpop.f32.mrf.mxu0  ;;  %v2537_v52 = vpop.f32.mrf.mxu1 }
 0x3ac   :  { %v2538_v11 = vadd.f32 %v2537_v52, %v2448_v17 }
 0x3ad   :  { %2843 = vst [vmem:[#allocation11 + $0x298] sm:$0xff] %v2713_v12 }
 0x3ae   :  { %2848 = vst [vmem:[#allocation11 + $0x2c0] sm:$0xff] %v2538_v11  ;;  %2487 = vmatmul.bf16.gmra.mxu0 %v4597_v20  ;;  %2576 = vmatmul.bf16.gmra.mxu1 %v4599_v34 }
 0x3af   :  { %2665 = vmatmul.bf16.gmra.mxu2 %v4597_v20  ;;  %2754 = vmatmul.bf16.gmra.mxu3 %v4599_v34 }
 0x3b2   :  { %v2626_v27 = vpop.f32.mrf.mxu2  ;;  %v2715_v26 = vpop.f32.mrf.mxu3 }
 0x3b3   :  { %v2716_v58 = vadd.f32 %v2715_v26, %v2626_v27  ;;  %v2450_v59 = vpop.f32.mrf.mxu0  ;;  %v2539_v44 = vpop.f32.mrf.mxu1 }
 0x3b4   :  { %v2540_v30 = vadd.f32 %v2539_v44, %v2450_v59 }
 0x3b5   :  { %2849 = vst [vmem:[#allocation11 + $0x2c8] sm:$0xff] %v2716_v58 }
 0x3b6   :  { %2854 = vst [vmem:[#allocation11 + $0x2f0] sm:$0xff] %v2540_v30 }
 0x3ba   :  { %v2628_v33 = vpop.f32.mrf.mxu2  ;;  %v2717_v55 = vpop.f32.mrf.mxu3 }
 0x3bb   :  { %v2718_v21 = vadd.f32 %v2717_v55, %v2628_v33  ;;  %v2453_v40 = vpop.f32.mrf.mxu0  ;;  %v2542_v60 = vpop.f32.mrf.mxu1 }
 0x3bc   :  { %v2543_v53 = vadd.f32 %v2542_v60, %v2453_v40 }
 0x3bd   :  { %2855 = vst [vmem:[#allocation11 + $0x2f8] sm:$0xff] %v2718_v21 }
 0x3be   :  { %2860 = vst [vmem:[#allocation11 + $0x320] sm:$0xff] %v2543_v53 }
 0x3c2   :  { %v2631_v20 = vpop.f32.mrf.mxu2  ;;  %v2720_v34 = vpop.f32.mrf.mxu3 }
 0x3c3   :  { %v2721_v23 = vadd.f32 %v2720_v34, %v2631_v20  ;;  %v2455_v6 = vpop.f32.mrf.mxu0  ;;  %v2544_v2 = vpop.f32.mrf.mxu1 }
 0x3c4   :  { %v2545_v56 = vadd.f32 %v2544_v2, %v2455_v6 }
 0x3c5   :  { %2861 = vst [vmem:[#allocation11 + $0x328] sm:$0xff] %v2721_v23 }
 0x3c6   :  { %2866 = vst [vmem:[#allocation11 + $0x350] sm:$0xff] %v2545_v56 }
 0x3ca   :  { %v2633_v29 = vpop.f32.mrf.mxu2  ;;  %v2722_v31 = vpop.f32.mrf.mxu3 }
 0x3cb   :  { %v2723_v36 = vadd.f32 %v2722_v31, %v2633_v29  ;;  %v2458_v24 = vpop.f32.mrf.mxu0  ;;  %v2547_v18 = vpop.f32.mrf.mxu1 }
 0x3cc   :  { %v2548_v43 = vadd.f32 %v2547_v18, %v2458_v24 }
 0x3cd   :  { %2867 = vst [vmem:[#allocation11 + $0x358] sm:$0xff] %v2723_v36 }
 0x3ce   :  { %2872 = vst [vmem:[#allocation11 + $0x380] sm:$0xff] %v2548_v43 }
 0x3d2   :  { %v2636_v51 = vpop.f32.mrf.mxu2  ;;  %v2725_v45 = vpop.f32.mrf.mxu3 }
 0x3d3   :  { %v2726_v46 = vadd.f32 %v2725_v45, %v2636_v51  ;;  %v2460_v9 = vpop.f32.mrf.mxu0  ;;  %v2549_v61 = vpop.f32.mrf.mxu1 }
 0x3d4   :  { %v2550_v57 = vadd.f32 %v2549_v61, %v2460_v9 }
 0x3d5   :  { %2873 = vst [vmem:[#allocation11 + $0x388] sm:$0xff] %v2726_v46 }
 0x3d6   :  { %2878 = vst [vmem:[#allocation11 + $0x3b0] sm:$0xff] %v2550_v57 }
 0x3da   :  { %v2638_v32 = vpop.f32.mrf.mxu2  ;;  %v2727_v42 = vpop.f32.mrf.mxu3 }
 0x3db   :  { %v2728_v19 = vadd.f32 %v2727_v42, %v2638_v32  ;;  %v2463_v38 = vpop.f32.mrf.mxu0  ;;  %v2552_v48 = vpop.f32.mrf.mxu1 }
 0x3dc   :  { %v2553_v49 = vadd.f32 %v2552_v48, %v2463_v38 }
 0x3dd   :  { %2879 = vst [vmem:[#allocation11 + $0x3b8] sm:$0xff] %v2728_v19 }
 0x3de   :  { %2884 = vst [vmem:[#allocation11 + $0x3e0] sm:$0xff] %v2553_v49 }
 0x3e2   :  { %v2641_v62 = vpop.f32.mrf.mxu2  ;;  %v2730_v63 = vpop.f32.mrf.mxu3 }
 0x3e3   :  { %v2731_v15 = vadd.f32 %v2730_v63, %v2641_v62  ;;  %v2465_v28 = vpop.f32.mrf.mxu0  ;;  %v2554_v14 = vpop.f32.mrf.mxu1 }
 0x3e4   :  { %v2555_v16 = vadd.f32 %v2554_v14, %v2465_v28 }
 0x3e5   :  { %2885 = vst [vmem:[#allocation11 + $0x3e8] sm:$0xff] %v2731_v15 }
 0x3e6   :  { %2890 = vst [vmem:[#allocation11 + $0x410] sm:$0xff] %v2555_v16 }
 0x3ea   :  { %v2643_v0 = vpop.f32.mrf.mxu2  ;;  %v2732_v1 = vpop.f32.mrf.mxu3 }
 0x3eb   :  { %v2733_v54 = vadd.f32 %v2732_v1, %v2643_v0  ;;  %v2468_v10 = vpop.f32.mrf.mxu0  ;;  %v2557_v35 = vpop.f32.mrf.mxu1 }
 0x3ec   :  { %v2558_v47 = vadd.f32 %v2557_v35, %v2468_v10 }
 0x3ed   :  { %2891 = vst [vmem:[#allocation11 + $0x418] sm:$0xff] %v2733_v54 }
 0x3ee   :  { %2896 = vst [vmem:[#allocation11 + $0x440] sm:$0xff] %v2558_v47 }
 0x3f2   :  { %v2646_v50 = vpop.f32.mrf.mxu2  ;;  %v2735_v4 = vpop.f32.mrf.mxu3 }
 0x3f3   :  { %v2736_v25 = vadd.f32 %v2735_v4, %v2646_v50  ;;  %v2470_v13 = vpop.f32.mrf.mxu0  ;;  %v2559_v8 = vpop.f32.mrf.mxu1 }
 0x3f4   :  { %v2560_v3 = vadd.f32 %v2559_v8, %v2470_v13 }
 0x3f5   :  { %2897 = vst [vmem:[#allocation11 + $0x448] sm:$0xff] %v2736_v25 }
 0x3f6   :  { %2902 = vst [vmem:[#allocation11 + $0x470] sm:$0xff] %v2560_v3 }
 0x3fa   :  { %v2648_v22 = vpop.f32.mrf.mxu2  ;;  %v2737_v5 = vpop.f32.mrf.mxu3 }
 0x3fb   :  { %v2738_v37 = vadd.f32 %v2737_v5, %v2648_v22  ;;  %v2473_v41 = vpop.f32.mrf.mxu0  ;;  %v2562_v39 = vpop.f32.mrf.mxu1 }
 0x3fc   :  { %v2563_v7 = vadd.f32 %v2562_v39, %v2473_v41 }
 0x3fd   :  { %2903 = vst [vmem:[#allocation11 + $0x478] sm:$0xff] %v2738_v37 }
 0x3fe   :  { %2908 = vst [vmem:[#allocation11 + $0x4a0] sm:$0xff] %v2563_v7 }
 0x402   :  { %v2651_v12 = vpop.f32.mrf.mxu2  ;;  %v2740_v17 = vpop.f32.mrf.mxu3 }
 0x403   :  { %v2741_v52 = vadd.f32 %v2740_v17, %v2651_v12  ;;  %v2475_v11 = vpop.f32.mrf.mxu0  ;;  %v2564_v27 = vpop.f32.mrf.mxu1 }
 0x404   :  { %v2565_v26 = vadd.f32 %v2564_v27, %v2475_v11 }
 0x405   :  { %2909 = vst [vmem:[#allocation11 + $0x4a8] sm:$0xff] %v2741_v52 }
 0x406   :  { %2914 = vst [vmem:[#allocation11 + $0x4d0] sm:$0xff] %v2565_v26 }
 0x40a   :  { %v2653_v58 = vpop.f32.mrf.mxu2  ;;  %v2742_v59 = vpop.f32.mrf.mxu3 }
 0x40b   :  { %v2743_v44 = vadd.f32 %v2742_v59, %v2653_v58  ;;  %v2478_v30 = vpop.f32.mrf.mxu0  ;;  %v2567_v33 = vpop.f32.mrf.mxu1 }
 0x40c   :  { %v2568_v55 = vadd.f32 %v2567_v33, %v2478_v30 }
 0x40d   :  { %2915 = vst [vmem:[#allocation11 + $0x4d8] sm:$0xff] %v2743_v44 }
 0x40e   :  { %2920 = vst [vmem:[#allocation11 + $0x500] sm:$0xff] %v2568_v55 }
 0x412   :  { %v2656_v21 = vpop.f32.mrf.mxu2  ;;  %v2745_v40 = vpop.f32.mrf.mxu3 }
 0x413   :  { %v2746_v60 = vadd.f32 %v2745_v40, %v2656_v21  ;;  %v2480_v53 = vpop.f32.mrf.mxu0  ;;  %v2569_v20 = vpop.f32.mrf.mxu1 }
 0x414   :  { %v2570_v34 = vadd.f32 %v2569_v20, %v2480_v53 }
 0x415   :  { %2921 = vst [vmem:[#allocation11 + $0x508] sm:$0xff] %v2746_v60 }
 0x416   :  { %2926 = vst [vmem:[#allocation11 + $0x530] sm:$0xff] %v2570_v34 }
 0x41a   :  { %v2658_v23 = vpop.f32.mrf.mxu2  ;;  %v2747_v6 = vpop.f32.mrf.mxu3 }
 0x41b   :  { %v2748_v2 = vadd.f32 %v2747_v6, %v2658_v23  ;;  %v2483_v56 = vpop.f32.mrf.mxu0  ;;  %v2572_v29 = vpop.f32.mrf.mxu1 }
 0x41c   :  { %v2573_v31 = vadd.f32 %v2572_v29, %v2483_v56 }
 0x41d   :  { %2927 = vst [vmem:[#allocation11 + $0x538] sm:$0xff] %v2748_v2 }
 0x41e   :  { %2932 = vst [vmem:[#allocation11 + $0x560] sm:$0xff] %v2573_v31 }
 0x422   :  { %v2661_v36 = vpop.f32.mrf.mxu2  ;;  %v2750_v24 = vpop.f32.mrf.mxu3 }
 0x423   :  { %v2751_v18 = vadd.f32 %v2750_v24, %v2661_v36  ;;  %v2485_v43 = vpop.f32.mrf.mxu0  ;;  %v2574_v51 = vpop.f32.mrf.mxu1 }
 0x424   :  { %v2575_v45 = vadd.f32 %v2574_v51, %v2485_v43 }
 0x425   :  { %2933 = vst [vmem:[#allocation11 + $0x568] sm:$0xff] %v2751_v18 }
 0x426   :  { %2938 = vst [vmem:[#allocation11 + $0x590] sm:$0xff] %v2575_v45 }
 0x42a   :  { %v2663_v46 = vpop.f32.mrf.mxu2  ;;  %v2752_v9 = vpop.f32.mrf.mxu3 }
 0x42b   :  { %v2753_v61 = vadd.f32 %v2752_v9, %v2663_v46  ;;  %v2488_v57 = vpop.f32.mrf.mxu0  ;;  %v2577_v32 = vpop.f32.mrf.mxu1 }
 0x42c   :  { %v2578_v42 = vadd.f32 %v2577_v32, %v2488_v57 }
 0x42d   :  { %2939 = vst [vmem:[#allocation11 + $0x598] sm:$0xff] %v2753_v61 }
 0x42e   :  { %2944 = vst [vmem:[#allocation11 + $0x5c0] sm:$0xff] %v2578_v42 }
 0x432   :  { %v2666_v19 = vpop.f32.mrf.mxu2  ;;  %v2755_v38 = vpop.f32.mrf.mxu3 }
 0x433   :  { %v2756_v48 = vadd.f32 %v2755_v38, %v2666_v19  ;;  %v2490_v49 = vpop.f32.mrf.mxu0  ;;  %v2579_v62 = vpop.f32.mrf.mxu1 }
 0x434   :  { %v2580_v63 = vadd.f32 %v2579_v62, %v2490_v49 }
 0x435   :  { %2945 = vst [vmem:[#allocation11 + $0x5c8] sm:$0xff] %v2756_v48 }
 0x436   :  { %2950 = vst [vmem:[#allocation11 + $0x5f0] sm:$0xff] %v2580_v63 }
 0x43a   :  { %v2668_v15 = vpop.f32.mrf.mxu2  ;;  %v2757_v28 = vpop.f32.mrf.mxu3 }
 0x43b   :  { %v2758_v14 = vadd.f32 %v2757_v28, %v2668_v15 }
 0x43d   :  { %2951 = vst [vmem:[#allocation11 + $0x5f8] sm:$0xff] %v2758_v14 }
 0x43e   :  { %2977 = dma.vmem_to_hbm [thread:$0]  %s2970_s19, 24576, %s2972_s22, [#allocation12], %s3766_s23, %s3766_s23, %s3767_s24  }
 0x43f   :  { %3751 = dma.done.wait [#allocation4], 8192  }
 0x440   :  { %3752 = vsyncadd [#allocation4], 4294959104 }
 0x441   :  { %3753 = dma.done.wait [#allocation12], 24576  }
 0x442   :  { %3754 = vsyncadd [#allocation12], 4294942720 }
 0x443   :  { %2986 = vsyncpa [#allocation3], 1 }
 0x444   :  { %2987 = vsyncpa [#allocation8], 1 }
 0x445   :  { %2988 = vsyncpa [#allocation4], 1 }
 0x446   :  { %2989 = vsyncpa [#allocation12], 1 }
 0x447   :  { %2990 = vsyncpa [#allocation5], 1 }

</bundles_post_ra>
